<compile_context>
chip_gen: v7x
topology: tpu7x:2x2x1
jax: 0.10.0
libtpu: 0.0.40
codegen_flags: <defaults>
</compile_context>

<pallas_src>
import functools

import jax
import jax.numpy as jnp
from jax.experimental import pallas as pl
from jax.experimental.pallas import tpu as pltpu

# Python float, NOT a jnp array (jnp module-level constants become captured
# constants inside pallas kernels and break tracing).
NEG_INF = -1e30

_VMEM_LIMIT = 48 * 1024 * 1024  # headroom below v7x's 64 MiB/TC; raise on v5e/v6e


def _round_up(x, m):
    return ((x + m - 1) // m) * m


# ---------------------------------------------------------------------------
# Kernel 1: fused ReLU + linear projection + per-node attention coefficients
#           (+ per-head ones-column augmentation of h for the denominator fold).
# ---------------------------------------------------------------------------
def _project_kernel(x_ref, w_ref, att_mat_ref, h_ref, a_ref, *, heads, channels):
    # ReLU fused with the projection (relu1 / relu2 of SKIPGAT).
    x = jnp.maximum(x_ref[...], 0.0).astype(jnp.bfloat16)
    # GATConv.lin (no bias): bf16 MXU matmul, f32 accumulation.
    hh = jnp.dot(x, w_ref[...], preferred_element_type=jnp.float32)  # [T, H*C]
    hh_bf = hh.astype(jnp.bfloat16)
    # Per-node attention coefficients with ONE small MXU matmul instead of 2H
    # cross-lane reductions: A[head*C + c, head] = att_dst[head, c],
    #                        A[head*C + c, H + head] = att_src[head, c].
    a_ref[...] = jnp.dot(hh_bf, att_mat_ref[...],
                         preferred_element_type=jnp.float32)         # [T, 2H]
    # Augment each head's slice with a trailing all-ones column so the O(N^2)
    # attention kernel gets aggregation AND softmax denominator from one matmul.
    tile = x_ref.shape[0]
    ones = jnp.ones((tile, 1), jnp.bfloat16)
    parts = []
    for head in range(heads):
        parts.append(hh_bf[:, head * channels:(head + 1) * channels])
        parts.append(ones)
    h_ref[...] = jnp.concatenate(parts, axis=1)                      # [T, H*(C+1)]


def _project(x, w_bf16, att_mat_bf16, *, heads, channels, tile_n):
    n, f_in = x.shape
    hc = heads * channels
    hc_aug = heads * (channels + 1)
    kernel = functools.partial(_project_kernel, heads=heads, channels=channels)
    return pl.pallas_call(
        kernel,
        out_shape=(jax.ShapeDtypeStruct((n, hc_aug), jnp.bfloat16),
                   jax.ShapeDtypeStruct((n, 2 * heads), jnp.float32)),
        grid_spec=pltpu.PrefetchScalarGridSpec(
            num_scalar_prefetch=0,
            grid=(n // tile_n,),
            in_specs=[
                pl.BlockSpec((tile_n, f_in), lambda i: (i, 0)),        # x tile
                pl.BlockSpec((f_in, hc), lambda i: (0, 0)),            # W (bf16)
                pl.BlockSpec((hc, 2 * heads), lambda i: (0, 0)),       # att matrix
            ],
            out_specs=[
                pl.BlockSpec((tile_n, hc_aug), lambda i: (i, 0)),      # h_aug (bf16)
                pl.BlockSpec((tile_n, 2 * heads), lambda i: (i, 0)),   # a coeffs
            ],
        ),
        compiler_params=pltpu.CompilerParams(
            dimension_semantics=("parallel",),
            vmem_limit_bytes=_VMEM_LIMIT),
    )(x, w_bf16, att_mat_bf16)


# ---------------------------------------------------------------------------
# Kernel 2: row-tiled attention (logits, masked softmax, aggregation, bias,
#           optional fused residual).  Only the O(N^2) work lives here.
# ---------------------------------------------------------------------------
def _attn_kernel(a_dst_ref, a_src_t_ref, h_ref, adj_ref, bias_ref, *rest,
                 heads, channels, has_residual):
    if has_residual:
        res_ref, out_ref = rest
    else:
        (out_ref,) = rest

    # Boolean edge mask, hoisted ONCE per tile (no [T, N] f32 additive-mask
    # temporary).  adj is int8: adj[i, j] != 0  iff edge j -> i.
    mask = adj_ref[...] != 0                                 # [T, N] bool

    h_aug = h_ref[...]        # [N, H*(C+1)] bf16; last column of each head = 1
    a_dst = a_dst_ref[...]    # [T, H]   f32  (destination tile)
    a_src_t = a_src_t_ref[...]  # [H, N] f32  (all source nodes, resident)

    cw = channels + 1
    head_outs = []
    for head in range(heads):  # static unroll over heads
        # e[i, j] = LeakyReLU(a_dst[i] + a_src[j]) for edge j -> i, -inf else.
        # Masking and LeakyReLU(0.2) fused into a single jnp.where pass.
        e = a_dst[:, head:head + 1] + a_src_t[head:head + 1, :]        # [T, N]
        e = jnp.where(mask, jnp.maximum(e, 0.2 * e), NEG_INF)
        # Softmax over incoming edges; masked entries underflow to 0 after exp.
        e_max = jnp.max(e, axis=1, keepdims=True)
        p = jnp.exp(e - e_max).astype(jnp.bfloat16)                    # [T, N]
        # One MXU pass yields BOTH the aggregation and the softmax denominator
        # (the trailing ones column of this head's h slice).
        agg = jnp.dot(p, h_aug[:, head * cw:(head + 1) * cw],
                      preferred_element_type=jnp.float32)              # [T, C+1]
        denom = agg[:, channels:channels + 1]                          # [T, 1]
        head_outs.append(agg[:, :channels] / denom)                    # exact divide
    # TODO(synk): attention dropout (training-only) omitted - eval semantics.
    out = jnp.concatenate(head_outs, axis=1) + bias_ref[...]           # [T, H*C]
    if has_residual:
        out = out + res_ref[...]                                       # fused skip
    out_ref[...] = out.astype(out_ref.dtype)                           # one store


def _attention(a_dst, a_src_t, h_aug_bf16, adj_i8, bias, residual, *, heads,
               channels, tile_n, out_dtype):
    n = adj_i8.shape[0]
    hc = heads * channels
    hc_aug = heads * (channels + 1)
    has_residual = residual is not None
    kernel = functools.partial(_attn_kernel, heads=heads, channels=channels,
                               has_residual=has_residual)
    in_specs = [
        pl.BlockSpec((tile_n, heads), lambda i: (i, 0)),   # a_dst tile
        pl.BlockSpec((heads, n), lambda i: (0, 0)),        # a_src^T (all sources)
        pl.BlockSpec((n, hc_aug), lambda i: (0, 0)),       # h_aug (all sources)
        pl.BlockSpec((tile_n, n), lambda i: (i, 0)),       # adj tile (int8)
        pl.BlockSpec((1, hc), lambda i: (0, 0)),           # bias
    ]
    args = [a_dst, a_src_t, h_aug_bf16, adj_i8, bias]
    if has_residual:
        in_specs.append(pl.BlockSpec((tile_n, hc), lambda i: (i, 0)))
        args.append(residual)
    cost = pl.CostEstimate(                                # advisory for XLA
        flops=int(2 * n * n * heads * (channels + 1) + 6 * n * n * heads),
        transcendentals=int(n * n * heads),
        bytes_accessed=int(n * n + 2 * n * hc_aug + 4 * n * hc + 4 * n * 3 * heads),
    )
    return pl.pallas_call(
        kernel,
        out_shape=jax.ShapeDtypeStruct((n, hc), out_dtype),
        grid_spec=pltpu.PrefetchScalarGridSpec(
            num_scalar_prefetch=0,
            grid=(n // tile_n,),
            in_specs=in_specs,
            out_specs=pl.BlockSpec((tile_n, hc), lambda i: (i, 0)),
        ),
        compiler_params=pltpu.CompilerParams(
            dimension_semantics=("parallel",),
            vmem_limit_bytes=_VMEM_LIMIT),
        cost_estimate=cost,
    )(*args)


def _build_att_matrix(att_src, att_dst, heads, channels):
    """[H*C, 2H] block matrix so a = h @ A gives (dst coeffs | src coeffs)."""
    a = jnp.zeros((heads * channels, 2 * heads), jnp.float32)
    for h in range(heads):
        a = a.at[h * channels:(h + 1) * channels, h].set(att_dst[h])
        a = a.at[h * channels:(h + 1) * channels, heads + h].set(att_src[h])
    return a.astype(jnp.bfloat16)


def gat_conv(x, adj_i8, w, att_src, att_dst, bias, residual=None, *, heads,
             channels, tile_n, out_dtype=jnp.float32):
    """Fused ReLU + GATConv (+ optional residual add) over a dense adjacency."""
    att_mat = _build_att_matrix(att_src, att_dst, heads, channels)
    h_aug, a = _project(x, w.astype(jnp.bfloat16), att_mat,
                        heads=heads, channels=channels, tile_n=tile_n)
    a_dst = a[:, :heads]        # [N, H]  destination coefficients
    a_src_t = a[:, heads:].T    # [H, N]  tiny XLA transpose, O(N*H)
    return _attention(a_dst, a_src_t, h_aug, adj_i8, bias, residual,
                      heads=heads, channels=channels, tile_n=tile_n,
                      out_dtype=out_dtype)


def skipgat_forward(params, x, adj_i8, *, in_features, hidden_features, heads,
                    tile_n=128):
    # hidden = conv1(relu1(x));  ReLU fused into the projection kernel.
    # Layer-1 output in bf16: layer 2 ReLUs + casts to bf16 anyway, and this
    # halves the inter-layer HBM traffic.
    h = gat_conv(x, adj_i8, params["w1"], params["att_src1"], params["att_dst1"],
                 params["b1"], heads=heads, channels=hidden_features,
                 tile_n=tile_n, out_dtype=jnp.bfloat16)
    # out = conv2(relu2(hidden)) + x;  ReLU + skip connection fused, f32 out.
    return gat_conv(h, adj_i8, params["w2"], params["att_src2"],
                    params["att_dst2"], params["b2"], residual=x, heads=heads,
                    channels=in_features // heads, tile_n=tile_n,
                    out_dtype=jnp.float32)


def init_skipgat_params(key, in_features, hidden_features, heads):
    c1 = hidden_features
    c2 = in_features // heads
    ks = jax.random.split(key, 8)
    scale = 0.1
    return dict(
        w1=scale * jax.random.normal(ks[0], (in_features, heads * c1), jnp.float32),
        att_src1=scale * jax.random.normal(ks[1], (heads, c1), jnp.float32),
        att_dst1=scale * jax.random.normal(ks[2], (heads, c1), jnp.float32),
        b1=scale * jax.random.normal(ks[3], (1, heads * c1), jnp.float32),
        w2=scale * jax.random.normal(ks[4], (heads * c1, heads * c2), jnp.float32),
        att_src2=scale * jax.random.normal(ks[5], (heads, c2), jnp.float32),
        att_dst2=scale * jax.random.normal(ks[6], (heads, c2), jnp.float32),
        b2=scale * jax.random.normal(ks[7], (1, heads * c2), jnp.float32),
    )


def build_adjacency(edge_index, num_nodes, num_padded):
    # adj[i, j] = 1 iff edge j -> i, plus self-loops on every row (incl. padded
    # rows, so each softmax row has >= 1 entry).  Matches add_self_loops=True.
    # TODO(synk): duplicate edges in edge_index are deduped by the dense
    # adjacency; PyG would count parallel edges multiple times in the softmax.
    src, dst = edge_index[0], edge_index[1]
    adj = jnp.zeros((num_padded, num_padded), jnp.int8)
    adj = adj.at[dst, src].set(1)
    diag = jnp.arange(num_padded)
    adj = adj.at[diag, diag].set(1)
    return adj


if __name__ == "__main__":
    IN_FEATURES = 8
    HIDDEN_FEATURES = 16
    HEADS = 2
    N_NODES = 200
    N_EDGES = 800
    TILE_N = 128  # v6e/v5e: 256-512 amortizes grid-step overhead better.

    key = jax.random.PRNGKey(0)
    k_x, k_src, k_dst, k_params = jax.random.split(key, 4)

    x = jax.random.normal(k_x, (N_NODES, IN_FEATURES), jnp.float32)
    edge_index = jnp.stack([
        jax.random.randint(k_src, (N_EDGES,), 0, N_NODES),
        jax.random.randint(k_dst, (N_EDGES,), 0, N_NODES),
    ])  # [2, E]  (row 0 = source nodes, row 1 = destination nodes)

    # Pad the node dimension to a multiple of TILE_N (row grid requirement).
    # Padded rows only carry a self-loop and zero features -> real rows are
    # numerically unaffected.
    n_pad = _round_up(N_NODES, TILE_N)
    x_pad = jnp.zeros((n_pad, IN_FEATURES), jnp.float32).at[:N_NODES].set(x)
    adj = build_adjacency(edge_index, N_NODES, n_pad)
    params = init_skipgat_params(k_params, IN_FEATURES, HIDDEN_FEATURES, HEADS)

    # TODO(synk): edge_attribute / edge_dim path not exercised (edge_features is
    # None in this instantiation), so lin_edge / att_edge are omitted.
    fwd = jax.jit(functools.partial(
        skipgat_forward, in_features=IN_FEATURES,
        hidden_features=HIDDEN_FEATURES, heads=HEADS, tile_n=TILE_N))
    out_pad = jax.block_until_ready(fwd(params, x_pad, adj))
    out = out_pad[:N_NODES]

    assert out.shape == (N_NODES, IN_FEATURES)
    assert bool(jnp.all(jnp.isfinite(out)))
    print("KERNEL_OK")
</pallas_src>

<mosaic_0001>
module attributes {stable_mosaic.version = 11 : i64} {
  func.func @_project_kernel(%arg0: i32, %arg1: memref<128x8xf32, #tpu.memory_space<vmem>>, %arg2: memref<8x32xbf16, #tpu.memory_space<vmem>>, %arg3: memref<32x4xbf16, #tpu.memory_space<vmem>>, %arg4: memref<128x34xbf16, #tpu.memory_space<vmem>>, %arg5: memref<128x4xf32, #tpu.memory_space<vmem>>) attributes {dimension_semantics = [#tpu.dimension_semantics<parallel>], iteration_bounds = array<i64: 2>, scalar_prefetch = 0 : i64, scratch_operands = 0 : i64, tpu.core_type = #tpu.core_type<tc>, window_params = [{transform_indices = @transform_0, window_bounds = array<i64: 128, 8>}, {pipeline_mode = #tpu.pipeline_mode<synchronous>, transform_indices = @transform_1, window_bounds = array<i64: 8, 32>}, {pipeline_mode = #tpu.pipeline_mode<synchronous>, transform_indices = @transform_2, window_bounds = array<i64: 32, 4>}, {transform_indices = @transform_3, window_bounds = array<i64: 128, 34>}, {transform_indices = @transform_4, window_bounds = array<i64: 128, 4>}]} {
    %c0 = arith.constant 0 : index
    %c0_0 = arith.constant 0 : index
    %0 = vector.load %arg1[%c0, %c0_0] : memref<128x8xf32, #tpu.memory_space<vmem>>, vector<128x8xf32>
    %cst = arith.constant 0.000000e+00 : f32
    %1 = vector.broadcast %cst : f32 to vector<128x8xf32>
    %2 = arith.maximumf %0, %1 : vector<128x8xf32>
    %3 = arith.truncf %2 : vector<128x8xf32> to vector<128x8xbf16>
    %c0_1 = arith.constant 0 : index
    %c0_2 = arith.constant 0 : index
    %4 = vector.load %arg2[%c0_1, %c0_2] : memref<8x32xbf16, #tpu.memory_space<vmem>>, vector<8x32xbf16>
    %cst_3 = arith.constant dense<0.000000e+00> : vector<128x32xf32>
    %5 = tpu.matmul %3, %4, %cst_3 {dimension_numbers = #tpu.dot_dimension_numbers<[1], [0], [0], [1], [0, 0, 1, 1], [], []>} : vector<128x8xbf16>, vector<8x32xbf16>, vector<128x32xf32> -> vector<128x32xf32>
    %6 = arith.truncf %5 : vector<128x32xf32> to vector<128x32xbf16>
    %c0_4 = arith.constant 0 : index
    %c0_5 = arith.constant 0 : index
    %7 = vector.load %arg3[%c0_4, %c0_5] : memref<32x4xbf16, #tpu.memory_space<vmem>>, vector<32x4xbf16>
    %cst_6 = arith.constant dense<0.000000e+00> : vector<128x4xf32>
    %8 = tpu.matmul %6, %7, %cst_6 {dimension_numbers = #tpu.dot_dimension_numbers<[1], [0], [0], [1], [0, 0, 1, 1], [], []>} : vector<128x32xbf16>, vector<32x4xbf16>, vector<128x4xf32> -> vector<128x4xf32>
    %c0_7 = arith.constant 0 : index
    %c0_8 = arith.constant 0 : index
    %9 = vector.load %arg5[%c0_7, %c0_8] : memref<128x4xf32, #tpu.memory_space<vmem>>, vector<128x4xf32>
    tpu.vector_store %arg5[%c0_7, %c0_8], %8 {strides = array<i32>} : memref<128x4xf32, #tpu.memory_space<vmem>>, vector<128x4xf32>,
    %cst_9 = arith.constant 1.000000e+00 : bf16
    %10 = vector.broadcast %cst_9 : bf16 to vector<128x1xbf16>
    %11 = vector.extract_strided_slice %6 {offsets = [0, 0], sizes = [128, 16], strides = [1, 1]} : vector<128x32xbf16> to vector<128x16xbf16>
    %12 = vector.extract_strided_slice %6 {offsets = [0, 16], sizes = [128, 16], strides = [1, 1]} : vector<128x32xbf16> to vector<128x16xbf16>
    %13 = tpu.concatenate %11, %10, %12, %10 in 1 : vector<128x16xbf16>, vector<128x1xbf16>, vector<128x16xbf16>, vector<128x1xbf16> -> vector<128x34xbf16>
    %c0_10 = arith.constant 0 : index
    %c0_11 = arith.constant 0 : index
    %14 = vector.load %arg4[%c0_10, %c0_11] : memref<128x34xbf16, #tpu.memory_space<vmem>>, vector<128x34xbf16>
    tpu.vector_store %arg4[%c0_10, %c0_11], %13 {strides = array<i32>} : memref<128x34xbf16, #tpu.memory_space<vmem>>, vector<128x34xbf16>,
    return
  }
  func.func @transform_0(%arg0: i32) -> (i32, i32) {
    %c0_i32 = arith.constant 0 : i32
    %c0_i32_0 = arith.constant 0 : i32
    return %arg0, %c0_i32 : i32, i32
  }
  func.func @transform_1(%arg0: i32) -> (i32, i32) {
    %c0_i32 = arith.constant 0 : i32
    %c0_i32_0 = arith.constant 0 : i32
    %c0_i32_1 = arith.constant 0 : i32
    return %c0_i32, %c0_i32_0 : i32, i32
  }
  func.func @transform_2(%arg0: i32) -> (i32, i32) {
    %c0_i32 = arith.constant 0 : i32
    %c0_i32_0 = arith.constant 0 : i32
    %c0_i32_1 = arith.constant 0 : i32
    return %c0_i32, %c0_i32_0 : i32, i32
  }
  func.func @transform_3(%arg0: i32) -> (i32, i32) {
    %c0_i32 = arith.constant 0 : i32
    %c0_i32_0 = arith.constant 0 : i32
    return %arg0, %c0_i32 : i32, i32
  }
  func.func @transform_4(%arg0: i32) -> (i32, i32) {
    %c0_i32 = arith.constant 0 : i32
    %c0_i32_0 = arith.constant 0 : i32
    return %arg0, %c0_i32 : i32, i32
  }
}

module attributes {stable_mosaic.version = 11 : i64} {
  func.func @_attn_kernel(%arg0: i32, %arg1: memref<128x2xf32, #tpu.memory_space<vmem>>, %arg2: memref<2x256xf32, #tpu.memory_space<vmem>>, %arg3: memref<256x34xbf16, #tpu.memory_space<vmem>>, %arg4: memref<128x256xi8, #tpu.memory_space<vmem>>, %arg5: memref<1x32xf32, #tpu.memory_space<vmem>>, %arg6: memref<128x32xbf16, #tpu.memory_space<vmem>>) attributes {dimension_semantics = [#tpu.dimension_semantics<parallel>], iteration_bounds = array<i64: 2>, scalar_prefetch = 0 : i64, scratch_operands = 0 : i64, tpu.core_type = #tpu.core_type<tc>, window_params = [{transform_indices = @transform_0, window_bounds = array<i64: 128, 2>}, {pipeline_mode = #tpu.pipeline_mode<synchronous>, transform_indices = @transform_1, window_bounds = array<i64: 2, 256>}, {pipeline_mode = #tpu.pipeline_mode<synchronous>, transform_indices = @transform_2, window_bounds = array<i64: 256, 34>}, {transform_indices = @transform_3, window_bounds = array<i64: 128, 256>}, {pipeline_mode = #tpu.pipeline_mode<synchronous>, transform_indices = @transform_4, window_bounds = array<i64: 1, 32>}, {transform_indices = @transform_5, window_bounds = array<i64: 128, 32>}]} {
    %c0 = arith.constant 0 : index
    %c0_0 = arith.constant 0 : index
    %0 = vector.load %arg4[%c0, %c0_0] : memref<128x256xi8, #tpu.memory_space<vmem>>, vector<128x256xi8>
    %c0_i8 = arith.constant 0 : i8
    %1 = vector.broadcast %c0_i8 : i8 to vector<128x256xi8>
    %2 = arith.cmpi ne, %0, %1 : vector<128x256xi8>
    %c0_1 = arith.constant 0 : index
    %c0_2 = arith.constant 0 : index
    %3 = vector.load %arg3[%c0_1, %c0_2] : memref<256x34xbf16, #tpu.memory_space<vmem>>, vector<256x34xbf16>
    %c0_3 = arith.constant 0 : index
    %c0_4 = arith.constant 0 : index
    %4 = vector.load %arg1[%c0_3, %c0_4] : memref<128x2xf32, #tpu.memory_space<vmem>>, vector<128x2xf32>
    %c0_5 = arith.constant 0 : index
    %c0_6 = arith.constant 0 : index
    %5 = vector.load %arg2[%c0_5, %c0_6] : memref<2x256xf32, #tpu.memory_space<vmem>>, vector<2x256xf32>
    %6 = vector.extract_strided_slice %4 {offsets = [0, 0], sizes = [128, 1], strides = [1, 1]} : vector<128x2xf32> to vector<128x1xf32>
    %7 = vector.extract_strided_slice %5 {offsets = [0, 0], sizes = [1, 256], strides = [1, 1]} : vector<2x256xf32> to vector<1x256xf32>
    %8 = vector.broadcast %6 : vector<128x1xf32> to vector<128x256xf32>
    %9 = vector.broadcast %7 : vector<1x256xf32> to vector<128x256xf32>
    %10 = arith.addf %8, %9 : vector<128x256xf32>
    %cst = arith.constant 2.000000e-01 : f32
    %11 = vector.broadcast %cst : f32 to vector<128x256xf32>
    %12 = arith.mulf %11, %10 : vector<128x256xf32>
    %13 = arith.maximumf %10, %12 : vector<128x256xf32>
    %cst_7 = arith.constant -1.000000e+30 : f32
    %14 = vector.broadcast %cst_7 : f32 to vector<128x256xf32>
    %15 = arith.select %2, %13, %14 : vector<128x256xi1>, vector<128x256xf32>
    %cst_8 = arith.constant dense<0xFF800000> : vector<128xf32>
    %16 = vector.multi_reduction <maximumf>, %15, %cst_8 [1] : vector<128x256xf32> to vector<128xf32>
    %17 = vector.shape_cast %16 : vector<128xf32> to vector<128x1xf32>
    %18 = vector.broadcast %17 : vector<128x1xf32> to vector<128x256xf32>
    %19 = arith.subf %15, %18 : vector<128x256xf32>
    %20 = math.exp %19 : vector<128x256xf32>
    %21 = arith.truncf %20 : vector<128x256xf32> to vector<128x256xbf16>
    %22 = vector.extract_strided_slice %3 {offsets = [0, 0], sizes = [256, 17], strides = [1, 1]} : vector<256x34xbf16> to vector<256x17xbf16>
    %cst_9 = arith.constant dense<0.000000e+00> : vector<128x17xf32>
    %23 = tpu.matmul %21, %22, %cst_9 {dimension_numbers = #tpu.dot_dimension_numbers<[1], [0], [0], [1], [0, 0, 1, 1], [], []>} : vector<128x256xbf16>, vector<256x17xbf16>, vector<128x17xf32> -> vector<128x17xf32>
    %24 = vector.extract_strided_slice %23 {offsets = [0, 16], sizes = [128, 1], strides = [1, 1]} : vector<128x17xf32> to vector<128x1xf32>
    %25 = vector.extract_strided_slice %23 {offsets = [0, 0], sizes = [128, 16], strides = [1, 1]} : vector<128x17xf32> to vector<128x16xf32>
    %26 = vector.broadcast %24 : vector<128x1xf32> to vector<128x16xf32>
    %27 = arith.divf %25, %26 : vector<128x16xf32>
    %28 = vector.extract_strided_slice %4 {offsets = [0, 1], sizes = [128, 1], strides = [1, 1]} : vector<128x2xf32> to vector<128x1xf32>
    %29 = vector.extract_strided_slice %5 {offsets = [1, 0], sizes = [1, 256], strides = [1, 1]} : vector<2x256xf32> to vector<1x256xf32>
    %30 = vector.broadcast %28 : vector<128x1xf32> to vector<128x256xf32>
    %31 = vector.broadcast %29 : vector<1x256xf32> to vector<128x256xf32>
    %32 = arith.addf %30, %31 : vector<128x256xf32>
    %cst_10 = arith.constant 2.000000e-01 : f32
    %33 = vector.broadcast %cst_10 : f32 to vector<128x256xf32>
    %34 = arith.mulf %33, %32 : vector<128x256xf32>
    %35 = arith.maximumf %32, %34 : vector<128x256xf32>
    %cst_11 = arith.constant -1.000000e+30 : f32
    %36 = vector.broadcast %cst_11 : f32 to vector<128x256xf32>
    %37 = arith.select %2, %35, %36 : vector<128x256xi1>, vector<128x256xf32>
    %cst_12 = arith.constant dense<0xFF800000> : vector<128xf32>
    %38 = vector.multi_reduction <maximumf>, %37, %cst_12 [1] : vector<128x256xf32> to vector<128xf32>
    %39 = vector.shape_cast %38 : vector<128xf32> to vector<128x1xf32>
    %40 = vector.broadcast %39 : vector<128x1xf32> to vector<128x256xf32>
    %41 = arith.subf %37, %40 : vector<128x256xf32>
    %42 = math.exp %41 : vector<128x256xf32>
    %43 = arith.truncf %42 : vector<128x256xf32> to vector<128x256xbf16>
    %44 = vector.extract_strided_slice %3 {offsets = [0, 17], sizes = [256, 17], strides = [1, 1]} : vector<256x34xbf16> to vector<256x17xbf16>
    %cst_13 = arith.constant dense<0.000000e+00> : vector<128x17xf32>
    %45 = tpu.matmul %43, %44, %cst_13 {dimension_numbers = #tpu.dot_dimension_numbers<[1], [0], [0], [1], [0, 0, 1, 1], [], []>} : vector<128x256xbf16>, vector<256x17xbf16>, vector<128x17xf32> -> vector<128x17xf32>
    %46 = vector.extract_strided_slice %45 {offsets = [0, 16], sizes = [128, 1], strides = [1, 1]} : vector<128x17xf32> to vector<128x1xf32>
    %47 = vector.extract_strided_slice %45 {offsets = [0, 0], sizes = [128, 16], strides = [1, 1]} : vector<128x17xf32> to vector<128x16xf32>
    %48 = vector.broadcast %46 : vector<128x1xf32> to vector<128x16xf32>
    %49 = arith.divf %47, %48 : vector<128x16xf32>
    %50 = tpu.concatenate %27, %49 in 1 : vector<128x16xf32>, vector<128x16xf32> -> vector<128x32xf32>
    %c0_14 = arith.constant 0 : index
    %c0_15 = arith.constant 0 : index
    %51 = vector.load %arg5[%c0_14, %c0_15] : memref<1x32xf32, #tpu.memory_space<vmem>>, vector<1x32xf32>
    %52 = vector.broadcast %51 : vector<1x32xf32> to vector<128x32xf32>
    %53 = arith.addf %50, %52 : vector<128x32xf32>
    %54 = arith.truncf %53 : vector<128x32xf32> to vector<128x32xbf16>
    %c0_16 = arith.constant 0 : index
    %c0_17 = arith.constant 0 : index
    %55 = vector.load %arg6[%c0_16, %c0_17] : memref<128x32xbf16, #tpu.memory_space<vmem>>, vector<128x32xbf16>
    tpu.vector_store %arg6[%c0_16, %c0_17], %54 {strides = array<i32>} : memref<128x32xbf16, #tpu.memory_space<vmem>>, vector<128x32xbf16>,
    return
  }
  func.func @transform_0(%arg0: i32) -> (i32, i32) {
    %c0_i32 = arith.constant 0 : i32
    %c0_i32_0 = arith.constant 0 : i32
    return %arg0, %c0_i32 : i32, i32
  }
  func.func @transform_1(%arg0: i32) -> (i32, i32) {
    %c0_i32 = arith.constant 0 : i32
    %c0_i32_0 = arith.constant 0 : i32
    %c0_i32_1 = arith.constant 0 : i32
    return %c0_i32, %c0_i32_0 : i32, i32
  }
  func.func @transform_2(%arg0: i32) -> (i32, i32) {
    %c0_i32 = arith.constant 0 : i32
    %c0_i32_0 = arith.constant 0 : i32
    %c0_i32_1 = arith.constant 0 : i32
    return %c0_i32, %c0_i32_0 : i32, i32
  }
  func.func @transform_3(%arg0: i32) -> (i32, i32) {
    %c0_i32 = arith.constant 0 : i32
    %c0_i32_0 = arith.constant 0 : i32
    return %arg0, %c0_i32 : i32, i32
  }
  func.func @transform_4(%arg0: i32) -> (i32, i32) {
    %c0_i32 = arith.constant 0 : i32
    %c0_i32_0 = arith.constant 0 : i32
    %c0_i32_1 = arith.constant 0 : i32
    return %c0_i32, %c0_i32_0 : i32, i32
  }
  func.func @transform_5(%arg0: i32) -> (i32, i32) {
    %c0_i32 = arith.constant 0 : i32
    %c0_i32_0 = arith.constant 0 : i32
    return %arg0, %c0_i32 : i32, i32
  }
}

module attributes {stable_mosaic.version = 11 : i64} {
  func.func @_project_kernel(%arg0: i32, %arg1: memref<128x32xbf16, #tpu.memory_space<vmem>>, %arg2: memref<32x8xbf16, #tpu.memory_space<vmem>>, %arg3: memref<8x4xbf16, #tpu.memory_space<vmem>>, %arg4: memref<128x10xbf16, #tpu.memory_space<vmem>>, %arg5: memref<128x4xf32, #tpu.memory_space<vmem>>) attributes {dimension_semantics = [#tpu.dimension_semantics<parallel>], iteration_bounds = array<i64: 2>, scalar_prefetch = 0 : i64, scratch_operands = 0 : i64, tpu.core_type = #tpu.core_type<tc>, window_params = [{transform_indices = @transform_0, window_bounds = array<i64: 128, 32>}, {pipeline_mode = #tpu.pipeline_mode<synchronous>, transform_indices = @transform_1, window_bounds = array<i64: 32, 8>}, {pipeline_mode = #tpu.pipeline_mode<synchronous>, transform_indices = @transform_2, window_bounds = array<i64: 8, 4>}, {transform_indices = @transform_3, window_bounds = array<i64: 128, 10>}, {transform_indices = @transform_4, window_bounds = array<i64: 128, 4>}]} {
    %c0 = arith.constant 0 : index
    %c0_0 = arith.constant 0 : index
    %0 = vector.load %arg1[%c0, %c0_0] : memref<128x32xbf16, #tpu.memory_space<vmem>>, vector<128x32xbf16>
    %cst = arith.constant 0.000000e+00 : bf16
    %1 = vector.broadcast %cst : bf16 to vector<128x32xbf16>
    %2 = arith.maximumf %0, %1 : vector<128x32xbf16>
    %c0_1 = arith.constant 0 : index
    %c0_2 = arith.constant 0 : index
    %3 = vector.load %arg2[%c0_1, %c0_2] : memref<32x8xbf16, #tpu.memory_space<vmem>>, vector<32x8xbf16>
    %cst_3 = arith.constant dense<0.000000e+00> : vector<128x8xf32>
    %4 = tpu.matmul %2, %3, %cst_3 {dimension_numbers = #tpu.dot_dimension_numbers<[1], [0], [0], [1], [0, 0, 1, 1], [], []>} : vector<128x32xbf16>, vector<32x8xbf16>, vector<128x8xf32> -> vector<128x8xf32>
    %5 = arith.truncf %4 : vector<128x8xf32> to vector<128x8xbf16>
    %c0_4 = arith.constant 0 : index
    %c0_5 = arith.constant 0 : index
    %6 = vector.load %arg3[%c0_4, %c0_5] : memref<8x4xbf16, #tpu.memory_space<vmem>>, vector<8x4xbf16>
    %cst_6 = arith.constant dense<0.000000e+00> : vector<128x4xf32>
    %7 = tpu.matmul %5, %6, %cst_6 {dimension_numbers = #tpu.dot_dimension_numbers<[1], [0], [0], [1], [0, 0, 1, 1], [], []>} : vector<128x8xbf16>, vector<8x4xbf16>, vector<128x4xf32> -> vector<128x4xf32>
    %c0_7 = arith.constant 0 : index
    %c0_8 = arith.constant 0 : index
    %8 = vector.load %arg5[%c0_7, %c0_8] : memref<128x4xf32, #tpu.memory_space<vmem>>, vector<128x4xf32>
    tpu.vector_store %arg5[%c0_7, %c0_8], %7 {strides = array<i32>} : memref<128x4xf32, #tpu.memory_space<vmem>>, vector<128x4xf32>,
    %cst_9 = arith.constant 1.000000e+00 : bf16
    %9 = vector.broadcast %cst_9 : bf16 to vector<128x1xbf16>
    %10 = vector.extract_strided_slice %5 {offsets = [0, 0], sizes = [128, 4], strides = [1, 1]} : vector<128x8xbf16> to vector<128x4xbf16>
    %11 = vector.extract_strided_slice %5 {offsets = [0, 4], sizes = [128, 4], strides = [1, 1]} : vector<128x8xbf16> to vector<128x4xbf16>
    %12 = tpu.concatenate %10, %9, %11, %9 in 1 : vector<128x4xbf16>, vector<128x1xbf16>, vector<128x4xbf16>, vector<128x1xbf16> -> vector<128x10xbf16>
    %c0_10 = arith.constant 0 : index
    %c0_11 = arith.constant 0 : index
    %13 = vector.load %arg4[%c0_10, %c0_11] : memref<128x10xbf16, #tpu.memory_space<vmem>>, vector<128x10xbf16>
    tpu.vector_store %arg4[%c0_10, %c0_11], %12 {strides = array<i32>} : memref<128x10xbf16, #tpu.memory_space<vmem>>, vector<128x10xbf16>,
    return
  }
  func.func @transform_0(%arg0: i32) -> (i32, i32) {
    %c0_i32 = arith.constant 0 : i32
    %c0_i32_0 = arith.constant 0 : i32
    return %arg0, %c0_i32 : i32, i32
  }
  func.func @transform_1(%arg0: i32) -> (i32, i32) {
    %c0_i32 = arith.constant 0 : i32
    %c0_i32_0 = arith.constant 0 : i32
    %c0_i32_1 = arith.constant 0 : i32
    return %c0_i32, %c0_i32_0 : i32, i32
  }
  func.func @transform_2(%arg0: i32) -> (i32, i32) {
    %c0_i32 = arith.constant 0 : i32
    %c0_i32_0 = arith.constant 0 : i32
    %c0_i32_1 = arith.constant 0 : i32
    return %c0_i32, %c0_i32_0 : i32, i32
  }
  func.func @transform_3(%arg0: i32) -> (i32, i32) {
    %c0_i32 = arith.constant 0 : i32
    %c0_i32_0 = arith.constant 0 : i32
    return %arg0, %c0_i32 : i32, i32
  }
  func.func @transform_4(%arg0: i32) -> (i32, i32) {
    %c0_i32 = arith.constant 0 : i32
    %c0_i32_0 = arith.constant 0 : i32
    return %arg0, %c0_i32 : i32, i32
  }
}

module attributes {stable_mosaic.version = 11 : i64} {
  func.func @_attn_kernel(%arg0: i32, %arg1: memref<128x2xf32, #tpu.memory_space<vmem>>, %arg2: memref<2x256xf32, #tpu.memory_space<vmem>>, %arg3: memref<256x10xbf16, #tpu.memory_space<vmem>>, %arg4: memref<128x256xi8, #tpu.memory_space<vmem>>, %arg5: memref<1x8xf32, #tpu.memory_space<vmem>>, %arg6: memref<128x8xf32, #tpu.memory_space<vmem>>, %arg7: memref<128x8xf32, #tpu.memory_space<vmem>>) attributes {dimension_semantics = [#tpu.dimension_semantics<parallel>], iteration_bounds = array<i64: 2>, scalar_prefetch = 0 : i64, scratch_operands = 0 : i64, tpu.core_type = #tpu.core_type<tc>, window_params = [{transform_indices = @transform_0, window_bounds = array<i64: 128, 2>}, {pipeline_mode = #tpu.pipeline_mode<synchronous>, transform_indices = @transform_1, window_bounds = array<i64: 2, 256>}, {pipeline_mode = #tpu.pipeline_mode<synchronous>, transform_indices = @transform_2, window_bounds = array<i64: 256, 10>}, {transform_indices = @transform_3, window_bounds = array<i64: 128, 256>}, {pipeline_mode = #tpu.pipeline_mode<synchronous>, transform_indices = @transform_4, window_bounds = array<i64: 1, 8>}, {transform_indices = @transform_5, window_bounds = array<i64: 128, 8>}, {transform_indices = @transform_6, window_bounds = array<i64: 128, 8>}]} {
    %c0 = arith.constant 0 : index
    %c0_0 = arith.constant 0 : index
    %0 = vector.load %arg4[%c0, %c0_0] : memref<128x256xi8, #tpu.memory_space<vmem>>, vector<128x256xi8>
    %c0_i8 = arith.constant 0 : i8
    %1 = vector.broadcast %c0_i8 : i8 to vector<128x256xi8>
    %2 = arith.cmpi ne, %0, %1 : vector<128x256xi8>
    %c0_1 = arith.constant 0 : index
    %c0_2 = arith.constant 0 : index
    %3 = vector.load %arg3[%c0_1, %c0_2] : memref<256x10xbf16, #tpu.memory_space<vmem>>, vector<256x10xbf16>
    %c0_3 = arith.constant 0 : index
    %c0_4 = arith.constant 0 : index
    %4 = vector.load %arg1[%c0_3, %c0_4] : memref<128x2xf32, #tpu.memory_space<vmem>>, vector<128x2xf32>
    %c0_5 = arith.constant 0 : index
    %c0_6 = arith.constant 0 : index
    %5 = vector.load %arg2[%c0_5, %c0_6] : memref<2x256xf32, #tpu.memory_space<vmem>>, vector<2x256xf32>
    %6 = vector.extract_strided_slice %4 {offsets = [0, 0], sizes = [128, 1], strides = [1, 1]} : vector<128x2xf32> to vector<128x1xf32>
    %7 = vector.extract_strided_slice %5 {offsets = [0, 0], sizes = [1, 256], strides = [1, 1]} : vector<2x256xf32> to vector<1x256xf32>
    %8 = vector.broadcast %6 : vector<128x1xf32> to vector<128x256xf32>
    %9 = vector.broadcast %7 : vector<1x256xf32> to vector<128x256xf32>
    %10 = arith.addf %8, %9 : vector<128x256xf32>
    %cst = arith.constant 2.000000e-01 : f32
    %11 = vector.broadcast %cst : f32 to vector<128x256xf32>
    %12 = arith.mulf %11, %10 : vector<128x256xf32>
    %13 = arith.maximumf %10, %12 : vector<128x256xf32>
    %cst_7 = arith.constant -1.000000e+30 : f32
    %14 = vector.broadcast %cst_7 : f32 to vector<128x256xf32>
    %15 = arith.select %2, %13, %14 : vector<128x256xi1>, vector<128x256xf32>
    %cst_8 = arith.constant dense<0xFF800000> : vector<128xf32>
    %16 = vector.multi_reduction <maximumf>, %15, %cst_8 [1] : vector<128x256xf32> to vector<128xf32>
    %17 = vector.shape_cast %16 : vector<128xf32> to vector<128x1xf32>
    %18 = vector.broadcast %17 : vector<128x1xf32> to vector<128x256xf32>
    %19 = arith.subf %15, %18 : vector<128x256xf32>
    %20 = math.exp %19 : vector<128x256xf32>
    %21 = arith.truncf %20 : vector<128x256xf32> to vector<128x256xbf16>
    %22 = vector.extract_strided_slice %3 {offsets = [0, 0], sizes = [256, 5], strides = [1, 1]} : vector<256x10xbf16> to vector<256x5xbf16>
    %cst_9 = arith.constant dense<0.000000e+00> : vector<128x5xf32>
    %23 = tpu.matmul %21, %22, %cst_9 {dimension_numbers = #tpu.dot_dimension_numbers<[1], [0], [0], [1], [0, 0, 1, 1], [], []>} : vector<128x256xbf16>, vector<256x5xbf16>, vector<128x5xf32> -> vector<128x5xf32>
    %24 = vector.extract_strided_slice %23 {offsets = [0, 4], sizes = [128, 1], strides = [1, 1]} : vector<128x5xf32> to vector<128x1xf32>
    %25 = vector.extract_strided_slice %23 {offsets = [0, 0], sizes = [128, 4], strides = [1, 1]} : vector<128x5xf32> to vector<128x4xf32>
    %26 = vector.broadcast %24 : vector<128x1xf32> to vector<128x4xf32>
    %27 = arith.divf %25, %26 : vector<128x4xf32>
    %28 = vector.extract_strided_slice %4 {offsets = [0, 1], sizes = [128, 1], strides = [1, 1]} : vector<128x2xf32> to vector<128x1xf32>
    %29 = vector.extract_strided_slice %5 {offsets = [1, 0], sizes = [1, 256], strides = [1, 1]} : vector<2x256xf32> to vector<1x256xf32>
    %30 = vector.broadcast %28 : vector<128x1xf32> to vector<128x256xf32>
    %31 = vector.broadcast %29 : vector<1x256xf32> to vector<128x256xf32>
    %32 = arith.addf %30, %31 : vector<128x256xf32>
    %cst_10 = arith.constant 2.000000e-01 : f32
    %33 = vector.broadcast %cst_10 : f32 to vector<128x256xf32>
    %34 = arith.mulf %33, %32 : vector<128x256xf32>
    %35 = arith.maximumf %32, %34 : vector<128x256xf32>
    %cst_11 = arith.constant -1.000000e+30 : f32
    %36 = vector.broadcast %cst_11 : f32 to vector<128x256xf32>
    %37 = arith.select %2, %35, %36 : vector<128x256xi1>, vector<128x256xf32>
    %cst_12 = arith.constant dense<0xFF800000> : vector<128xf32>
    %38 = vector.multi_reduction <maximumf>, %37, %cst_12 [1] : vector<128x256xf32> to vector<128xf32>
    %39 = vector.shape_cast %38 : vector<128xf32> to vector<128x1xf32>
    %40 = vector.broadcast %39 : vector<128x1xf32> to vector<128x256xf32>
    %41 = arith.subf %37, %40 : vector<128x256xf32>
    %42 = math.exp %41 : vector<128x256xf32>
    %43 = arith.truncf %42 : vector<128x256xf32> to vector<128x256xbf16>
    %44 = vector.extract_strided_slice %3 {offsets = [0, 5], sizes = [256, 5], strides = [1, 1]} : vector<256x10xbf16> to vector<256x5xbf16>
    %cst_13 = arith.constant dense<0.000000e+00> : vector<128x5xf32>
    %45 = tpu.matmul %43, %44, %cst_13 {dimension_numbers = #tpu.dot_dimension_numbers<[1], [0], [0], [1], [0, 0, 1, 1], [], []>} : vector<128x256xbf16>, vector<256x5xbf16>, vector<128x5xf32> -> vector<128x5xf32>
    %46 = vector.extract_strided_slice %45 {offsets = [0, 4], sizes = [128, 1], strides = [1, 1]} : vector<128x5xf32> to vector<128x1xf32>
    %47 = vector.extract_strided_slice %45 {offsets = [0, 0], sizes = [128, 4], strides = [1, 1]} : vector<128x5xf32> to vector<128x4xf32>
    %48 = vector.broadcast %46 : vector<128x1xf32> to vector<128x4xf32>
    %49 = arith.divf %47, %48 : vector<128x4xf32>
    %50 = tpu.concatenate %27, %49 in 1 : vector<128x4xf32>, vector<128x4xf32> -> vector<128x8xf32>
    %c0_14 = arith.constant 0 : index
    %c0_15 = arith.constant 0 : index
    %51 = vector.load %arg5[%c0_14, %c0_15] : memref<1x8xf32, #tpu.memory_space<vmem>>, vector<1x8xf32>
    %52 = vector.broadcast %51 : vector<1x8xf32> to vector<128x8xf32>
    %53 = arith.addf %50, %52 : vector<128x8xf32>
    %c0_16 = arith.constant 0 : index
    %c0_17 = arith.constant 0 : index
    %54 = vector.load %arg6[%c0_16, %c0_17] : memref<128x8xf32, #tpu.memory_space<vmem>>, vector<128x8xf32>
    %55 = arith.addf %53, %54 : vector<128x8xf32>
    %c0_18 = arith.constant 0 : index
    %c0_19 = arith.constant 0 : index
    %56 = vector.load %arg7[%c0_18, %c0_19] : memref<128x8xf32, #tpu.memory_space<vmem>>, vector<128x8xf32>
    tpu.vector_store %arg7[%c0_18, %c0_19], %55 {strides = array<i32>} : memref<128x8xf32, #tpu.memory_space<vmem>>, vector<128x8xf32>,
    return
  }
  func.func @transform_0(%arg0: i32) -> (i32, i32) {
    %c0_i32 = arith.constant 0 : i32
    %c0_i32_0 = arith.constant 0 : i32
    return %arg0, %c0_i32 : i32, i32
  }
  func.func @transform_1(%arg0: i32) -> (i32, i32) {
    %c0_i32 = arith.constant 0 : i32
    %c0_i32_0 = arith.constant 0 : i32
    %c0_i32_1 = arith.constant 0 : i32
    return %c0_i32, %c0_i32_0 : i32, i32
  }
  func.func @transform_2(%arg0: i32) -> (i32, i32) {
    %c0_i32 = arith.constant 0 : i32
    %c0_i32_0 = arith.constant 0 : i32
    %c0_i32_1 = arith.constant 0 : i32
    return %c0_i32, %c0_i32_0 : i32, i32
  }
  func.func @transform_3(%arg0: i32) -> (i32, i32) {
    %c0_i32 = arith.constant 0 : i32
    %c0_i32_0 = arith.constant 0 : i32
    return %arg0, %c0_i32 : i32, i32
  }
  func.func @transform_4(%arg0: i32) -> (i32, i32) {
    %c0_i32 = arith.constant 0 : i32
    %c0_i32_0 = arith.constant 0 : i32
    %c0_i32_1 = arith.constant 0 : i32
    return %c0_i32, %c0_i32_0 : i32, i32
  }
  func.func @transform_5(%arg0: i32) -> (i32, i32) {
    %c0_i32 = arith.constant 0 : i32
    %c0_i32_0 = arith.constant 0 : i32
    return %arg0, %c0_i32 : i32, i32
  }
  func.func @transform_6(%arg0: i32) -> (i32, i32) {
    %c0_i32 = arith.constant 0 : i32
    %c0_i32_0 = arith.constant 0 : i32
    return %arg0, %c0_i32 : i32, i32
  }
}

</mosaic_0001>

<bundles_post_ra>
// kernel: skipgat_forward.4
= control target key start
LH: loop header
LB: loop body
LE: loop exit
PB: predicated region body
PF: predicated region fallthrough
CT: control target
= control target key end

     0   :  { %s920_s15 = smov 0   ;;  %s1096_s0 = inlined_call_operand.vmem [shape: f32[256,8], index: 0, kind: input, shape index: {}]   ;;  %s1097_s1 = inlined_call_operand.vmem [shape: bf16[8,32], index: 1, kind: input, shape index: {}]   ;;  %s1098_s2 = inlined_call_operand.vmem [shape: bf16[32,4], index: 2, kind: input, shape index: {}]   ;;  %s1099_s3 = inlined_call_operand.vmem [shape: bf16[256,34], index: 3, kind: output, shape index: {0}]   ;;  %s1100_s4 = inlined_call_operand.vmem [shape: f32[256,4], index: 4, kind: output, shape index: {1}]  }
   0x1 LB: > { %s770_s16 = sadd.s32 4294967295, %s892_s15   ;;  %p774_p0 = scmp.ge.s32.totalorder %s892_s15, 1  ;;  %s892_s15 = sphi %s920_s15, %s15_s15  }
   0x2   : > { %p166_p1 = scmp.lt.s32.totalorder %s892_s15, 3 }
   0x4   : > { %p167_p2 = pnand %p774_p0, %p166_p1 }
   0x5   : > { %v257_v0 = vld [vmem:[%s1097_s1] sm:$0xf] (!%p167_p2)  ;;  %vm283_vm0 = vcmask (!%p167_p2), 1043456   ;;  %s775_s19 = sshll.u32 (!%p167_p2), %s770_s16, 4  ;;  %vm258_vm1 = vcmask (!%p167_p2), 64512   ;;  %v885_v43 = vld [vmem:[%s1098_s2 + $0x8] sm:$0xff] (!%p167_p2)  }
   0x6   : > { %170 = sbr.rel (%p167_p2) target bundleno = 480 (0x1e0), region = 32  ;;  %v884_v1 = vld [vmem:[%s1098_s2] sm:$0xff] (!%p167_p2)   ;;  %874 = vmatprep.subr.msk.bf16.mxu0 (!%p167_p2), %vm283_vm0, %v257_v0  ;;  %v285_v2 = vsel (!%p167_p2), %vm283_vm0, %v257_v0, 0  ;;  %p198_p3 = scmp.lt.s32.totalorder (!%p167_p2), %s775_s19, 31  ;;  %vm408_vm2 = vcmask (!%p167_p2), 261120   ;;  %vm571_vm3 = vcmask (!%p167_p2), 130048  }
   0x7   : > { %837 = vmatpush3.bf16.msra.mxu0 (!%p167_p2), %v285_v2  ;;  %854 = vmatprep.subr.bf16.mxu1 (!%p167_p2), %v884_v1  ;;  %s894_s28 = smov (!%p167_p2), 1   ;;  %vm581_vm4 = vcmask (!%p167_p2), 138240   ;;  %vm598_vm5 = vcmask (!%p167_p2), 269312   ;;  %vm663_vm6 = vcmask (!%p167_p2), 273408   ;;  %vm530_vm7 = vcmask (!%p167_p2), 31744  }
   0x8   : > { %855 = vmatpush3.bf16.msra.mxu1 (!%p167_p2), %v884_v1 }
   0x9   : > { %856 = vmatprep.subr.bf16.mxu1 (!%p167_p2), %v885_v43 }
   0xc   : > { %857 = vmatpush3.bf16.msra.mxu1 (!%p167_p2), %v885_v43 }
   0xd   : > { %s1102_s19 = smov (!%p198_p3, %s775_s19), 31 }
   0xe   : > { %s776_s22 = sshll.u32 %s1102_s19, 3  ;;  %s778_s29 = sshll.u32 %s1102_s19, 2 }
   0xf   : > { %s942_s25 = scalar_lea.vmem %s1096_s0, %s776_s22  ;;  %s997_s6 = scalar_lea.vmem %s1099_s3, %s778_s29 }
  0x10   : > { %v217_v3 = vld [vmem:[%s942_s25] sm:$0xff]  ;;  %v218_v4 = vld [vmem:[%s942_s25 + $0x8] sm:$0xff]  ;;  %v219_v5 = vld [vmem:[%s942_s25 + $0x10] sm:$0xff]  ;;  %s1059_s9 = scalar_lea.vmem %s1100_s4, %s776_s22 }
  0x11   : > { %v233_v6 = vmax.f32 %v217_v3, 0.0  ;;  %v234_v7 = vmax.f32 %v218_v4, 0.0  ;;  %v220_v8 = vld [vmem:[%s942_s25 + $0x18] sm:$0xff]  ;;  %v235_v9 = vmax.f32 %v219_v5, 0.0  ;;  %v221_v10 = vld [vmem:[%s942_s25 + $0x20] sm:$0xff]  ;;  %v222_v11 = vld [vmem:[%s942_s25 + $0x28] sm:$0xff] }
  0x12   : > { %v236_v12 = vmax.f32 %v220_v8, 0.0  ;;  %v237_v13 = vmax.f32 %v221_v10, 0.0  ;;  %v238_v14 = vmax.f32 %v222_v11, 0.0  ;;  %v223_v16 = vld [vmem:[%s942_s25 + $0x30] sm:$0xff]  ;;  %v224_v17 = vld [vmem:[%s942_s25 + $0x38] sm:$0xff]  ;;  %v225_v20 = vld [vmem:[%s942_s25 + $0x40] sm:$0xff] }
  0x13   : > { %v249_v15 = vpack.c.bf16 %v234_v7, %v233_v6  ;;  %v226_v21 = vld [vmem:[%s942_s25 + $0x48] sm:$0xff]  ;;  %v239_v22 = vmax.f32 %v223_v16, 0.0  ;;  %v240_v23 = vmax.f32 %v224_v17, 0.0  ;;  %v241_v24 = vmax.f32 %v225_v20, 0.0  ;;  %v227_v28 = vld [vmem:[%s942_s25 + $0x50] sm:$0xff]  ;;  %v228_v29 = vld [vmem:[%s942_s25 + $0x58] sm:$0xff] }
  0x14   : > { %v250_v18 = vpack.c.bf16 %v236_v12, %v235_v9  ;;  %v251_v19 = vpack.c.bf16 %v238_v14, %v237_v13  ;;  %v242_v25 = vmax.f32 %v226_v21, 0.0  ;;  %v229_v30 = vld [vmem:[%s942_s25 + $0x60] sm:$0xff]  ;;  %v230_v31 = vld [vmem:[%s942_s25 + $0x68] sm:$0xff]  ;;  %v243_v32 = vmax.f32 %v227_v28, 0.0  ;;  %v231_v38 = vld [vmem:[%s942_s25 + $0x70] sm:$0xff] }
  0x15   : > { %838 = vmatprep.mubr.msk.bf16.mxu0 %vm258_vm1, %v249_v15  ;;  %v252_v26 = vpack.c.bf16 %v240_v23, %v239_v22  ;;  %v244_v33 = vmax.f32 %v228_v29, 0.0  ;;  %v245_v34 = vmax.f32 %v229_v30, 0.0  ;;  %v246_v35 = vmax.f32 %v230_v31, 0.0  ;;  %v232_v39 = vld [vmem:[%s942_s25 + $0x78] sm:$0xff] }
  0x16   : > { %839 = vmatmul.mubr.msk.bf16.vlgmr.msra.gmra.mrb[0].mxu0 %vm258_vm1, %v250_v18  ;;  %v253_v27 = vpack.c.bf16 %v242_v25, %v241_v24  ;;  %v247_v40 = vmax.f32 %v231_v38, 0.0  ;;  %v248_v41 = vmax.f32 %v232_v39, 0.0 }
  0x17   : > { %842 = vmatprep.mubr.msk.bf16.mxu0 %vm258_vm1, %v251_v19  ;;  %v254_v36 = vpack.c.bf16 %v244_v33, %v243_v32  ;;  %v255_v37 = vpack.c.bf16 %v246_v35, %v245_v34 }
  0x18   : > { %v256_v42 = vpack.c.bf16 %v248_v41, %v247_v40 }
  0x1e   : > { %843 = vmatmul.mubr.msk.bf16.gmra.mrb[4].mxu0 %vm258_vm1, %v252_v26 }
  0x1f   : > { %846 = vmatprep.mubr.msk.bf16.mxu0 %vm258_vm1, %v253_v27 }
  0x26   : > { %847 = vmatmul.mubr.msk.bf16.gmra.mrb[8].mxu0 %vm258_vm1, %v254_v36 }
  0x27   : > { %850 = vmatprep.mubr.msk.bf16.mxu0 %vm258_vm1, %v255_v37 }
  0x2e   : > { %851 = vmatmul.mubr.msk.bf16.gmra.mrb[12].mxu0 %vm258_vm1, %v256_v42 }
  0xe9   : > { %v840_v44 = vpop.f32.mrb[0].mxu0 }
  0xea   : > { %v321_v45 = vpop.f32.mrb[1].mxu0 }
  0xeb   : > { %v841_v46 = vpop.f32.mrb[2].mxu0 }
  0xec   : > { %v385_v47 = vpack.c.bf16 %v841_v46, %v840_v44  ;;  %v324_v48 = vpop.f32.mrb[3].mxu0 }
  0xed   : > { %v384_v49 = vpack.c.bf16 %v324_v48, %v321_v45 }
  0xee   : > { %557 = vrot.lane.b32.xlu0 %v385_v47, %s894_s28  ;;  %v574_v5 = vsel %vm571_vm3, %v385_v47, 1065369472 }
  0xef   : > { %858 = vmatprep.mubr.msk.bf16.mxu1 %vm408_vm2, %v384_v49  ;;  %v573_v11 = vsel %vm571_vm3, %v384_v49, 1065369472 }
  0xf0   : > { %859 = vmatmul.mubr.msk.bf16.vlgmr.msra.gmra.mrb[0].mxu1 %vm408_vm2, %v385_v47 }
  0xf1   : > { %v844_v50 = vpop.f32.mrb[4].mxu0 }
  0xf2   : > { %555 = vrot.lane.b32.xlu0 %v384_v49, %s894_s28  ;;  %v337_v51 = vpop.f32.mrb[5].mxu0 }
  0xf3   : > { %v845_v52 = vpop.f32.mrb[6].mxu0 }
  0xf4   : > { %v387_v53 = vpack.c.bf16 %v845_v52, %v844_v50  ;;  %v340_v54 = vpop.f32.mrb[7].mxu0 }
  0xf5   : > { %v386_v55 = vpack.c.bf16 %v340_v54, %v337_v51 }
  0xf6   : > { %561 = vrot.lane.b32.xlu1 %v387_v53, %s894_s28  ;;  %v576_v17 = vsel %vm571_vm3, %v387_v53, 1065369472 }
  0xf7   : > { %862 = vmatprep.mubr.msk.bf16.mxu1 %vm408_vm2, %v386_v55  ;;  %v575_v23 = vsel %vm571_vm3, %v386_v55, 1065369472 }
  0xf8   : > { %863 = vmatmul.mubr.msk.bf16.gmra.mrb[4].mxu1 %vm408_vm2, %v387_v53 }
  0xf9   : > { %v848_v56 = vpop.f32.mrb[8].mxu0 }
  0xfa   : > { %559 = vrot.lane.b32.xlu1 %v386_v55, %s894_s28  ;;  %v353_v57 = vpop.f32.mrb[9].mxu0 }
  0xfb   : > { %v849_v58 = vpop.f32.mrb[10].mxu0 }
  0xfc   : > { %v389_v59 = vpack.c.bf16 %v849_v58, %v848_v56  ;;  %v356_v60 = vpop.f32.mrb[11].mxu0 }
  0xfd   : > { %v388_v61 = vpack.c.bf16 %v356_v60, %v353_v57 }
  0xfe   : > { %565 = vrot.lane.b32.xlu1 %v389_v59, %s894_s28  ;;  %v578_v29 = vsel %vm571_vm3, %v389_v59, 1065369472 }
  0xff   : > { %563 = vrot.lane.b32.xlu0 %v388_v61, %s894_s28  ;;  %866 = vmatprep.mubr.msk.bf16.mxu1 %vm408_vm2, %v388_v61  ;;  %v577_v32 = vsel %vm571_vm3, %v388_v61, 1065369472 }
 0x100   : > { %867 = vmatmul.mubr.msk.bf16.gmra.mrb[8].mxu1 %vm408_vm2, %v389_v59 }
 0x101   : > { %v852_v62 = vpop.f32.mrb[12].mxu0 }
 0x102   : > { %v369_v63 = vpop.f32.mrb[13].mxu0 }
 0x103   : > { %v853_v0 = vpop.f32.mrb[14].mxu0 }
 0x104   : > { %v391_v1 = vpack.c.bf16 %v853_v0, %v852_v62  ;;  %v372_v2 = vpop.f32.mrb[15].mxu0 }
 0x105   : > { %v983_v3 = vpack.c.bf16 %v372_v2, %v369_v63 }
 0x106   : > { %569 = vrot.lane.b32.xlu1 %v391_v1, %s894_s28  ;;  %v580_v41 = vsel %vm571_vm3, %v391_v1, 1065369472 }
 0x107   : > { %567 = vrot.lane.b32.xlu0 %v983_v3, %s894_s28  ;;  %870 = vmatprep.mubr.msk.bf16.mxu1 %vm408_vm2, %v983_v3  ;;  %v579_v44 = vsel %vm571_vm3, %v983_v3, 1065369472 }
 0x108   : > { %871 = vmatmul.mubr.msk.bf16.gmra.mrb[12].mxu1 %vm408_vm2, %v391_v1 }
 0x160   : > { %v558_v4 = vpop.permute.xlu0 %557 }
 0x161   : > { %v585_v6 = vsel %vm581_vm4, %v574_v5, %v558_v4 }
 0x162   : > { %v600_v7 = vsel %vm598_vm5, %v585_v6, 1065369472 }
 0x163   : > { %v801_v8 = vcombine.low %v600_v7, %v600_v7  ;;  %v802_v9 = vcombine.high %v600_v7, %v600_v7 }
 0x164   : > { %v556_v10 = vpop.permute.xlu0 %555 }
 0x165   : > { %666 = vst.msk [vmem:[%s997_s6 + $0x8] sm:$0xf] %vm663_vm6, %v801_v8  ;;  %667 = vst.msk [vmem:[%s997_s6 + $0xc] sm:$0xf] %vm663_vm6, %v802_v9  ;;  %v583_v12 = vsel %vm581_vm4, %v573_v11, %v556_v10 }
 0x166   : > { %v599_v13 = vsel %vm598_vm5, %v583_v12, 1065369472 }
 0x167   : > { %v799_v14 = vcombine.low %v599_v13, %v599_v13  ;;  %v800_v15 = vcombine.high %v599_v13, %v599_v13 }
 0x168   : > { %v562_v16 = vpop.permute.xlu1 %561 }
 0x169   : > { %664 = vst.msk [vmem:[%s997_s6] sm:$0xf] %vm663_vm6, %v799_v14  ;;  %665 = vst.msk [vmem:[%s997_s6 + $0x4] sm:$0xf] %vm663_vm6, %v800_v15  ;;  %v589_v18 = vsel %vm581_vm4, %v576_v17, %v562_v16 }
 0x16a   : > { %v602_v19 = vsel %vm598_vm5, %v589_v18, 1065369472 }
 0x16b   : > { %v805_v20 = vcombine.low %v602_v19, %v602_v19  ;;  %v806_v21 = vcombine.high %v602_v19, %v602_v19 }
 0x16c   : > { %v560_v22 = vpop.permute.xlu1 %559 }
 0x16d   : > { %670 = vst.msk [vmem:[%s997_s6 + $0x18] sm:$0xf] %vm663_vm6, %v805_v20  ;;  %671 = vst.msk [vmem:[%s997_s6 + $0x1c] sm:$0xf] %vm663_vm6, %v806_v21  ;;  %v587_v24 = vsel %vm581_vm4, %v575_v23, %v560_v22 }
 0x16e   : > { %v601_v25 = vsel %vm598_vm5, %v587_v24, 1065369472 }
 0x16f   : > { %v803_v26 = vcombine.low %v601_v25, %v601_v25  ;;  %v804_v27 = vcombine.high %v601_v25, %v601_v25 }
 0x170   : > { %v566_v28 = vpop.permute.xlu1 %565 }
 0x171   : > { %668 = vst.msk [vmem:[%s997_s6 + $0x10] sm:$0xf] %vm663_vm6, %v803_v26  ;;  %669 = vst.msk [vmem:[%s997_s6 + $0x14] sm:$0xf] %vm663_vm6, %v804_v27  ;;  %v593_v30 = vsel %vm581_vm4, %v578_v29, %v566_v28  ;;  %v564_v31 = vpop.permute.xlu0 %563 }
 0x172   : > { %v604_v33 = vsel %vm598_vm5, %v593_v30, 1065369472  ;;  %v591_v34 = vsel %vm581_vm4, %v577_v32, %v564_v31 }
 0x173   : > { %v809_v35 = vcombine.low %v604_v33, %v604_v33  ;;  %v810_v36 = vcombine.high %v604_v33, %v604_v33  ;;  %v603_v37 = vsel %vm598_vm5, %v591_v34, 1065369472 }
 0x174   : > { %v807_v38 = vcombine.low %v603_v37, %v603_v37  ;;  %v808_v39 = vcombine.high %v603_v37, %v603_v37 }
 0x175   : > { %674 = vst.msk [vmem:[%s997_s6 + $0x28] sm:$0xf] %vm663_vm6, %v809_v35  ;;  %675 = vst.msk [vmem:[%s997_s6 + $0x2c] sm:$0xf] %vm663_vm6, %v810_v36 }
 0x176   : > { %672 = vst.msk [vmem:[%s997_s6 + $0x20] sm:$0xf] %vm663_vm6, %v807_v38  ;;  %673 = vst.msk [vmem:[%s997_s6 + $0x24] sm:$0xf] %vm663_vm6, %v808_v39 }
 0x178   : > { %v570_v40 = vpop.permute.xlu1 %569 }
 0x179   : > { %v597_v42 = vsel %vm581_vm4, %v580_v41, %v570_v40  ;;  %v568_v43 = vpop.permute.xlu0 %567 }
 0x17a   : > { %v606_v45 = vsel %vm598_vm5, %v597_v42, 1065369472  ;;  %v595_v46 = vsel %vm581_vm4, %v579_v44, %v568_v43 }
 0x17b   : > { %v813_v47 = vcombine.low %v606_v45, %v606_v45  ;;  %v814_v48 = vcombine.high %v606_v45, %v606_v45  ;;  %v605_v49 = vsel %vm598_vm5, %v595_v46, 1065369472 }
 0x17c   : > { %v811_v50 = vcombine.low %v605_v49, %v605_v49  ;;  %v812_v51 = vcombine.high %v605_v49, %v605_v49 }
 0x17d   : > { %678 = vst.msk [vmem:[%s997_s6 + $0x38] sm:$0xf] %vm663_vm6, %v813_v47  ;;  %679 = vst.msk [vmem:[%s997_s6 + $0x3c] sm:$0xf] %vm663_vm6, %v814_v48 }
 0x17e   : > { %676 = vst.msk [vmem:[%s997_s6 + $0x30] sm:$0xf] %vm663_vm6, %v811_v50  ;;  %677 = vst.msk [vmem:[%s997_s6 + $0x34] sm:$0xf] %vm663_vm6, %v812_v51 }
 0x1c3   : > { %v860_v52 = vpop.f32.mrb[0].mxu1 }
 0x1c4   : > { %533 = vst.msk [vmem:[%s1059_s9 + $0x10] sm:$0xff] %vm530_vm7, %v860_v52  ;;  %v467_v53 = vpop.f32.mrb[1].mxu1 }
 0x1c5   : > { %531 = vst.msk [vmem:[%s1059_s9] sm:$0xff] %vm530_vm7, %v467_v53  ;;  %v861_v54 = vpop.f32.mrb[2].mxu1 }
 0x1c6   : > { %534 = vst.msk [vmem:[%s1059_s9 + $0x18] sm:$0xff] %vm530_vm7, %v861_v54  ;;  %v470_v55 = vpop.f32.mrb[3].mxu1 }
 0x1c7   : > { %532 = vst.msk [vmem:[%s1059_s9 + $0x8] sm:$0xff] %vm530_vm7, %v470_v55 }
 0x1cb   : > { %v864_v56 = vpop.f32.mrb[4].mxu1 }
 0x1cc   : > { %537 = vst.msk [vmem:[%s1059_s9 + $0x30] sm:$0xff] %vm530_vm7, %v864_v56  ;;  %v483_v57 = vpop.f32.mrb[5].mxu1 }
 0x1cd   : > { %535 = vst.msk [vmem:[%s1059_s9 + $0x20] sm:$0xff] %vm530_vm7, %v483_v57  ;;  %v865_v58 = vpop.f32.mrb[6].mxu1 }
 0x1ce   : > { %538 = vst.msk [vmem:[%s1059_s9 + $0x38] sm:$0xff] %vm530_vm7, %v865_v58  ;;  %v486_v59 = vpop.f32.mrb[7].mxu1 }
 0x1cf   : > { %536 = vst.msk [vmem:[%s1059_s9 + $0x28] sm:$0xff] %vm530_vm7, %v486_v59 }
 0x1d3   : > { %v868_v60 = vpop.f32.mrb[8].mxu1 }
 0x1d4   : > { %541 = vst.msk [vmem:[%s1059_s9 + $0x50] sm:$0xff] %vm530_vm7, %v868_v60  ;;  %v499_v61 = vpop.f32.mrb[9].mxu1 }
 0x1d5   : > { %539 = vst.msk [vmem:[%s1059_s9 + $0x40] sm:$0xff] %vm530_vm7, %v499_v61  ;;  %v869_v62 = vpop.f32.mrb[10].mxu1 }
 0x1d6   : > { %542 = vst.msk [vmem:[%s1059_s9 + $0x58] sm:$0xff] %vm530_vm7, %v869_v62  ;;  %v502_v63 = vpop.f32.mrb[11].mxu1 }
 0x1d7   : > { %540 = vst.msk [vmem:[%s1059_s9 + $0x48] sm:$0xff] %vm530_vm7, %v502_v63 }
 0x1db   : > { %v872_v0 = vpop.f32.mrb[12].mxu1 }
 0x1dc   : > { %545 = vst.msk [vmem:[%s1059_s9 + $0x70] sm:$0xff] %vm530_vm7, %v872_v0  ;;  %v515_v1 = vpop.f32.mrb[13].mxu1 }
 0x1dd   : > { %543 = vst.msk [vmem:[%s1059_s9 + $0x60] sm:$0xff] %vm530_vm7, %v515_v1  ;;  %v873_v2 = vpop.f32.mrb[14].mxu1 }
 0x1de   : > { %546 = vst.msk [vmem:[%s1059_s9 + $0x78] sm:$0xff] %vm530_vm7, %v873_v2  ;;  %v518_v3 = vpop.f32.mrb[15].mxu1 }
 0x1df   : > { %544 = vst.msk [vmem:[%s1059_s9 + $0x68] sm:$0xff] %vm530_vm7, %v518_v3 }
 0x1e0 PF: > { %s15_s15 = sadd.s32 1, %s892_s15  }
 0x1e1   : > { %p12_p4 = scmp.ge.s32.totalorder %s15_s15, 4  }
 0x1e3   :  { %14 = sbr.rel (!%p12_p4) target bundleno = 1 (0x1), region = 74 }

// kernel: skipgat_forward.6
= control target key start
LH: loop header
LB: loop body
LE: loop exit
PB: predicated region body
PF: predicated region fallthrough
CT: control target
= control target key end

     0   :  { %s961_s15 = smov 0   ;;  %s1132_s0 = inlined_call_operand.vmem [shape: bf16[256,32], index: 0, kind: input, shape index: {}]   ;;  %s1133_s1 = inlined_call_operand.vmem [shape: bf16[32,8], index: 1, kind: input, shape index: {}]   ;;  %s1134_s2 = inlined_call_operand.vmem [shape: bf16[8,4], index: 2, kind: input, shape index: {}]   ;;  %s1135_s3 = inlined_call_operand.vmem [shape: bf16[256,10], index: 3, kind: output, shape index: {0}]   ;;  %s1136_s4 = inlined_call_operand.vmem [shape: f32[256,4], index: 4, kind: output, shape index: {1}]  }
   0x1 LB: > { %s801_s16 = sadd.s32 4294967295, %s932_s15   ;;  %p805_p0 = scmp.ge.s32.totalorder %s932_s15, 1  ;;  %s932_s15 = sphi %s961_s15, %s15_s15  }
   0x2   : > { %p166_p1 = scmp.lt.s32.totalorder %s932_s15, 3 }
   0x4   : > { %p167_p2 = pnand %p805_p0, %p166_p1 }
   0x5   : > { %v924_v0 = vld [vmem:[%s1133_s1] sm:$0xff] (!%p167_p2)   ;;  %s806_s19 = sshll.u32 (!%p167_p2), %s801_s16, 4  ;;  %v925_v1 = vld [vmem:[%s1133_s1 + $0x8] sm:$0xff] (!%p167_p2)   ;;  %v934_v5 = vmov (!%p167_p2), 0   ;;  %vm305_vm0 = vcmask (!%p167_p2), 261120   ;;  %vm461_vm1 = vcmask (!%p167_p2), 1043456  }
   0x6   : > { %170 = sbr.rel (%p167_p2) target bundleno = 480 (0x1e0), region = 32  ;;  %p198_p3 = scmp.lt.s32.totalorder (!%p167_p2), %s806_s19, 31  ;;  %875 = vmatprep.subr.bf16.mxu0 (!%p167_p2), %v924_v0  ;;  %v435_v43 = vld [vmem:[%s1134_s2] sm:$0xf] (!%p167_p2)  ;;  %vm436_vm2 = vcmask (!%p167_p2), 64512   ;;  %vm562_vm3 = vcmask (!%p167_p2), 31744  }
   0x7   : > { %876 = vmatpush3.bf16.msra.mxu0 (!%p167_p2), %v924_v0  ;;  %913 = vmatprep.subr.msk.bf16.mxu1 (!%p167_p2), %vm461_vm1, %v435_v43  ;;  %v463_v44 = vsel (!%p167_p2), %vm461_vm1, %v435_v43, 0  ;;  %s935_s28 = smov (!%p167_p2), 1   ;;  %vm612_vm4 = vcmask (!%p167_p2), 39936   ;;  %vm629_vm5 = vcmask (!%p167_p2), 72704   ;;  %vm694_vm6 = vcmask (!%p167_p2), 76800  }
   0x8   : > { %877 = vmatprep.subr.bf16.mxu0 (!%p167_p2), %v925_v1  ;;  %896 = vmatpush3.bf16.msra.mxu1 (!%p167_p2), %v463_v44 }
   0xb   : > { %878 = vmatpush3.bf16.msra.mxu0 (!%p167_p2), %v925_v1 }
   0xd   : > { %s1138_s19 = smov (!%p198_p3, %s806_s19), 31 }
   0xe   : > { %s807_s22 = sshll.u32 %s1138_s19, 2  ;;  %s811_s6 = sshll.u32 %s1138_s19, 3 }
   0xf   : > { %s983_s25 = scalar_lea.vmem %s1132_s0, %s807_s22  ;;  %s1035_s5 = scalar_lea.vmem %s1135_s3, %s807_s22 }
  0x10   : > { %v217_v2 = vld [vmem:[%s983_s25] sm:$0xf]  ;;  %v218_v3 = vld [vmem:[%s983_s25 + $0x4] sm:$0xf]  ;;  %v219_v4 = vld [vmem:[%s983_s25 + $0x8] sm:$0xf]  ;;  %s1095_s9 = scalar_lea.vmem %s1136_s4, %s811_s6 }
  0x11   : > { %v233_v6 = vmax.bf16 %v934_v5, %v217_v2  ;;  %v234_v7 = vmax.bf16 %v934_v5, %v218_v3  ;;  %v220_v8 = vld [vmem:[%s983_s25 + $0xc] sm:$0xf]  ;;  %v235_v9 = vmax.bf16 %v934_v5, %v219_v4  ;;  %v221_v10 = vld [vmem:[%s983_s25 + $0x10] sm:$0xf]  ;;  %v222_v11 = vld [vmem:[%s983_s25 + $0x14] sm:$0xf] }
  0x12   : > { %v236_v12 = vmax.bf16 %v934_v5, %v220_v8  ;;  %v237_v13 = vmax.bf16 %v934_v5, %v221_v10  ;;  %v238_v14 = vmax.bf16 %v934_v5, %v222_v11  ;;  %v223_v16 = vld [vmem:[%s983_s25 + $0x18] sm:$0xf]  ;;  %v224_v17 = vld [vmem:[%s983_s25 + $0x1c] sm:$0xf]  ;;  %v225_v20 = vld [vmem:[%s983_s25 + $0x20] sm:$0xf] }
  0x13   : > { %v812_v15 = vcombine.low %v233_v6, %v234_v7  ;;  %v226_v21 = vld [vmem:[%s983_s25 + $0x24] sm:$0xf]  ;;  %v239_v22 = vmax.bf16 %v934_v5, %v223_v16  ;;  %v240_v23 = vmax.bf16 %v934_v5, %v224_v17  ;;  %v241_v24 = vmax.bf16 %v934_v5, %v225_v20  ;;  %v227_v28 = vld [vmem:[%s983_s25 + $0x28] sm:$0xf]  ;;  %v228_v29 = vld [vmem:[%s983_s25 + $0x2c] sm:$0xf] }
  0x14   : > { %v813_v18 = vcombine.low %v235_v9, %v236_v12  ;;  %v814_v19 = vcombine.low %v237_v13, %v238_v14  ;;  %v242_v25 = vmax.bf16 %v934_v5, %v226_v21  ;;  %v229_v30 = vld [vmem:[%s983_s25 + $0x30] sm:$0xf]  ;;  %v230_v31 = vld [vmem:[%s983_s25 + $0x34] sm:$0xf]  ;;  %v243_v32 = vmax.bf16 %v934_v5, %v227_v28  ;;  %v231_v38 = vld [vmem:[%s983_s25 + $0x38] sm:$0xf] }
  0x15   : > { %879 = vmatprep.mubr.msk.bf16.mxu0 %vm305_vm0, %v812_v15  ;;  %v815_v26 = vcombine.low %v239_v22, %v240_v23  ;;  %v244_v33 = vmax.bf16 %v934_v5, %v228_v29  ;;  %v245_v34 = vmax.bf16 %v934_v5, %v229_v30  ;;  %v246_v35 = vmax.bf16 %v934_v5, %v230_v31  ;;  %v232_v39 = vld [vmem:[%s983_s25 + $0x3c] sm:$0xf] }
  0x16   : > { %880 = vmatmul.mubr.msk.bf16.vlgmr.msra.gmra.mrb[0].mxu0 %vm305_vm0, %v813_v18  ;;  %v816_v27 = vcombine.low %v241_v24, %v242_v25  ;;  %v247_v40 = vmax.bf16 %v934_v5, %v231_v38  ;;  %v248_v41 = vmax.bf16 %v934_v5, %v232_v39 }
  0x17   : > { %883 = vmatprep.mubr.msk.bf16.mxu0 %vm305_vm0, %v814_v19  ;;  %v817_v36 = vcombine.low %v243_v32, %v244_v33  ;;  %v818_v37 = vcombine.low %v245_v34, %v246_v35 }
  0x18   : > { %v819_v42 = vcombine.low %v247_v40, %v248_v41 }
  0x1e   : > { %884 = vmatmul.mubr.msk.bf16.gmra.mrb[4].mxu0 %vm305_vm0, %v815_v26 }
  0x1f   : > { %887 = vmatprep.mubr.msk.bf16.mxu0 %vm305_vm0, %v816_v27 }
  0x26   : > { %888 = vmatmul.mubr.msk.bf16.gmra.mrb[8].mxu0 %vm305_vm0, %v817_v36 }
  0x27   : > { %891 = vmatprep.mubr.msk.bf16.mxu0 %vm305_vm0, %v818_v37 }
  0x2e   : > { %892 = vmatmul.mubr.msk.bf16.gmra.mrb[12].mxu0 %vm305_vm0, %v819_v42 }
  0xe9   : > { %v881_v45 = vpop.f32.mrb[0].mxu0 }
  0xea   : > { %v364_v46 = vpop.f32.mrb[1].mxu0 }
  0xeb   : > { %v882_v47 = vpop.f32.mrb[2].mxu0 }
  0xec   : > { %v428_v48 = vpack.c.bf16 %v882_v47, %v881_v45  ;;  %v367_v49 = vpop.f32.mrb[3].mxu0 }
  0xed   : > { %v427_v50 = vpack.c.bf16 %v367_v49, %v364_v46 }
  0xee   : > { %589 = vrot.lane.b32.xlu0 %v428_v48, %s935_s28  ;;  %v605_v6 = vsel %vm562_vm3, %v428_v48, 1065369472 }
  0xef   : > { %897 = vmatprep.mubr.msk.bf16.mxu1 %vm436_vm2, %v427_v50  ;;  %v604_v12 = vsel %vm562_vm3, %v427_v50, 1065369472 }
  0xf0   : > { %898 = vmatmul.mubr.msk.bf16.vlgmr.msra.gmra.mrb[0].mxu1 %vm436_vm2, %v428_v48 }
  0xf1   : > { %v885_v51 = vpop.f32.mrb[4].mxu0 }
  0xf2   : > { %587 = vrot.lane.b32.xlu0 %v427_v50, %s935_s28  ;;  %v380_v52 = vpop.f32.mrb[5].mxu0 }
  0xf3   : > { %v886_v53 = vpop.f32.mrb[6].mxu0 }
  0xf4   : > { %v430_v54 = vpack.c.bf16 %v886_v53, %v885_v51  ;;  %v383_v55 = vpop.f32.mrb[7].mxu0 }
  0xf5   : > { %v429_v56 = vpack.c.bf16 %v383_v55, %v380_v52 }
  0xf6   : > { %593 = vrot.lane.b32.xlu1 %v430_v54, %s935_s28  ;;  %v607_v18 = vsel %vm562_vm3, %v430_v54, 1065369472 }
  0xf7   : > { %901 = vmatprep.mubr.msk.bf16.mxu1 %vm436_vm2, %v429_v56  ;;  %v606_v24 = vsel %vm562_vm3, %v429_v56, 1065369472 }
  0xf8   : > { %902 = vmatmul.mubr.msk.bf16.gmra.mrb[4].mxu1 %vm436_vm2, %v430_v54 }
  0xf9   : > { %v889_v57 = vpop.f32.mrb[8].mxu0 }
  0xfa   : > { %591 = vrot.lane.b32.xlu1 %v429_v56, %s935_s28  ;;  %v396_v58 = vpop.f32.mrb[9].mxu0 }
  0xfb   : > { %v890_v59 = vpop.f32.mrb[10].mxu0 }
  0xfc   : > { %v432_v60 = vpack.c.bf16 %v890_v59, %v889_v57  ;;  %v399_v61 = vpop.f32.mrb[11].mxu0 }
  0xfd   : > { %v431_v62 = vpack.c.bf16 %v399_v61, %v396_v58 }
  0xfe   : > { %597 = vrot.lane.b32.xlu1 %v432_v60, %s935_s28  ;;  %v609_v30 = vsel %vm562_vm3, %v432_v60, 1065369472 }
  0xff   : > { %595 = vrot.lane.b32.xlu0 %v431_v62, %s935_s28  ;;  %905 = vmatprep.mubr.msk.bf16.mxu1 %vm436_vm2, %v431_v62  ;;  %v608_v33 = vsel %vm562_vm3, %v431_v62, 1065369472 }
 0x100   : > { %906 = vmatmul.mubr.msk.bf16.gmra.mrb[8].mxu1 %vm436_vm2, %v432_v60 }
 0x101   : > { %v893_v63 = vpop.f32.mrb[12].mxu0 }
 0x102   : > { %v412_v0 = vpop.f32.mrb[13].mxu0 }
 0x103   : > { %v894_v1 = vpop.f32.mrb[14].mxu0 }
 0x104   : > { %v434_v2 = vpack.c.bf16 %v894_v1, %v893_v63  ;;  %v415_v3 = vpop.f32.mrb[15].mxu0 }
 0x105   : > { %v433_v4 = vpack.c.bf16 %v415_v3, %v412_v0 }
 0x106   : > { %601 = vrot.lane.b32.xlu1 %v434_v2, %s935_s28  ;;  %v611_v42 = vsel %vm562_vm3, %v434_v2, 1065369472 }
 0x107   : > { %599 = vrot.lane.b32.xlu0 %v433_v4, %s935_s28  ;;  %909 = vmatprep.mubr.msk.bf16.mxu1 %vm436_vm2, %v433_v4  ;;  %v610_v45 = vsel %vm562_vm3, %v433_v4, 1065369472 }
 0x108   : > { %910 = vmatmul.mubr.msk.bf16.gmra.mrb[12].mxu1 %vm436_vm2, %v434_v2 }
 0x160   : > { %v590_v5 = vpop.permute.xlu0 %589 }
 0x161   : > { %v616_v7 = vsel %vm612_vm4, %v605_v6, %v590_v5 }
 0x162   : > { %v631_v8 = vsel %vm629_vm5, %v616_v7, 1065369472 }
 0x163   : > { %v840_v9 = vcombine.low %v631_v8, %v631_v8  ;;  %v841_v10 = vcombine.high %v631_v8, %v631_v8 }
 0x164   : > { %v588_v11 = vpop.permute.xlu0 %587 }
 0x165   : > { %697 = vst.msk [vmem:[%s1035_s5 + $0x8] sm:$0xf] %vm694_vm6, %v840_v9  ;;  %698 = vst.msk [vmem:[%s1035_s5 + $0xc] sm:$0xf] %vm694_vm6, %v841_v10  ;;  %v614_v13 = vsel %vm612_vm4, %v604_v12, %v588_v11 }
 0x166   : > { %v630_v14 = vsel %vm629_vm5, %v614_v13, 1065369472 }
 0x167   : > { %v838_v15 = vcombine.low %v630_v14, %v630_v14  ;;  %v839_v16 = vcombine.high %v630_v14, %v630_v14 }
 0x168   : > { %v594_v17 = vpop.permute.xlu1 %593 }
 0x169   : > { %695 = vst.msk [vmem:[%s1035_s5] sm:$0xf] %vm694_vm6, %v838_v15  ;;  %696 = vst.msk [vmem:[%s1035_s5 + $0x4] sm:$0xf] %vm694_vm6, %v839_v16  ;;  %v620_v19 = vsel %vm612_vm4, %v607_v18, %v594_v17 }
 0x16a   : > { %v633_v20 = vsel %vm629_vm5, %v620_v19, 1065369472 }
 0x16b   : > { %v844_v21 = vcombine.low %v633_v20, %v633_v20  ;;  %v845_v22 = vcombine.high %v633_v20, %v633_v20 }
 0x16c   : > { %v592_v23 = vpop.permute.xlu1 %591 }
 0x16d   : > { %701 = vst.msk [vmem:[%s1035_s5 + $0x18] sm:$0xf] %vm694_vm6, %v844_v21  ;;  %702 = vst.msk [vmem:[%s1035_s5 + $0x1c] sm:$0xf] %vm694_vm6, %v845_v22  ;;  %v618_v25 = vsel %vm612_vm4, %v606_v24, %v592_v23 }
 0x16e   : > { %v632_v26 = vsel %vm629_vm5, %v618_v25, 1065369472 }
 0x16f   : > { %v842_v27 = vcombine.low %v632_v26, %v632_v26  ;;  %v843_v28 = vcombine.high %v632_v26, %v632_v26 }
 0x170   : > { %v598_v29 = vpop.permute.xlu1 %597 }
 0x171   : > { %699 = vst.msk [vmem:[%s1035_s5 + $0x10] sm:$0xf] %vm694_vm6, %v842_v27  ;;  %700 = vst.msk [vmem:[%s1035_s5 + $0x14] sm:$0xf] %vm694_vm6, %v843_v28  ;;  %v624_v31 = vsel %vm612_vm4, %v609_v30, %v598_v29  ;;  %v596_v32 = vpop.permute.xlu0 %595 }
 0x172   : > { %v635_v34 = vsel %vm629_vm5, %v624_v31, 1065369472  ;;  %v622_v35 = vsel %vm612_vm4, %v608_v33, %v596_v32 }
 0x173   : > { %v848_v36 = vcombine.low %v635_v34, %v635_v34  ;;  %v849_v37 = vcombine.high %v635_v34, %v635_v34  ;;  %v634_v38 = vsel %vm629_vm5, %v622_v35, 1065369472 }
 0x174   : > { %v846_v39 = vcombine.low %v634_v38, %v634_v38  ;;  %v847_v40 = vcombine.high %v634_v38, %v634_v38 }
 0x175   : > { %705 = vst.msk [vmem:[%s1035_s5 + $0x28] sm:$0xf] %vm694_vm6, %v848_v36  ;;  %706 = vst.msk [vmem:[%s1035_s5 + $0x2c] sm:$0xf] %vm694_vm6, %v849_v37 }
 0x176   : > { %703 = vst.msk [vmem:[%s1035_s5 + $0x20] sm:$0xf] %vm694_vm6, %v846_v39  ;;  %704 = vst.msk [vmem:[%s1035_s5 + $0x24] sm:$0xf] %vm694_vm6, %v847_v40 }
 0x178   : > { %v602_v41 = vpop.permute.xlu1 %601 }
 0x179   : > { %v628_v43 = vsel %vm612_vm4, %v611_v42, %v602_v41  ;;  %v600_v44 = vpop.permute.xlu0 %599 }
 0x17a   : > { %v637_v46 = vsel %vm629_vm5, %v628_v43, 1065369472  ;;  %v626_v47 = vsel %vm612_vm4, %v610_v45, %v600_v44 }
 0x17b   : > { %v852_v48 = vcombine.low %v637_v46, %v637_v46  ;;  %v853_v49 = vcombine.high %v637_v46, %v637_v46  ;;  %v636_v50 = vsel %vm629_vm5, %v626_v47, 1065369472 }
 0x17c   : > { %v850_v51 = vcombine.low %v636_v50, %v636_v50  ;;  %v851_v52 = vcombine.high %v636_v50, %v636_v50 }
 0x17d   : > { %709 = vst.msk [vmem:[%s1035_s5 + $0x38] sm:$0xf] %vm694_vm6, %v852_v48  ;;  %710 = vst.msk [vmem:[%s1035_s5 + $0x3c] sm:$0xf] %vm694_vm6, %v853_v49 }
 0x17e   : > { %707 = vst.msk [vmem:[%s1035_s5 + $0x30] sm:$0xf] %vm694_vm6, %v850_v51  ;;  %708 = vst.msk [vmem:[%s1035_s5 + $0x34] sm:$0xf] %vm694_vm6, %v851_v52 }
 0x1c3   : > { %v899_v53 = vpop.f32.mrb[0].mxu1 }
 0x1c4   : > { %565 = vst.msk [vmem:[%s1095_s9 + $0x10] sm:$0xff] %vm562_vm3, %v899_v53  ;;  %v499_v54 = vpop.f32.mrb[1].mxu1 }
 0x1c5   : > { %563 = vst.msk [vmem:[%s1095_s9] sm:$0xff] %vm562_vm3, %v499_v54  ;;  %v900_v55 = vpop.f32.mrb[2].mxu1 }
 0x1c6   : > { %566 = vst.msk [vmem:[%s1095_s9 + $0x18] sm:$0xff] %vm562_vm3, %v900_v55  ;;  %v502_v56 = vpop.f32.mrb[3].mxu1 }
 0x1c7   : > { %564 = vst.msk [vmem:[%s1095_s9 + $0x8] sm:$0xff] %vm562_vm3, %v502_v56 }
 0x1cb   : > { %v903_v57 = vpop.f32.mrb[4].mxu1 }
 0x1cc   : > { %569 = vst.msk [vmem:[%s1095_s9 + $0x30] sm:$0xff] %vm562_vm3, %v903_v57  ;;  %v515_v58 = vpop.f32.mrb[5].mxu1 }
 0x1cd   : > { %567 = vst.msk [vmem:[%s1095_s9 + $0x20] sm:$0xff] %vm562_vm3, %v515_v58  ;;  %v904_v59 = vpop.f32.mrb[6].mxu1 }
 0x1ce   : > { %570 = vst.msk [vmem:[%s1095_s9 + $0x38] sm:$0xff] %vm562_vm3, %v904_v59  ;;  %v518_v60 = vpop.f32.mrb[7].mxu1 }
 0x1cf   : > { %568 = vst.msk [vmem:[%s1095_s9 + $0x28] sm:$0xff] %vm562_vm3, %v518_v60 }
 0x1d3   : > { %v907_v61 = vpop.f32.mrb[8].mxu1 }
 0x1d4   : > { %573 = vst.msk [vmem:[%s1095_s9 + $0x50] sm:$0xff] %vm562_vm3, %v907_v61  ;;  %v531_v62 = vpop.f32.mrb[9].mxu1 }
 0x1d5   : > { %571 = vst.msk [vmem:[%s1095_s9 + $0x40] sm:$0xff] %vm562_vm3, %v531_v62  ;;  %v908_v63 = vpop.f32.mrb[10].mxu1 }
 0x1d6   : > { %574 = vst.msk [vmem:[%s1095_s9 + $0x58] sm:$0xff] %vm562_vm3, %v908_v63  ;;  %v534_v0 = vpop.f32.mrb[11].mxu1 }
 0x1d7   : > { %572 = vst.msk [vmem:[%s1095_s9 + $0x48] sm:$0xff] %vm562_vm3, %v534_v0 }
 0x1db   : > { %v911_v1 = vpop.f32.mrb[12].mxu1 }
 0x1dc   : > { %577 = vst.msk [vmem:[%s1095_s9 + $0x70] sm:$0xff] %vm562_vm3, %v911_v1  ;;  %v547_v2 = vpop.f32.mrb[13].mxu1 }
 0x1dd   : > { %575 = vst.msk [vmem:[%s1095_s9 + $0x60] sm:$0xff] %vm562_vm3, %v547_v2  ;;  %v912_v3 = vpop.f32.mrb[14].mxu1 }
 0x1de   : > { %578 = vst.msk [vmem:[%s1095_s9 + $0x78] sm:$0xff] %vm562_vm3, %v912_v3  ;;  %v550_v4 = vpop.f32.mrb[15].mxu1 }
 0x1df   : > { %576 = vst.msk [vmem:[%s1095_s9 + $0x68] sm:$0xff] %vm562_vm3, %v550_v4 }
 0x1e0 PF: > { %s15_s15 = sadd.s32 1, %s932_s15  }
 0x1e1   : > { %p12_p4 = scmp.ge.s32.totalorder %s15_s15, 4  }
 0x1e3   :  { %14 = sbr.rel (!%p12_p4) target bundleno = 1 (0x1), region = 74 }

// kernel: skipgat_forward.5
= control target key start
LH: loop header
LB: loop body
LE: loop exit
PB: predicated region body
PF: predicated region fallthrough
CT: control target
= control target key end

     0   :  { %s2523_s18 = smov 0   ;;  %s3804_s0 = inlined_call_operand.vmem [shape: f32[256,2], index: 0, kind: input, shape index: {}]   ;;  %s3805_s1 = inlined_call_operand.vmem [shape: f32[2,256], index: 1, kind: input, shape index: {}]   ;;  %s3806_s2 = inlined_call_operand.vmem [shape: bf16[256,34], index: 2, kind: input, shape index: {}]   ;;  %s3807_s3 = inlined_call_operand.vmem [shape: s8[256,256], index: 3, kind: input, shape index: {}]   ;;  %s3808_s4 = inlined_call_operand.vmem [shape: f32[1,32], index: 4, kind: input, shape index: {}]   ;;  %s3809_s5 = inlined_call_operand.vmem [shape: bf16[256,32], index: 5, kind: output, shape index: {}]  }
   0x1 LB: > { %s2061_s19 = sadd.s32 4294967295, %s2486_s18   ;;  %p2065_p0 = scmp.ge.s32.totalorder %s2486_s18, 1  ;;  %s2486_s18 = sphi %s2523_s18, %s15_s18  }
   0x2   : > { %p200_p1 = scmp.lt.s32.totalorder %s2486_s18, 3 }
   0x4   : > { %p201_p2 = pnand %p2065_p0, %p200_p1 }
   0x6   : > { %204 = sbr.rel (%p201_p2) target bundleno = 1049 (0x419), region = 40 }
   0xd   : > { %s2066_s20 = sshll.u32 %s2061_s19, 4  ;;  %v2488_v0 = vmov 1   ;;  %v2538_v1 = vld [vmem:[%s3806_s2 + $0x40] sm:$0xff]   ;;  %v2561_v5 = vld [vmem:[%s3806_s2 + $0x48] sm:$0xff]   ;;  %v2584_v9 = vld [vmem:[%s3806_s2 + $0x10] sm:$0xff]   ;;  %s2068_s12 = sshll.u32 %s2061_s19, 2 }
   0xe   : > { %2267 = vset.pattern.permute.xlu1 %v2488_v0  ;;  %2266 = vset.pattern.permute.xlu0 %v2488_v0  ;;  %p235_p3 = scmp.lt.s32.totalorder %s2066_s20, 31  ;;  %v2544_v2 = vld [vmem:[%s3806_s2] sm:$0xff]   ;;  %v2575_v8 = vld [vmem:[%s3806_s2 + $0x8] sm:$0xff]   ;;  %v2589_v10 = vld [vmem:[%s3806_s2 + $0x50] sm:$0xff]   ;;  %p241_p4 = scmp.lt.s32.totalorder %s2068_s12, 7  ;;  %v3810_v28 = vmov 0  }
   0xf   : > { %2125 = vmatprep.subr.bf16.mxu0 %v2538_v1  ;;  %v2602_v13 = vld [vmem:[%s3806_s2 + $0x58] sm:$0xff]   ;;  %v2697_v57 = vld [vmem:[%s3806_s2 + $0x60] sm:$0xff]  }
  0x10   : > { %s4042_s20 = smov (!%p235_p3, %s2066_s20), 31  ;;  %2126 = vmatpush3.bf16.msra.mxu0 %v2544_v2  ;;  %v2617_v16 = vld [vmem:[%s3806_s2 + $0x18] sm:$0xff]   ;;  %s4044_s12 = smov (!%p241_p4, %s2068_s12), 7  ;;  %v2702_v62 = vld [vmem:[%s3806_s2 + $0x20] sm:$0xff]  }
  0x11   : > { %s2067_s23 = sshll.u32 %s4042_s20, 3  ;;  %2127 = vmatprep.subr.bf16.mxu0 %v2561_v5  ;;  %s2108_s17 = sshll.u32 %s4044_s12, 4 }
  0x12   : > { %s2549_s28 = scalar_lea.vmem %s3804_s0, %s2067_s23  ;;  %s2648_s22 = scalar_lea.vmem %s3807_s3, %s2108_s17 }
  0x13   : > { %v2553_v3 = vld [vmem:[%s2549_s28 + $0x10] sm:$0xff]  ;;  %v2556_v4 = vld [vmem:[%s2549_s28] sm:$0xff]  ;;  %v2567_v6 = vld [vmem:[%s2549_s28 + $0x18] sm:$0xff]  ;;  %s2490_s23 = smov 111   ;;  %s2492_s17 = smov 16  }
  0x14   : > { %1190 = vperm.xlu1 %2267, %v2553_v3   ;;  %1182 = vperm.xlu0 %2266, %v2556_v4   ;;  %v2570_v7 = vld [vmem:[%s2549_s28 + $0x8] sm:$0xff]  ;;  %v2595_v12 = vld [vmem:[%s2549_s28 + $0x20] sm:$0xff]  ;;  %v2606_v14 = vld [vmem:[%s2549_s28 + $0x38] sm:$0xff] }
  0x15   : > { %2128 = vmatpush3.bf16.msra.mxu0 %v2575_v8  ;;  %v2592_v11 = vld [vmem:[%s2549_s28 + $0x28] sm:$0xff]  ;;  %v2612_v15 = vld [vmem:[%s2549_s28 + $0x30] sm:$0xff]  ;;  %v2627_v18 = vld [vmem:[%s2549_s28 + $0x40] sm:$0xff] }
  0x16   : > { %2129 = vmatprep.subr.bf16.mxu0 %v2589_v10  ;;  %v2621_v17 = vld [vmem:[%s2549_s28 + $0x48] sm:$0xff]  ;;  %v2632_v19 = vld [vmem:[%s2549_s28 + $0x58] sm:$0xff]  ;;  %v2635_v20 = vld [vmem:[%s2549_s28 + $0x50] sm:$0xff] }
  0x17   : > { %3872 = vst [vmem:[#allocation2_spill] sm:$0xff] %v2632_v19  ;;  %v2640_v21 = vld [vmem:[%s2549_s28 + $0x68] sm:$0xff]  ;;  %v2643_v22 = vld [vmem:[%s2549_s28 + $0x60] sm:$0xff]  ;;  %v2655_v25 = vld [vmem:[%s2549_s28 + $0x78] sm:$0xff] }
  0x18   : > { %1194 = vperm.xlu1 %2267, %v2567_v6   ;;  %1186 = vperm.xlu0 %2266, %v2570_v7   ;;  %3873 = vst [vmem:[#allocation3_spill] sm:$0xff] %v2640_v21  ;;  %v260_v23 = vld [vmem:[%s2648_s22 + $0x20] sm:$0xff]  ;;  %v261_v24 = vld [vmem:[%s2648_s22 + $0x28] sm:$0xff]  ;;  %v2658_v26 = vld [vmem:[%s2549_s28 + $0x70] sm:$0xff] }
  0x19   : > { %2130 = vmatpush3.bf16.msra.mxu0 %v2584_v9  ;;  %3874 = vst [vmem:[#allocation4_spill] sm:$0xff] %v2658_v26  ;;  %vm268_vm0 = vnez %v260_v23  ;;  %vm269_vm1 = vnez %v261_v24  ;;  %v262_v27 = vld [vmem:[%s2648_s22 + $0x30] sm:$0xff]  ;;  %v263_v36 = vld [vmem:[%s2648_s22 + $0x38] sm:$0xff] }
  0x1a   : > { %2131 = vmatprep.subr.bf16.mxu0 %v2602_v13  ;;  %v520_v29 = vsel %vm268_vm0, 16843009, %v3810_v28  ;;  %v521_v30 = vsel %vm269_vm1, 16843009, %v3810_v28  ;;  %vm270_vm2 = vnez %v262_v27  ;;  %vm271_vm3 = vnez %v263_v36 }
  0x1b   : > { %v542_v31 = vunpack.c.1.s8 %v520_v29  ;;  %v543_v32 = vunpack.c.1.s8 %v521_v30  ;;  %v540_v33 = vunpack.c.0.s8 %v520_v29  ;;  %v541_v34 = vunpack.c.0.s8 %v521_v30 }
  0x1c   : > { %1202 = vperm.xlu1 %2267, %v2592_v11   ;;  %1198 = vperm.xlu0 %2266, %v2595_v12   ;;  %v544_v35 = vunpack.c.2.s8 %v520_v29  ;;  %v545_v38 = vunpack.c.2.s8 %v521_v30  ;;  %v546_v39 = vunpack.c.3.s8 %v520_v29  ;;  %v547_v41 = vunpack.c.3.s8 %v521_v30 }
  0x1d   : > { %2132 = vmatpush3.bf16.msra.mxu0 %v2617_v16  ;;  %v574_v37 = vpack.c.b16 %v543_v32, %v542_v31  ;;  %v572_v40 = vpack.c.b16 %v541_v34, %v540_v33  ;;  %v522_v44 = vsel %vm270_vm2, 16843009, %v3810_v28  ;;  %v523_v48 = vsel %vm271_vm3, 16843009, %v3810_v28  ;;  %v256_v31 = vld [vmem:[%s2648_s22] sm:$0xff]  ;;  %v257_v32 = vld [vmem:[%s2648_s22 + $0x8] sm:$0xff] }
  0x1e   : > { %v576_v43 = vpack.c.b16 %v545_v38, %v544_v35  ;;  %v578_v46 = vpack.c.b16 %v547_v41, %v546_v39  ;;  %v550_v49 = vunpack.c.1.s8 %v522_v44  ;;  %v551_v52 = vunpack.c.1.s8 %v523_v48  ;;  %2133 = vmatprep.subr.bf16.mxu0 %v2697_v57  ;;  %v2739_v33 = vld [vmem:[%s3806_s2 + $0x70] sm:$0xff]   ;;  %v2753_v41 = vld [vmem:[%s3806_s2 + $0x78] sm:$0xff]  }
  0x1f   : > { %v575_v42 = vpack.c.b8 %v574_v37, %v574_v37  ;;  %v573_v45 = vpack.c.b8 %v572_v40, %v572_v40  ;;  %v554_v59 = vunpack.c.3.s8 %v522_v44  ;;  %v555_v60 = vunpack.c.3.s8 %v523_v48  ;;  %v2744_v34 = vld [vmem:[%s3806_s2 + $0x30] sm:$0xff]  }
  0x20   : > { %1210 = vperm.xlu1 %2267, %v2606_v14   ;;  %1206 = vperm.xlu0 %2266, %v2612_v15   ;;  %v577_v47 = vpack.c.b8 %v576_v43, %v576_v43  ;;  %v579_v51 = vpack.c.b8 %v578_v46, %v578_v46  ;;  %v582_v56 = vpack.c.b16 %v551_v52, %v550_v49  ;;  %v548_v61 = vunpack.c.0.s8 %v522_v44  ;;  %v258_v43 = vld [vmem:[%s2648_s22 + $0x10] sm:$0xff] }
  0x21   : > { %vm597_vm4 = vnez %v575_v42  ;;  %vm596_vm5 = vnez %v573_v45  ;;  %v549_v63 = vunpack.c.0.s8 %v523_v48  ;;  %v552_v0 = vunpack.c.2.s8 %v522_v44  ;;  %2134 = vmatpush3.bf16.msra.mxu0 %v2702_v62  ;;  %v259_v44 = vld [vmem:[%s2648_s22 + $0x18] sm:$0xff]  ;;  %s2072_s22 = sshll.u32 %s4042_s20, 2 }
  0x22   : > { %v2679_v50 = vsel %vm597_vm4, 16843009, %v3810_v28  ;;  %v2682_v53 = vsel %vm596_vm5, 16843009, %v3810_v28  ;;  %vm598_vm6 = vnez %v577_v47  ;;  %vm599_vm7 = vnez %v579_v51  ;;  %v2760_v45 = vld [vmem:[%s3806_s2 + $0x38] sm:$0xff]   ;;  %s3722_s25 = scalar_lea.vmem %s3809_s5, %s2072_s22 }
  0x23   : > { %v2685_v54 = vsel %vm598_vm6, 16843009, %v3810_v28  ;;  %v2692_v55 = vsel %vm599_vm7, 16843009, %v3810_v28  ;;  %v583_v58 = vpack.c.b8 %v582_v56, %v582_v56  ;;  %vm264_vm12 = vnez %v256_v31 }
  0x24   : > { %1218 = vperm.xlu1 %2267, %v2621_v17   ;;  %1214 = vperm.xlu0 %2266, %v2627_v18   ;;  %3875 = vst [vmem:[#allocation5_spill] sm:$0xff] %v2685_v54  ;;  %3876 = vst [vmem:[#allocation6_spill] sm:$0xff] %v2692_v55  ;;  %vm265_vm13 = vnez %v257_v32  ;;  %v516_v35 = vsel %vm264_vm12, 16843009, %v3810_v28  ;;  %v402_v42 = vlaneseq  ;;  %vm266_vm14 = vnez %v258_v43 }
  0x25   : > { %vm601_vm8 = vnez %v583_v58  ;;  %v517_v36 = vsel %vm265_vm13, 16843009, %v3810_v28  ;;  %v524_v37 = vunpack.c.0.s8 %v516_v35  ;;  %v528_v39 = vunpack.c.2.s8 %v516_v35 }
  0x26   : > { %v525_v38 = vunpack.c.0.s8 %v517_v36  ;;  %v529_v40 = vunpack.c.2.s8 %v517_v36  ;;  %v526_v46 = vunpack.c.1.s8 %v516_v35  ;;  %v527_v47 = vunpack.c.1.s8 %v517_v36 }
  0x27   : > { %v531_v49 = vunpack.c.3.s8 %v517_v36  ;;  %vm267_vm15 = vnez %v259_v44  ;;  %v2764_v56 = vshrl.u32 %v402_v42, 7 }
  0x28   : > { %1226 = vperm.xlu1 %2267, %v2632_v19   ;;  %1222 = vperm.xlu0 %2266, %v2635_v20   ;;  %v556_v51 = vpack.c.b16 %v525_v38, %v524_v37  ;;  %v560_v52 = vpack.c.b16 %v529_v40, %v528_v39  ;;  %v558_v58 = vpack.c.b16 %v527_v47, %v526_v46 }
  0x29   : > { %3881 = vst [vmem:[#allocation11_spill] sm:$0xff] %v2764_v56 }
  0x2c   : > { %1234 = vperm.xlu1 %2267, %v2640_v21   ;;  %1230 = vperm.xlu0 %2266, %v2643_v22  }
  0x30   : > { %1242 = vperm.xlu1 %2267, %v2655_v25   ;;  %1238 = vperm.xlu0 %2266, %v2658_v26  }
  0x34   : > { %1551 = vrot.lane.b32.xlu1 %v2544_v2, %s2490_s23  ;;  %1567 = vrot.lane.b32.xlu0 %v2538_v1, %s2490_s23  ;;  %v2712_v1 = vld [vmem:[%s3806_s2 + $0x68] sm:$0xff]   ;;  %v586_v2 = vpack.c.b16 %v555_v60, %v554_v59  ;;  %v2767_v60 = vsel %vm266_vm14, 16843009, %v3810_v28 }
  0x35   : > { %2268 = vset.pattern.permute.xlu1 %v3810_v28  ;;  %2269 = vset.pattern.permute.xlu0 %v3810_v28  ;;  %v534_v31 = vunpack.c.1.s8 %v2767_v60 }
  0x36   : > { %2135 = vmatprep.subr.bf16.mxu0 %v2712_v1 }
  0x38   : > { %1569 = vrot.lane.b32.xlu1 %v2561_v5, %s2490_s23  ;;  %1553 = vrot.lane.b32.xlu0 %v2575_v8, %s2490_s23  ;;  %v553_v5 = vunpack.c.2.s8 %v523_v48  ;;  %v2715_v8 = vsel %vm601_vm8, 16843009, %v3810_v28  ;;  %v530_v48 = vunpack.c.3.s8 %v516_v35 }
  0x39   : > { %3877 = vst [vmem:[#allocation7_spill] sm:$0xff] %v2715_v8 }
  0x3a   : > { %v562_v59 = vpack.c.b16 %v531_v49, %v530_v48 }
  0x3c   : > { %1555 = vrot.lane.b32.xlu1 %v2584_v9, %s2490_s23  ;;  %1571 = vrot.lane.b32.xlu0 %v2589_v10, %s2490_s23  ;;  %v580_v9 = vpack.c.b16 %v549_v63, %v548_v61  ;;  %v587_v10 = vpack.c.b8 %v586_v2, %v586_v2  ;;  %v2770_v61 = vsel %vm267_vm15, 16843009, %v3810_v28  ;;  %v557_v63 = vpack.c.b8 %v556_v51, %v556_v51 }
  0x3d   : > { %v1247_v2 = vsub.s32 1, %v2764_v56  ;;  %v535_v32 = vunpack.c.1.s8 %v2770_v61 }
  0x3e   : > { %v581_v23 = vpack.c.b8 %v580_v9, %v580_v9  ;;  %vm603_vm9 = vnez %v587_v10  ;;  %v2777_v9 = vld [vmem:[%s3805_s1] sm:$0xf]  ;;  %v559_v10 = vpack.c.b8 %v558_v58, %v558_v58  ;;  %vm588_vm0 = vnez %v557_v63 }
  0x3f   : > { %v2725_v27 = vsel %vm603_vm9, 16843009, %v3810_v28  ;;  %3882 = vst [vmem:[#allocation12_spill] sm:$0xff] %v2777_v9  ;;  %v1248_v35 = vrot.slane %v2777_v9, %v1247_v2  ;;  %v604_v38 = vsel %vm588_vm0, 16843009, %v3810_v28  ;;  %v566_v40 = vpack.c.b16 %v535_v32, %v534_v31 }
  0x40   : > { %1573 = vrot.lane.b32.xlu1 %v2602_v13, %s2490_s23  ;;  %1557 = vrot.lane.b32.xlu0 %v2617_v16, %s2490_s23  ;;  %v584_v13 = vpack.c.b16 %v553_v5, %v552_v0  ;;  %v2722_v16 = vld [vmem:[%s3806_s2 + $0x28] sm:$0xff]   ;;  %3878 = vst [vmem:[#allocation8_spill] sm:$0xff] %v2725_v27  ;;  %vm600_vm10 = vnez %v581_v23  ;;  %v561_v0 = vpack.c.b8 %v560_v52, %v560_v52  ;;  %v1251_v5 = vsub.s32 3, %v2764_v56 }
  0x41   : > { %2136 = vmatpush3.bf16.msra.mxu0 %v2722_v16  ;;  %v2729_v29 = vsel %vm600_vm10, 16843009, %v3810_v28  ;;  %v532_v23 = vunpack.c.0.s8 %v2767_v60  ;;  %vm589_vm2 = vnez %v559_v10  ;;  %v2787_v42 = vrot.slane %v1248_v35, %v1247_v2 }
  0x42   : > { %v585_v24 = vpack.c.b8 %v584_v13, %v584_v13  ;;  %3879 = vst [vmem:[#allocation9_spill] sm:$0xff] %v2729_v29  ;;  %2137 = vmatprep.subr.bf16.mxu0 %v2739_v33  ;;  %v563_v13 = vpack.c.b8 %v562_v59, %v562_v59  ;;  %vm590_vm1 = vnez %v561_v0  ;;  %v1252_v36 = vrot.slane %v2777_v9, %v1251_v5 }
  0x43   : > { %v606_v39 = vsel %vm590_vm1, 16843009, %v3810_v28  ;;  %v605_v44 = vsel %vm589_vm2, 16843009, %v3810_v28  ;;  %v620_v47 = vunpack.c.0.s8 %v604_v38  ;;  %v621_v48 = vunpack.c.1.s8 %v604_v38 }
  0x44   : > { %vm602_vm11 = vnez %v585_v24  ;;  %v533_v24 = vunpack.c.0.s8 %v2770_v61  ;;  %vm591_vm3 = vnez %v563_v13  ;;  %v2789_v43 = vrot.slane %v1252_v36, %v1247_v2 }
  0x45   : > { %v2732_v30 = vsel %vm602_vm11, 16843009, %v3810_v28  ;;  %2138 = vmatpush3.bf16.msra.mxu0 %v2744_v34  ;;  %v607_v46 = vsel %vm591_vm3, 16843009, %v3810_v28  ;;  %v624_v49 = vunpack.c.0.s8 %v606_v39  ;;  %v625_v52 = vunpack.c.1.s8 %v606_v39 }
  0x46   : > { %3880 = vst [vmem:[#allocation10_spill] sm:$0xff] %v2732_v30  ;;  %2139 = vmatprep.subr.bf16.mxu0 %v2753_v41  ;;  %v564_v37 = vpack.c.b16 %v533_v24, %v532_v23  ;;  %v567_v58 = vpack.c.b8 %v566_v40, %v566_v40  ;;  %v622_v0 = vunpack.c.0.s8 %v605_v44  ;;  %v623_v5 = vunpack.c.1.s8 %v605_v44 }
  0x47   : > { %v626_v10 = vunpack.c.0.s8 %v607_v46  ;;  %v627_v13 = vunpack.c.1.s8 %v607_v46  ;;  %vm2797_vm4 = vcmp.ne.s32.totalorder %v620_v47, 0  ;;  %v3883_v32 = vmov 0 }
  0x48   : > { %v565_v51 = vpack.c.b8 %v564_v37, %v564_v37  ;;  %v3884_v32 = vsel %vm2797_vm4, 4294967295, %v3883_v32  ;;  %vm2801_vm5 = vcmp.ne.s32.totalorder %v621_v48, 0  ;;  %v3886_v35 = vmov 0 }
  0x49   : > { %2140 = vmatpush3.bf16.msra.mxu0 %v2760_v45  ;;  %3885 = vst [vmem:[#allocation13_spill] sm:$0xff] %v3884_v32  ;;  %v3887_v35 = vsel %vm2801_vm5, 4294967295, %v3886_v35  ;;  %vm2805_vm6 = vcmp.ne.s32.totalorder %v624_v49, 0  ;;  %v3889_v36 = vmov 0  ;;  %vm2813_vm8 = vnez %v567_v58 }
  0x4a   : > { %3888 = vst [vmem:[#allocation14_spill] sm:$0xff] %v3887_v35  ;;  %v3890_v36 = vsel %vm2805_vm6, 4294967295, %v3889_v36  ;;  %vm2809_vm7 = vnez %v565_v51  ;;  %vm2817_vm9 = vcmp.ne.s32.totalorder %v625_v52, 0  ;;  %vm2821_vm10 = vcmp.ne.s32.totalorder %v622_v0, 0 }
  0x4b   : > { %3891 = vst [vmem:[#allocation15_spill] sm:$0xff] %v3890_v36  ;;  %vm2825_vm11 = vcmp.ne.s32.totalorder %v623_v5, 0  ;;  %vm2832_vm12 = vcmp.ne.s32.totalorder %v626_v10, 0  ;;  %v3903_v9 = vmov 0  ;;  %vm2836_vm13 = vcmp.ne.s32.totalorder %v627_v13, 0 }
  0x4c   : > { %v3904_v9 = vsel %vm2832_vm12, 4294967295, %v3903_v9  ;;  %v3906_v52 = vmov 0  ;;  %v3909_v0 = vmov 0   ;;  %v3910_v36 = vmov 0 }
  0x4d   : > { %3905 = vst [vmem:[#allocation17_spill] sm:$0xff] %v3904_v9  ;;  %v3907_v52 = vsel %vm2836_vm13, 4294967295, %v3906_v52  ;;  %v608_v5 = vsel %vm2809_vm7, 16843009, %v3909_v0 }
  0x4e   : > { %3908 = vst [vmem:[#allocation18_spill] sm:$0xff] %v3907_v52 }
  0x93   : > { %v1191_v59 = vpop.permute.xlu1 %1190  ;;  %v1183_v63 = vpop.permute.xlu0 %1182 }
  0x94   : > { %v1267_v23 = vadd.f32 %v2787_v42, %v1191_v59  ;;  %v1268_v2 = vadd.f32 %v2789_v43, %v1191_v59  ;;  %v1263_v24 = vadd.f32 %v2787_v42, %v1183_v63  ;;  %v1264_v31 = vadd.f32 %v2789_v43, %v1183_v63 }
  0x95   : > { %v3896_v59 = vmov 0 }
  0x96   : > { %v1299_v38 = vmul.f32 0.2, %v1267_v23  ;;  %v1300_v39 = vmul.f32 0.2, %v1268_v2  ;;  %v1295_v40 = vmul.f32 0.2, %v1263_v24 }
  0x97   : > { %v1296_v46 = vmul.f32 0.2, %v1264_v31  ;;  %v1195_v47 = vpop.permute.xlu1 %1194  ;;  %v1187_v48 = vpop.permute.xlu0 %1186  ;;  %v3897_v59 = vsel %vm2817_vm9, 4294967295, %v3896_v59 }
  0x98   : > { %3898 = vst [vmem:[#allocation16_spill] sm:$0xff] %v3897_v59  ;;  %v1269_v58 = vadd.f32 %v2787_v42, %v1195_v47  ;;  %v1265_v63 = vadd.f32 %v2787_v42, %v1187_v48  ;;  %v1266_v28 = vadd.f32 %v2789_v43, %v1187_v48  ;;  %v1270_v30 = vadd.f32 %v2789_v43, %v1195_v47 }
  0x99   : > { %v1327_v56 = vmax.f32 %v1263_v24, %v1295_v40  ;;  %v1328_v29 = vmax.f32 %v1264_v31, %v1296_v46  ;;  %v609_v48 = vsel %vm2813_vm8, 16843009, %v3909_v0  ;;  %v1331_v8 = vmax.f32 %v1267_v23, %v1299_v38 }
  0x9a   : > { %v1301_v10 = vmul.f32 0.2, %v1269_v58  ;;  %v1297_v27 = vmul.f32 0.2, %v1265_v63  ;;  %v1332_v55 = vmax.f32 %v1268_v2, %v1300_v39  ;;  %v1298_v13 = vmul.f32 0.2, %v1266_v28 }
  0x9b   : > { %v1203_v54 = vpop.permute.xlu1 %1202  ;;  %v1199_v26 = vpop.permute.xlu0 %1198  ;;  %v2849_v21 = vsel %vm2797_vm4, %v1327_v56, -1e+30  ;;  %v2853_v37 = vsel %vm2801_vm5, %v1328_v29, -1e+30  ;;  %v628_v24 = vunpack.c.0.s8 %v608_v5  ;;  %v1302_v2 = vmul.f32 0.2, %v1270_v30 }
  0x9c   : > { %v1273_v31 = vadd.f32 %v2787_v42, %v1203_v54  ;;  %v1274_v40 = vadd.f32 %v2789_v43, %v1203_v54  ;;  %v1271_v44 = vadd.f32 %v2787_v42, %v1199_v26  ;;  %v1272_v23 = vadd.f32 %v2789_v43, %v1199_v26 }
  0x9d   : > { %v1391_v38 = vmax.f32 %v2849_v21, %v2853_v37  ;;  %v1329_v39 = vmax.f32 %v1265_v63, %v1297_v27  ;;  %v629_v56 = vunpack.c.1.s8 %v608_v5  ;;  %v2863_v29 = vsel %vm2805_vm6, %v1331_v8, -1e+30 }
  0x9e   : > { %v1303_v46 = vmul.f32 0.2, %v1271_v44  ;;  %v2867_v47 = vsel %vm2817_vm9, %v1332_v55, -1e+30  ;;  %v630_v54 = vunpack.c.0.s8 %v609_v48  ;;  %v1304_v35 = vmul.f32 0.2, %v1272_v23 }
  0x9f   : > { %1392 = vmax.xlane.f32.xlu1 %v1391_v38  ;;  %v2869_v32 = vpop.permute.xlu1 %1210  ;;  %v2871_v26 = vpop.permute.xlu0 %1206  ;;  %v1330_v19 = vmax.f32 %v1266_v28, %v1298_v13  ;;  %v2875_v27 = vsel %vm2821_vm10, %v1329_v39, -1e+30  ;;  %v1333_v63 = vmax.f32 %v1269_v58, %v1301_v10  ;;  %v1305_v5 = vmul.f32 0.2, %v1273_v31 }
  0xa0   : > { %v1306_v8 = vmul.f32 0.2, %v1274_v40  ;;  %vm2877_vm14 = vcmp.ne.s32.totalorder %v628_v24, 0  ;;  %v631_v55 = vunpack.c.1.s8 %v609_v48  ;;  %v1397_v38 = vmax.f32 %v2863_v29, %v2867_v47 }
  0xa1   : > { %v3911_v36 = vsel %vm2877_vm14, 4294967295, %v3910_v36  ;;  %v2885_v59 = vsel %vm2825_vm11, %v1330_v19, -1e+30  ;;  %v1334_v28 = vmax.f32 %v1270_v30, %v1302_v2  ;;  %v1335_v13 = vmax.f32 %v1271_v44, %v1303_v46 }
  0xa2   : > { %3912 = vst [vmem:[#allocation19_spill] sm:$0xff] %v3911_v36  ;;  %v1394_v39 = vmax.f32 %v2875_v27, %v2885_v59  ;;  %vm2889_vm15 = vcmp.ne.s32.totalorder %v629_v56, 0  ;;  %v3913_v58 = vmov 0  ;;  %v2899_v24 = vsel %vm2832_vm12, %v1333_v63, -1e+30 }
  0xa3   : > { %v3914_v58 = vsel %vm2889_vm15, 4294967295, %v3913_v58  ;;  %1398 = vmax.xlane.f32.xlu1 %v1397_v38  ;;  %v2893_v10 = vpop.permute.xlu1 %1218  ;;  %v2895_v48 = vpop.permute.xlu0 %1214  ;;  %v2903_v19 = vsel %vm2836_vm13, %v1334_v28, -1e+30  ;;  %v1336_v30 = vmax.f32 %v1272_v23, %v1304_v35  ;;  %v2907_v44 = vsel %vm2877_vm14, %v1335_v13, -1e+30 }
  0xa4   : > { %3915 = vst [vmem:[#allocation20_spill] sm:$0xff] %v3914_v58  ;;  %1395 = vmax.xlane.f32.xlu0 %v1394_v39  ;;  %vm2909_vm0 = vcmp.ne.s32.totalorder %v630_v54, 0  ;;  %v3916_v2 = vmov 0  ;;  %vm2913_vm1 = vcmp.ne.s32.totalorder %v631_v55, 0  ;;  %v3919_v56 = vmov 0 }
  0xa5   : > { %v3917_v2 = vsel %vm2909_vm0, 4294967295, %v3916_v2  ;;  %v3920_v56 = vsel %vm2913_vm1, 4294967295, %v3919_v56  ;;  %v2919_v46 = vsel %vm2889_vm15, %v1336_v30, -1e+30  ;;  %v1337_v63 = vmax.f32 %v1273_v31, %v1305_v5 }
  0xa6   : > { %3918 = vst [vmem:[#allocation21_spill] sm:$0xff] %v3917_v2  ;;  %3921 = vst [vmem:[#allocation22_spill] sm:$0xff] %v3920_v56  ;;  %v1338_v38 = vmax.f32 %v1274_v40, %v1306_v8  ;;  %v1400_v35 = vmax.f32 %v2899_v24, %v2903_v19  ;;  %v1403_v23 = vmax.f32 %v2907_v44, %v2919_v46 }
  0xa7   : > { %v2925_v54 = vpop.permute.xlu1 %1226  ;;  %v2927_v28 = vpop.permute.xlu0 %1222  ;;  %v2931_v55 = vsel %vm2909_vm0, %v1337_v63, -1e+30 }
  0xa8   : > { %v2935_v13 = vsel %vm2913_vm1, %v1338_v38, -1e+30  ;;  %1401 = vmax.xlane.f32.xlu0 %v1400_v35  ;;  %1404 = vmax.xlane.f32.xlu1 %v1403_v23 }
  0xa9   : > { %v1406_v31 = vmax.f32 %v2931_v55, %v2935_v13 }
  0xab   : > { %v2939_v40 = vpop.permute.xlu1 %1234  ;;  %v2941_v5 = vpop.permute.xlu0 %1230 }
  0xac   : > { %1407 = vmax.xlane.f32.xlu0 %v1406_v31 }
  0xaf   : > { %v2943_v8 = vpop.permute.xlu1 %1242  ;;  %v2945_v39 = vpop.permute.xlu0 %1238 }
  0xb3   : > { %v1552_v30 = vpop.permute.xlu1 %1551  ;;  %v1568_v63 = vpop.permute.xlu0 %1567 }
  0xb4   : > { %2189 = vmatprep.subr.bf16.mxu1 %v1568_v63  ;;  %v537_v63 = vunpack.c.2.s8 %v2770_v61 }
  0xb5   : > { %2190 = vmatpush3.bf16.msra.mxu1 %v1552_v30  ;;  %v536_v30 = vunpack.c.2.s8 %v2767_v60 }
  0xb7   : > { %v1570_v38 = vpop.permute.xlu1 %1569  ;;  %v1554_v56 = vpop.permute.xlu0 %1553 }
  0xb8   : > { %2191 = vmatprep.subr.bf16.mxu1 %v1570_v38 }
  0xb9   : > { %1559 = vrot.lane.b32.xlu1 %v2702_v62, %s2490_s23  ;;  %2192 = vmatpush3.bf16.msra.mxu1 %v1554_v56  ;;  %v568_v62 = vpack.c.b16 %v537_v63, %v536_v30  ;;  %v538_v56 = vunpack.c.3.s8 %v2767_v60  ;;  %v1278_v60 = vadd.f32 %v2789_v43, %v2869_v32 }
  0xbb   : > { %v1556_v35 = vpop.permute.xlu1 %1555  ;;  %v1572_v23 = vpop.permute.xlu0 %1571  ;;  %v569_v38 = vpack.c.b8 %v568_v62, %v568_v62 }
  0xbc   : > { %2193 = vmatprep.subr.bf16.mxu1 %v1572_v23 }
  0xbd   : > { %1577 = vrot.lane.b32.xlu1 %v2712_v1, %s2490_s23  ;;  %2194 = vmatpush3.bf16.msra.mxu1 %v1556_v35  ;;  %v539_v1 = vunpack.c.3.s8 %v2770_v61  ;;  %vm594_vm2 = vnez %v569_v38  ;;  %v1310_v38 = vmul.f32 0.2, %v1278_v60 }
  0xbf   : > { %v1574_v31 = vpop.permute.xlu1 %1573  ;;  %v1558_v2 = vpop.permute.xlu0 %1557  ;;  %v570_v35 = vpack.c.b16 %v539_v1, %v538_v56 }
  0xc0   : > { %2195 = vmatprep.subr.bf16.mxu1 %v1574_v31  ;;  %v610_v31 = vsel %vm594_vm2, 16843009, %v3909_v0 }
  0xc1   : > { %2196 = vmatpush3.bf16.msra.mxu1 %v1558_v2  ;;  %v571_v23 = vpack.c.b8 %v570_v35, %v570_v35  ;;  %v1275_v2 = vadd.f32 %v2787_v42, %v2871_v26  ;;  %v632_v63 = vunpack.c.0.s8 %v610_v31  ;;  %v633_v62 = vunpack.c.1.s8 %v610_v31 }
  0xc2   : > { %1575 = vrot.lane.b32.xlu0 %v2697_v57, %s2490_s23  ;;  %v1276_v57 = vadd.f32 %v2789_v43, %v2871_v26  ;;  %v3922_v26 = vmov 0  ;;  %v3928_v31 = vmov 0 }
  0xc3   : > { %vm595_vm3 = vnez %v571_v23  ;;  %v1307_v61 = vmul.f32 0.2, %v1275_v2  ;;  %vm2969_vm7 = vcmp.ne.s32.totalorder %v632_v63, 0  ;;  %vm2973_vm8 = vcmp.ne.s32.totalorder %v633_v62, 0 }
  0xc4   : > { %v1308_v30 = vmul.f32 0.2, %v1276_v57  ;;  %v611_v56 = vsel %vm595_vm3, 16843009, %v3909_v0  ;;  %v3923_v26 = vsel %vm2969_vm7, 4294967295, %v3922_v26  ;;  %v3925_v23 = vmov 0 }
  0xc5   : > { %v1339_v35 = vmax.f32 %v1275_v2, %v1307_v61  ;;  %3924 = vst [vmem:[#allocation23_spill] sm:$0xff] %v3923_v26  ;;  %v3926_v23 = vsel %vm2973_vm8, 4294967295, %v3925_v23  ;;  %v634_v9 = vunpack.c.0.s8 %v611_v56  ;;  %v3931_v61 = vmov 0 }
  0xc6   : > { %1561 = vrot.lane.b32.xlu0 %v2722_v16, %s2490_s23  ;;  %v1277_v16 = vadd.f32 %v2787_v42, %v2869_v32  ;;  %v1340_v52 = vmax.f32 %v1276_v57, %v1308_v30  ;;  %3927 = vst [vmem:[#allocation24_spill] sm:$0xff] %v3926_v23  ;;  %v635_v32 = vunpack.c.1.s8 %v611_v56  ;;  %v1342_v57 = vmax.f32 %v1278_v60, %v1310_v38 }
  0xc7   : > { %v2979_v58 = vsel %vm2969_vm7, %v1339_v35, -1e+30  ;;  %vm2985_vm2 = vcmp.ne.s32.totalorder %v634_v9, 0  ;;  %v638_v60 = vunpack.c.0.s8 %v2679_v50  ;;  %v3934_v56 = vmov 0 }
  0xc8   : > { %v1309_v1 = vmul.f32 0.2, %v1277_v16  ;;  %v2983_v0 = vsel %vm2973_vm8, %v1340_v52, -1e+30  ;;  %v3929_v31 = vsel %vm2985_vm2, 4294967295, %v3928_v31  ;;  %vm2989_vm3 = vcmp.ne.s32.totalorder %v635_v32, 0 }
  0xc9   : > { %3930 = vst [vmem:[#allocation25_spill] sm:$0xff] %v3929_v31  ;;  %v3932_v61 = vsel %vm2989_vm3, 4294967295, %v3931_v61  ;;  %v1409_v30 = vmax.f32 %v2979_v58, %v2983_v0  ;;  %v3001_v52 = vsel %vm2989_vm3, %v1342_v57, -1e+30  ;;  %vm3026_vm3 = vcmp.ne.s32.totalorder %v638_v60, 0 }
  0xca   : > { %v1341_v2 = vmax.f32 %v1277_v16, %v1309_v1  ;;  %3933 = vst [vmem:[#allocation26_spill] sm:$0xff] %v3932_v61  ;;  %v1281_v16 = vadd.f32 %v2787_v42, %v2893_v10  ;;  %v3935_v56 = vsel %vm3026_vm3, 4294967295, %v3934_v56  ;;  %v637_v32 = vunpack.c.1.s8 %v2682_v53 }
  0xcb   : > { %3936 = vst [vmem:[#allocation27_spill] sm:$0xff] %v3935_v56 }
  0xcc   : > { %v2997_v63 = vsel %vm2985_vm2, %v1341_v2, -1e+30 }
  0xcd   : > { %v1412_v9 = vmax.f32 %v2997_v63, %v3001_v52 }
  0xe1   : > { %1410 = vmax.xlane.f32.xlu1 %v1409_v30 }
  0xe5   : > { %1413 = vmax.xlane.f32.xlu0 %v1412_v9  ;;  %v3941_v9 = vmov 0 }
  0xf2   : > { %328 = vperm.xlu1 %2268, %v2570_v7   ;;  %v1313_v7 = vmul.f32 0.2, %v1281_v16 }
  0xf4   : > { %v1345_v62 = vmax.f32 %v1281_v16, %v1313_v7  ;;  %v3944_v16 = vmov 0 }
  0xf6   : > { %333 = vperm.xlu1 %2268, %v2553_v3   ;;  %v1282_v3 = vadd.f32 %v2789_v43, %v2893_v10  ;;  %v3937_v10 = vmov 0 }
  0xfa   : > { %343 = vperm.xlu1 %2268, %v2595_v12   ;;  %v1314_v12 = vmul.f32 0.2, %v1282_v3 }
  0xfb   : > { %1579 = vrot.lane.b32.xlu0 %v2739_v33, %s2490_s23  ;;  %v639_v33 = vunpack.c.1.s8 %v2679_v50  ;;  %v3036_v50 = vsel %vm3026_vm3, %v1345_v62, -1e+30  ;;  %vm3050_vm3 = vcmp.ne.s32.totalorder %v637_v32, 0 }
  0xfc   : > { %v3945_v16 = vsel %vm3050_vm3, 4294967295, %v3944_v16 }
  0xfd   : > { %vm3030_vm2 = vcmp.ne.s32.totalorder %v639_v33, 0  ;;  %3946 = vst [vmem:[#allocation31_spill] sm:$0xff] %v3945_v16  ;;  %v1287_v16 = vadd.f32 %v2787_v42, %v2941_v5 }
  0xfe   : > { %1563 = vrot.lane.b32.xlu1 %v2744_v34, %s2490_s23  ;;  %v1279_v34 = vadd.f32 %v2787_v42, %v2895_v48  ;;  %v3938_v10 = vsel %vm3030_vm2, 4294967295, %v3937_v10 }
  0xff   : > { %1565 = vrot.lane.b32.xlu0 %v2760_v45, %s2490_s23  ;;  %v1280_v45 = vadd.f32 %v2789_v43, %v2895_v48  ;;  %3939 = vst [vmem:[#allocation28_spill] sm:$0xff] %v3938_v10  ;;  %v636_v48 = vunpack.c.0.s8 %v2682_v53  ;;  %v1319_v26 = vmul.f32 0.2, %v1287_v16 }
 0x100   : > { %v1311_v1 = vmul.f32 0.2, %v1279_v34 }
 0x101   : > { %v1312_v38 = vmul.f32 0.2, %v1280_v45  ;;  %vm3046_vm8 = vcmp.ne.s32.totalorder %v636_v48, 0 }
 0x102   : > { %1581 = vrot.lane.b32.xlu1 %v2753_v41, %s2490_s23  ;;  %v1346_v41 = vmax.f32 %v1282_v3, %v1314_v12  ;;  %v1343_v57 = vmax.f32 %v1279_v34, %v1311_v1  ;;  %v3942_v9 = vsel %vm3046_vm8, 4294967295, %v3941_v9 }
 0x103   : > { %v1344_v30 = vmax.f32 %v1280_v45, %v1312_v38  ;;  %3943 = vst [vmem:[#allocation30_spill] sm:$0xff] %v3942_v9  ;;  %v3970_v9 = vmov 0 }
 0x104   : > { %v3040_v35 = vsel %vm3030_vm2, %v1346_v41, -1e+30  ;;  %v3056_v3 = vsel %vm3046_vm8, %v1343_v57, -1e+30  ;;  %v1284_v57 = vadd.f32 %v2789_v43, %v2927_v28 }
 0x105   : > { %3940 = vst [vmem:[#allocation29_spill] sm:$0xff] %v3040_v35  ;;  %v1418_v2 = vmax.f32 %v3036_v50, %v3040_v35  ;;  %3947 = vst [vmem:[#allocation32_spill] sm:$0xff] %v3056_v3  ;;  %v3060_v53 = vsel %vm3050_vm3, %v1344_v30, -1e+30 }
 0x106   : > { %3948 = vst [vmem:[#allocation33_spill] sm:$0xff] %v3060_v53  ;;  %v1415_v7 = vmax.f32 %v3056_v3, %v3060_v53  ;;  %v3973_v3 = vld [vmem:[#allocation11_spill] sm:$0xff] }
 0x107   : > { %v404_v35 = vsub.s32 0, %v3973_v3 }
 0x11e   : > { %1419 = vmax.xlane.f32.xlu0 %v1418_v2 }
 0x126   : > { %1416 = vmax.xlane.f32.xlu1 %v1415_v7 }
 0x12c   : > { %v3064_v12 = vpop.xlane.xlu1 %1392 }
 0x12d   : > { %v1440_v60 = vsub.f32 %v2853_v37, %v3064_v12 }
 0x12f   : > { %v1473_v62 = vmul.f32 1.442695, %v1440_v60 }
 0x130   : > { %v3068_v33 = vpop.xlane.xlu1 %1398 }
 0x131   : > { %v3070_v34 = vpop.xlane.xlu0 %1395  ;;  %2288 = vpow2.f32 %v1473_v62 }
 0x132   : > { %v1442_v45 = vsub.f32 %v2885_v59, %v3070_v34 }
 0x134   : > { %v1477_v41 = vmul.f32 1.442695, %v1442_v45  ;;  %323 = vperm.xlu0 %2269, %v2556_v4   ;;  %v3954_v45 = vld [vmem:[#allocation7_spill] sm:$0xff] }
 0x135   : > { %v3075_v1 = vpop.xlane.xlu1 %1404  ;;  %v3077_v38 = vpop.xlane.xlu0 %1401  ;;  %v646_v62 = vunpack.c.0.s8 %v3954_v45 }
 0x136   : > { %2290 = vpow2.f32 %v1477_v41  ;;  %v647_v41 = vunpack.c.1.s8 %v3954_v45 }
 0x137   : > { %353 = vperm.xlu1 %2268, %v2612_v15   ;;  %vm3132_vm0 = vcmp.ne.s32.totalorder %v646_v62, 0 }
 0x138   : > { %338 = vperm.xlu0 %2269, %v2567_v6   ;;  %vm3136_vm7 = vcmp.ne.s32.totalorder %v647_v41, 0  ;;  %v3972_v41 = vld [vmem:[#allocation9_spill] sm:$0xff] }
 0x139   : > { %v3081_v37 = vpop.xlane.xlu0 %1407  ;;  %v1560_v48 = vpop.permute.xlu1 %1559  ;;  %v644_v61 = vunpack.c.0.s8 %v3972_v41  ;;  %v645_v31 = vunpack.c.1.s8 %v3972_v41 }
 0x13b   : > { %363 = vperm.xlu1 %2268, %v2627_v18   ;;  %v2289_v4 = vpop.eup %2288  ;;  %v3950_v18 = vld [vmem:[#allocation3_spill] sm:$0xff] }
 0x13c   : > { %348 = vperm.xlu0 %2269, %v2592_v11   ;;  %v3949_v11 = vld [vmem:[#allocation2_spill] sm:$0xff] }
 0x13d   : > { %v1576_v59 = vpop.permute.xlu0 %1575  ;;  %v1578_v32 = vpop.permute.xlu1 %1577 }
 0x13e   : > { %2197 = vmatprep.subr.bf16.mxu1 %v1576_v59  ;;  %v1286_v59 = vadd.f32 %v2789_v43, %v2925_v54 }
 0x13f   : > { %373 = vperm.xlu1 %2268, %v2635_v20   ;;  %2198 = vmatpush3.bf16.msra.mxu1 %v1560_v48  ;;  %v3951_v20 = vld [vmem:[#allocation4_spill] sm:$0xff]  ;;  %v1285_v48 = vadd.f32 %v2787_v42, %v2925_v54  ;;  %v3963_v54 = vmov 0 }
 0x140   : > { %358 = vperm.xlu0 %2269, %v2606_v14   ;;  %2199 = vmatprep.subr.bf16.mxu1 %v1578_v32  ;;  %v2291_v2 = vpop.eup %2290  ;;  %v1283_v14 = vadd.f32 %v2787_v42, %v2927_v28  ;;  %v1316_v28 = vmul.f32 0.2, %v1284_v57 }
 0x141   : > { %v1562_v15 = vpop.permute.xlu0 %1561  ;;  %v1536_v6 = vpack.c.bf16 %v2291_v2, %v2289_v4  ;;  %v1289_v4 = vadd.f32 %v2787_v42, %v2939_v40  ;;  %v3955_v2 = vmov 0 }
 0x142   : > { %v1315_v32 = vmul.f32 0.2, %v1283_v14  ;;  %v1348_v45 = vmax.f32 %v1284_v57, %v1316_v28  ;;  %v1292_v28 = vadd.f32 %v2789_v43, %v2945_v39 }
 0x143   : > { %383 = vperm.xlu1 %2268, %v2643_v22   ;;  %2200 = vmatpush3.bf16.msra.mxu1 %v1562_v15  ;;  %v3952_v22 = vld [vmem:[#allocation5_spill] sm:$0xff]  ;;  %v1290_v15 = vadd.f32 %v2789_v43, %v2939_v40  ;;  %v1293_v40 = vadd.f32 %v2787_v42, %v2943_v8  ;;  %v1321_v10 = vmul.f32 0.2, %v1289_v4 }
 0x144   : > { %368 = vperm.xlu0 %2269, %v2621_v17   ;;  %1631 = vmatprep.mubr.bf16.mxu1 %v1536_v6  ;;  %v640_v30 = vunpack.c.0.s8 %v3952_v22  ;;  %v641_v7 = vunpack.c.1.s8 %v3952_v22  ;;  %v3953_v17 = vld [vmem:[#allocation6_spill] sm:$0xff]  ;;  %v3958_v6 = vmov 0  ;;  %v1294_v22 = vadd.f32 %v2789_v43, %v2943_v8 }
 0x145   : > { %v642_v60 = vunpack.c.0.s8 %v3953_v17  ;;  %v1322_v56 = vmul.f32 0.2, %v1290_v15  ;;  %v1288_v8 = vadd.f32 %v2789_v43, %v2941_v5  ;;  %v1353_v36 = vmax.f32 %v1289_v4, %v1321_v10 }
 0x146   : > { %vm3111_vm2 = vcmp.ne.s32.totalorder %v640_v30, 0  ;;  %vm3115_vm3 = vcmp.ne.s32.totalorder %v641_v7, 0  ;;  %v1326_v57 = vmul.f32 0.2, %v1294_v22  ;;  %v3974_v43 = vmov 0 }
 0x147   : > { %398 = vperm.xlu1 %2268, %v2655_v25   ;;  %v643_v25 = vunpack.c.1.s8 %v3953_v17  ;;  %v3956_v2 = vsel %vm3111_vm2, 4294967295, %v3955_v2  ;;  %v3959_v6 = vsel %vm3115_vm3, 4294967295, %v3958_v6  ;;  %vm3119_vm8 = vcmp.ne.s32.totalorder %v642_v60, 0 }
 0x148   : > { %378 = vperm.xlu0 %2269, %v3949_v11   ;;  %3957 = vst [vmem:[#allocation2_spill] sm:$0xff] %v3956_v2  ;;  %3960 = vst [vmem:[#allocation3_spill] sm:$0xff] %v3959_v6  ;;  %v3961_v11 = vmov 0  ;;  %v1317_v17 = vmul.f32 0.2, %v1285_v48  ;;  %v1354_v53 = vmax.f32 %v1290_v15, %v1322_v56  ;;  %v1358_v4 = vmax.f32 %v1294_v22, %v1326_v57 }
 0x149   : > { %v3962_v11 = vsel %vm3119_vm8, 4294967295, %v3961_v11  ;;  %vm3123_vm1 = vcmp.ne.s32.totalorder %v643_v25, 0  ;;  %v1318_v60 = vmul.f32 0.2, %v1286_v59  ;;  %v1347_v25 = vmax.f32 %v1283_v14, %v1315_v32 }
 0x14a   : > { %v3964_v54 = vsel %vm3123_vm1, 4294967295, %v3963_v54  ;;  %v1325_v14 = vmul.f32 0.2, %v1293_v40  ;;  %v1291_v32 = vadd.f32 %v2787_v42, %v2945_v39  ;;  %v1320_v41 = vmul.f32 0.2, %v1288_v8  ;;  %v3976_v39 = vld [vmem:[#allocation10_spill] sm:$0xff] }
 0x14b   : > { %v3157_v5 = vsel %vm3111_vm2, %v1347_v25, -1e+30  ;;  %v1350_v23 = vmax.f32 %v1286_v59, %v1318_v60  ;;  %v408_v42 = vsub.s32 2, %v3973_v3  ;;  %v648_v25 = vunpack.c.0.s8 %v3976_v39 }
 0x14c   : > { %388 = vperm.xlu0 %2269, %v3950_v18   ;;  %v3965_v18 = vld [vmem:[#allocation8_spill] sm:$0xff]  ;;  %v1323_v2 = vmul.f32 0.2, %v1291_v32  ;;  %v1324_v6 = vmul.f32 0.2, %v1292_v28  ;;  %v649_v59 = vunpack.c.1.s8 %v3976_v39  ;;  %v1357_v3 = vmax.f32 %v1293_v40, %v1325_v14 }
 0x14d   : > { %v651_v62 = vunpack.c.1.s8 %v3965_v18  ;;  %v3179_v10 = vsel %vm3123_vm1, %v1350_v23, -1e+30  ;;  %v3183_v15 = vsel %vm3132_vm0, %v1353_v36, -1e+30  ;;  %v1351_v60 = vmax.f32 %v1287_v16, %v1319_v26 }
 0x14e   : > { %vm3195_vm1 = vcmp.ne.s32.totalorder %v645_v31, 0  ;;  %v1356_v14 = vmax.f32 %v1292_v28, %v1324_v6 }
 0x14f   : > { %vm3165_vm12 = vcmp.ne.s32.totalorder %v651_v62, 0  ;;  %v3977_v62 = vld [vmem:[#allocation12_spill] sm:$0xff] }
 0x150   : > { %393 = vperm.xlu0 %2269, %v3951_v20   ;;  %v650_v20 = vunpack.c.0.s8 %v3965_v18  ;;  %v3161_v18 = vsel %vm3115_vm3, %v1348_v45, -1e+30  ;;  %v3975_v43 = vsel %vm3165_vm12, 4294967295, %v3974_v43  ;;  %v1352_v45 = vmax.f32 %v1288_v8, %v1320_v41 }
 0x151   : > { %v409_v39 = vrot.slane %v3977_v62, %v408_v42  ;;  %v1355_v8 = vmax.f32 %v1291_v32, %v1323_v2  ;;  %v1446_v2 = vsub.f32 %v2903_v19, %v3077_v38  ;;  %v1439_v32 = vsub.f32 %v2849_v21, %v3064_v12 }
 0x152   : > { %vm3145_vm13 = vcmp.ne.s32.totalorder %v650_v20, 0  ;;  %v1349_v20 = vmax.f32 %v1285_v48, %v1317_v17  ;;  %v1421_v48 = vmax.f32 %v3157_v5, %v3161_v18  ;;  %v3187_v17 = vsel %vm3136_vm7, %v1354_v53, -1e+30 }
 0x153   : > { %v3971_v9 = vsel %vm3145_vm13, 4294967295, %v3970_v9  ;;  %v1430_v26 = vmax.f32 %v3183_v15, %v3187_v17  ;;  %v3205_v16 = vsel %vm3145_vm13, %v1357_v3, -1e+30  ;;  %v3219_v22 = vsel %vm3195_vm1, %v1352_v45, -1e+30 }
 0x154   : > { %v3175_v56 = vsel %vm3119_vm8, %v1349_v20, -1e+30  ;;  %v405_v20 = vrot.slane %v3977_v62, %v404_v35  ;;  %vm3191_vm8 = vcmp.ne.s32.totalorder %v644_v61, 0  ;;  %v3209_v61 = vsel %vm3165_vm12, %v1358_v4, -1e+30 }
 0x155   : > { %v1424_v36 = vmax.f32 %v3175_v56, %v3179_v10  ;;  %v3215_v31 = vsel %vm3191_vm8, %v1351_v60, -1e+30  ;;  %v3223_v41 = vrot.slane %v409_v39, %v404_v35  ;;  %vm3225_vm12 = vcmp.ne.s32.totalorder %v648_v25, 0 }
 0x156   : > { %v3221_v57 = vrot.slane %v405_v20, %v404_v35  ;;  %vm3229_vm13 = vcmp.ne.s32.totalorder %v649_v59, 0  ;;  %v1441_v3 = vsub.f32 %v2875_v27, %v3070_v34  ;;  %v1436_v6 = vmax.f32 %v3205_v16, %v3209_v61 }
 0x157   : > { %v1427_v35 = vmax.f32 %v3215_v31, %v3219_v22  ;;  %v3247_v59 = vsel %vm3225_vm12, %v1355_v8, -1e+30  ;;  %v3251_v27 = vsel %vm3229_vm13, %v1356_v14, -1e+30  ;;  %v1444_v19 = vsub.f32 %v2867_v47, %v3068_v33 }
 0x158   : > { %v1475_v21 = vmul.f32 1.442695, %v1441_v3  ;;  %v1485_v12 = vmul.f32 1.442695, %v1446_v2  ;;  %v1433_v62 = vmax.f32 %v3247_v59, %v3251_v27  ;;  %v1471_v20 = vmul.f32 1.442695, %v1439_v32 }
 0x159   : > { %v1445_v14 = vsub.f32 %v2899_v24, %v3077_v38  ;;  %v1450_v3 = vsub.f32 %v2935_v13, %v3081_v37  ;;  %v1448_v13 = vsub.f32 %v2919_v46, %v3075_v1  ;;  %v1447_v46 = vsub.f32 %v2907_v44, %v3075_v1 }
 0x15a   : > { %2292 = vpow2.f32 %v1475_v21 }
 0x15b   : > { %2294 = vpow2.f32 %v1485_v12  ;;  %v1483_v49 = vmul.f32 1.442695, %v1445_v14  ;;  %v1493_v38 = vmul.f32 1.442695, %v1450_v3 }
 0x15c   : > { %2296 = vpow2.f32 %v1471_v20 }
 0x16b   : > { %1422 = vmax.xlane.f32.xlu1 %v1421_v48  ;;  %v2491_v48 = vmov 16  }
 0x16c   : > { %2270 = vset.pattern.permute.xlu0 %v2491_v48  ;;  %2271 = vset.pattern.permute.xlu1 %v2491_v48 }
 0x16e   : > { %v3211_v53 = vpop.xlane.xlu1 %1410 }
 0x16f   : > { %1425 = vmax.xlane.f32.xlu0 %v1424_v36  ;;  %1431 = vmax.xlane.f32.xlu1 %v1430_v26  ;;  %v1481_v26 = vmul.f32 1.442695, %v1444_v19  ;;  %v1489_v19 = vmul.f32 1.442695, %v1448_v13  ;;  %v1452_v12 = vsub.f32 %v2983_v0, %v3211_v53  ;;  %v1451_v0 = vsub.f32 %v2979_v58, %v3211_v53 }
 0x171   : > { %2298 = vpow2.f32 %v1481_v26  ;;  %v1497_v26 = vmul.f32 1.442695, %v1452_v12 }
 0x172   : > { %v329_v28 = vpop.permute.xlu1 %328  ;;  %v3243_v25 = vpop.xlane.xlu0 %1413  ;;  %2300 = vpow2.f32 %v1483_v49 }
 0x173   : > { %v422_v34 = vadd.f32 %v3221_v57, %v329_v28  ;;  %v423_v4 = vadd.f32 %v3223_v41, %v329_v28  ;;  %1437 = vmax.xlane.f32.xlu1 %v1436_v6  ;;  %1428 = vmax.xlane.f32.xlu0 %v1427_v35  ;;  %v1443_v35 = vsub.f32 %v2863_v29, %v3068_v33  ;;  %2302 = vpow2.f32 %v1493_v38 }
 0x174   : > { %v1449_v29 = vsub.f32 %v2931_v55, %v3081_v37  ;;  %v1454_v33 = vsub.f32 %v3001_v52, %v3243_v25  ;;  %v1487_v52 = vmul.f32 1.442695, %v1447_v46  ;;  %v1453_v44 = vsub.f32 %v2997_v63, %v3243_v25 }
 0x175   : > { %v454_v60 = vmul.f32 0.2, %v422_v34  ;;  %v455_v45 = vmul.f32 0.2, %v423_v4  ;;  %v1479_v28 = vmul.f32 1.442695, %v1443_v35 }
 0x176   : > { %v3259_v39 = vpop.permute.xlu1 %333  ;;  %v1580_v36 = vpop.permute.xlu0 %1579  ;;  %v1501_v37 = vmul.f32 1.442695, %v1454_v33  ;;  %v1499_v14 = vmul.f32 1.442695, %v1453_v44 }
 0x177   : > { %v486_v8 = vmax.f32 %v422_v34, %v454_v60  ;;  %v487_v47 = vmax.f32 %v423_v4, %v455_v45  ;;  %1434 = vmax.xlane.f32.xlu0 %v1433_v62  ;;  %2201 = vmatprep.subr.bf16.mxu1 %v1580_v36  ;;  %v2293_v34 = vpop.eup %2292  ;;  %2304 = vpow2.f32 %v1479_v28  ;;  %v1491_v62 = vmul.f32 1.442695, %v1449_v29 }
 0x178   : > { %v2295_v21 = vpop.eup %2294  ;;  %2306 = vpow2.f32 %v1489_v19  ;;  %v424_v29 = vadd.f32 %v3221_v57, %v3259_v39 }
 0x179   : > { %v3267_v2 = vsel %vm2821_vm10, %v486_v8, -1e+30  ;;  %v3271_v6 = vsel %vm2825_vm11, %v487_v47, -1e+30  ;;  %v2297_v45 = vpop.eup %2296  ;;  %2308 = vpow2.f32 %v1491_v62 }
 0x17a   : > { %v3275_v32 = vpop.permute.xlu1 %343  ;;  %v719_v24 = vmax.f32 %v3267_v2, %v3271_v6  ;;  %v1566_v60 = vpop.permute.xlu0 %1565  ;;  %v1535_v20 = vpack.c.bf16 %v2293_v34, %v2297_v45  ;;  %2310 = vpow2.f32 %v1501_v37  ;;  %v456_v33 = vmul.f32 0.2, %v424_v29  ;;  %v3986_v37 = vld [vmem:[#allocation29_spill] sm:$0xff] }
 0x17b   : > { %v2299_v55 = vpop.eup %2298  ;;  %2312 = vpow2.f32 %v1487_v52  ;;  %v425_v34 = vadd.f32 %v3223_v41, %v3259_v39  ;;  %v428_v46 = vadd.f32 %v3221_v57, %v3275_v32  ;;  %v3988_v39 = vld [vmem:[#allocation33_spill] sm:$0xff] }
 0x17c   : > { %720 = vmax.xlane.f32.xlu1 %v719_v24  ;;  %v1538_v36 = vpack.c.bf16 %v2295_v21, %v2299_v55  ;;  %v2301_v1 = vpop.eup %2300  ;;  %2314 = vpow2.f32 %v1497_v26  ;;  %v1495_v24 = vmul.f32 1.442695, %v1451_v0  ;;  %v488_v12 = vmax.f32 %v424_v29, %v456_v33  ;;  %v3987_v26 = vld [vmem:[#allocation32_spill] sm:$0xff] }
 0x17d   : > { %v2303_v8 = vpop.eup %2302  ;;  %2316 = vpow2.f32 %v1499_v14  ;;  %v460_v45 = vmul.f32 0.2, %v428_v46 }
 0x17e   : > { %v1564_v51 = vpop.permute.xlu1 %1563  ;;  %2318 = vpow2.f32 %v1495_v24 }
 0x17f   : > { %2202 = vmatpush3.bf16.msra.mxu1 %v1564_v51  ;;  %v492_v24 = vmax.f32 %v428_v46, %v460_v45 }
 0x181   : > { %v2305_v47 = vpop.eup %2304 }
 0x182   : > { %v1582_v4 = vpop.permute.xlu1 %1581  ;;  %v2307_v3 = vpop.eup %2306  ;;  %v1537_v35 = vpack.c.bf16 %v2301_v1, %v2305_v47  ;;  %v3309_v47 = vsel %vm2805_vm6, %v488_v12, -1e+30 }
 0x183   : > { %2203 = vmatprep.subr.bf16.mxu1 %v1582_v4  ;;  %v1540_v13 = vpack.c.bf16 %v2303_v8, %v2307_v3  ;;  %v2309_v49 = vpop.eup %2308  ;;  %v429_v4 = vadd.f32 %v3223_v41, %v3275_v32 }
 0x184   : > { %2204 = vmatpush3.bf16.msra.mxu1 %v1566_v60  ;;  %v2311_v63 = vpop.eup %2310  ;;  %v457_v60 = vmul.f32 0.2, %v425_v34 }
 0x185   : > { %v2313_v25 = vpop.eup %2312  ;;  %v461_v62 = vmul.f32 0.2, %v429_v4 }
 0x186   : > { %v2315_v38 = vpop.eup %2314  ;;  %v1539_v28 = vpack.c.bf16 %v2309_v49, %v2313_v25  ;;  %v489_v14 = vmax.f32 %v425_v34, %v457_v60 }
 0x187   : > { %1632 = vmatmul.mubr.bf16.vlgmr.msra.gmra.mrb[0].mxu1 %v1535_v20  ;;  %v1542_v51 = vpack.c.bf16 %v2311_v63, %v2315_v38  ;;  %v2317_v58 = vpop.eup %2316 }
 0x188   : > { %1639 = vmatprep.mubr.bf16.mxu1 %v1538_v36  ;;  %v2319_v53 = vpop.eup %2318  ;;  %v3323_v12 = vsel %vm2817_vm9, %v489_v14, -1e+30 }
 0x189   : > { %v1541_v19 = vpack.c.bf16 %v2317_v58, %v2319_v53  ;;  %3992 = vst [vmem:[#allocation4_spill] sm:$0xff] %v3323_v12 }
 0x18f   : > { %1640 = vmatmul.mubr.bf16.gmra.mrb[4].mxu1 %v1537_v35 }
 0x190   : > { %1647 = vmatprep.mubr.bf16.mxu1 %v1540_v13  ;;  %v493_v13 = vmax.f32 %v429_v4, %v461_v62 }
 0x197   : > { %1648 = vmatmul.mubr.bf16.gmra.mrb[8].mxu1 %v1539_v28 }
 0x198   : > { %1655 = vmatprep.mubr.bf16.mxu1 %v1542_v51 }
 0x19f   : > { %1656 = vmatmul.mubr.bf16.gmra.mrb[12].mxu1 %v1541_v19 }
 0x1ab   : > { %v1420_v21 = vpop.xlane.xlu0 %1419 }
 0x1ac   : > { %v1457_v55 = vsub.f32 %v3036_v50, %v1420_v21  ;;  %v1458_v20 = vsub.f32 %v3986_v37, %v1420_v21  ;;  %v4004_v37 = vld [vmem:[#allocation23_spill] sm:$0xff] }
 0x1ad   : > { %vm4005_vm6 = vnez %v4004_v37 }
 0x1ae   : > { %v1509_v49 = vmul.f32 1.442695, %v1458_v20  ;;  %v1507_v28 = vmul.f32 1.442695, %v1457_v55 }
 0x1b3   : > { %v1417_v52 = vpop.xlane.xlu1 %1416  ;;  %v324_v36 = vpop.permute.xlu0 %323 }
 0x1b4   : > { %v1455_v44 = vsub.f32 %v3987_v26, %v1417_v52  ;;  %v1456_v1 = vsub.f32 %v3988_v39, %v1417_v52  ;;  %v420_v0 = vadd.f32 %v3221_v57, %v324_v36  ;;  %v421_v8 = vadd.f32 %v3223_v41, %v324_v36 }
 0x1b5   : > { %v3334_v26 = vsel %vm2877_vm14, %v492_v24, -1e+30  ;;  %v3338_v39 = vsel %vm2889_vm15, %v493_v13, -1e+30 }
 0x1b6   : > { %v1503_v3 = vmul.f32 1.442695, %v1455_v44  ;;  %v1505_v35 = vmul.f32 1.442695, %v1456_v1  ;;  %v452_v50 = vmul.f32 0.2, %v420_v0 }
 0x1b7   : > { %v453_v63 = vmul.f32 0.2, %v421_v8  ;;  %v354_v25 = vpop.permute.xlu1 %353  ;;  %v339_v38 = vpop.permute.xlu0 %338  ;;  %3995 = vst [vmem:[#allocation5_spill] sm:$0xff] %v3334_v26  ;;  %3997 = vst [vmem:[#allocation6_spill] sm:$0xff] %v3338_v39 }
 0x1b8   : > { %v484_v51 = vmax.f32 %v420_v0, %v452_v50  ;;  %v432_v58 = vadd.f32 %v3221_v57, %v354_v25  ;;  %v3313_v53 = vadd.f32 %v3223_v41, %v354_v25  ;;  %2320 = vpow2.f32 %v1505_v35 }
 0x1b9   : > { %v485_v19 = vmax.f32 %v421_v8, %v453_v63  ;;  %v426_v29 = vadd.f32 %v3221_v57, %v339_v38  ;;  %v427_v33 = vadd.f32 %v3223_v41, %v339_v38  ;;  %2322 = vpow2.f32 %v1503_v3 }
 0x1ba   : > { %v464_v34 = vmul.f32 0.2, %v432_v58  ;;  %v3319_v4 = vsel %vm2797_vm4, %v484_v51, -1e+30  ;;  %2324 = vpow2.f32 %v1509_v49  ;;  %v3341_v1 = vmul.f32 0.2, %v3313_v53 }
 0x1bb   : > { %v458_v60 = vmul.f32 0.2, %v426_v29  ;;  %v459_v45 = vmul.f32 0.2, %v427_v33  ;;  %v364_v62 = vpop.permute.xlu1 %363  ;;  %v349_v55 = vpop.permute.xlu0 %348  ;;  %v3327_v20 = vsel %vm2801_vm5, %v485_v19, -1e+30  ;;  %2326 = vpow2.f32 %v1507_v28 }
 0x1bc   : > { %v3330_v52 = vadd.f32 %v3221_v57, %v364_v62  ;;  %v430_v8 = vadd.f32 %v3221_v57, %v349_v55  ;;  %v431_v32 = vadd.f32 %v3223_v41, %v349_v55  ;;  %v496_v14 = vmax.f32 %v432_v58, %v464_v34  ;;  %v3998_v58 = vld [vmem:[#allocation17_spill] sm:$0xff] }
 0x1bd   : > { %v490_v0 = vmax.f32 %v426_v29, %v458_v60  ;;  %v491_v3 = vmax.f32 %v427_v33, %v459_v45  ;;  %v3346_v35 = vadd.f32 %v3223_v41, %v364_v62  ;;  %v716_v50 = vmax.f32 %v3319_v4, %v3327_v20  ;;  %v4001_v62 = vld [vmem:[#allocation18_spill] sm:$0xff] }
 0x1be   : > { %v3351_v24 = vmul.f32 0.2, %v3330_v52  ;;  %v462_v13 = vmul.f32 0.2, %v430_v8  ;;  %v463_v49 = vmul.f32 0.2, %v431_v32  ;;  %v722_v38 = vmax.f32 %v3309_v47, %v3323_v12 }
 0x1bf   : > { %v374_v63 = vpop.permute.xlu1 %373  ;;  %v359_v25 = vpop.permute.xlu0 %358  ;;  %717 = vmax.xlane.f32.xlu0 %v716_v50  ;;  %vm3999_vm4 = vnez %v3998_v58  ;;  %v728_v29 = vmax.f32 %v3334_v26, %v3338_v39  ;;  %v497_v33 = vmax.f32 %v3313_v53, %v3341_v1  ;;  %v3372_v60 = vmul.f32 0.2, %v3346_v35 }
 0x1c0   : > { %v3356_v28 = vadd.f32 %v3221_v57, %v374_v63  ;;  %v3359_v51 = vadd.f32 %v3223_v41, %v374_v63  ;;  %v3363_v19 = vsel %vm3999_vm4, %v490_v0, -1e+30  ;;  %v494_v34 = vmax.f32 %v430_v8, %v462_v13  ;;  %v4007_v63 = vld [vmem:[#allocation21_spill] sm:$0xff] }
 0x1c1   : > { %4000 = vst [vmem:[#allocation7_spill] sm:$0xff] %v3363_v19  ;;  %v434_v46 = vadd.f32 %v3221_v57, %v359_v25  ;;  %v435_v21 = vadd.f32 %v3223_v41, %v359_v25  ;;  %v495_v45 = vmax.f32 %v431_v32, %v463_v49  ;;  %vm4002_vm5 = vnez %v4001_v62 }
 0x1c2   : > { %v3376_v55 = vsel %vm4002_vm5, %v491_v3, -1e+30  ;;  %v3380_v36 = vsel %vm4005_vm6, %v496_v14, -1e+30  ;;  %v2321_v44 = vpop.eup %2320  ;;  %v500_v53 = vmax.f32 %v3330_v52, %v3351_v24  ;;  %v3387_v49 = vmul.f32 0.2, %v3356_v28 }
 0x1c3   : > { %4003 = vst [vmem:[#allocation8_spill] sm:$0xff] %v3376_v55  ;;  %4006 = vst [vmem:[#allocation9_spill] sm:$0xff] %v3380_v36  ;;  %v466_v1 = vmul.f32 0.2, %v434_v46  ;;  %v467_v0 = vmul.f32 0.2, %v435_v21  ;;  %v725_v8 = vmax.f32 %v3363_v19, %v3376_v55  ;;  %v384_v50 = vpop.permute.xlu1 %383  ;;  %v369_v13 = vpop.permute.xlu0 %368  ;;  %723 = vmax.xlane.f32.xlu0 %v722_v38  ;;  %vm4008_vm9 = vnez %v4007_v63 }
 0x1c4   : > { %v2323_v32 = vpop.eup %2322  ;;  %v3390_v3 = vmul.f32 0.2, %v3359_v51  ;;  %v3393_v14 = vadd.f32 %v3221_v57, %v384_v50  ;;  %v3397_v52 = vsel %vm4008_vm9, %v494_v34, -1e+30  ;;  %v3400_v58 = vadd.f32 %v3223_v41, %v384_v50  ;;  %v4009_v19 = vld [vmem:[#allocation22_spill] sm:$0xff] }
 0x1c5   : > { %v2325_v24 = vpop.eup %2324  ;;  %v498_v25 = vmax.f32 %v434_v46, %v466_v1  ;;  %726 = vmax.xlane.f32.xlu1 %v725_v8  ;;  %v438_v62 = vadd.f32 %v3221_v57, %v369_v13  ;;  %v439_v37 = vadd.f32 %v3223_v41, %v369_v13  ;;  %v499_v39 = vmax.f32 %v435_v21, %v467_v0 }
 0x1c6   : > { %v2327_v26 = vpop.eup %2326  ;;  %v3405_v38 = vmul.f32 0.2, %v3393_v14  ;;  %v1544_v55 = vpack.c.bf16 %v2325_v24, %v2321_v44  ;;  %vm4010_vm10 = vnez %v4009_v19  ;;  %v501_v13 = vmax.f32 %v3346_v35, %v3372_v60 }
 0x1c7   : > { %v3409_v34 = vsel %vm4010_vm10, %v495_v45, -1e+30  ;;  %v470_v63 = vmul.f32 0.2, %v438_v62  ;;  %v471_v46 = vmul.f32 0.2, %v439_v37  ;;  %v1543_v8 = vpack.c.bf16 %v2327_v26, %v2323_v32  ;;  %v399_v50 = vpop.permute.xlu1 %398  ;;  %v379_v12 = vpop.permute.xlu0 %378  ;;  %729 = vmax.xlane.f32.xlu0 %v728_v29 }
 0x1c8   : > { %v731_v1 = vmax.f32 %v3397_v52, %v3409_v34  ;;  %v504_v21 = vmax.f32 %v3356_v28, %v3387_v49  ;;  %1663 = vmatprep.mubr.bf16.mxu1 %v1544_v55  ;;  %v3418_v19 = vadd.f32 %v3221_v57, %v399_v50  ;;  %v4011_v45 = vld [vmem:[#allocation24_spill] sm:$0xff]  ;;  %v505_v26 = vmax.f32 %v3359_v51, %v3390_v3  ;;  %v4013_v28 = vld [vmem:[#allocation25_spill] sm:$0xff]  ;;  %v4016_v3 = vld [vmem:[#allocation26_spill] sm:$0xff] }
 0x1c9   : > { %vm4012_vm11 = vnez %v4011_v45  ;;  %v477_v0 = vmul.f32 0.2, %v3400_v58  ;;  %1664 = vmatmul.mubr.bf16.gmra.mrb[16].mxu1 %v1543_v8  ;;  %v3428_v35 = vadd.f32 %v3223_v41, %v399_v50  ;;  %vm4014_vm14 = vnez %v4013_v28  ;;  %v4019_v8 = vld [vmem:[#allocation30_spill] sm:$0xff] }
 0x1ca   : > { %v3422_v44 = vsel %vm4012_vm11, %v497_v33, -1e+30  ;;  %732 = vmax.xlane.f32.xlu1 %v731_v1  ;;  %v3432_v29 = vsel %vm4014_vm14, %v498_v25, -1e+30  ;;  %v502_v60 = vmax.f32 %v438_v62, %v470_v63  ;;  %v442_v55 = vadd.f32 %v3221_v57, %v379_v12 }
 0x1cb   : > { %4015 = vst [vmem:[#allocation11_spill] sm:$0xff] %v3432_v29  ;;  %v443_v33 = vadd.f32 %v3223_v41, %v379_v12  ;;  %v734_v32 = vmax.f32 %v3380_v36, %v3422_v44  ;;  %v508_v51 = vmax.f32 %v3393_v14, %v3405_v38  ;;  %v503_v49 = vmax.f32 %v439_v37, %v471_v46  ;;  %v389_v1 = vpop.permute.xlu0 %388  ;;  %v4021_v38 = vld [vmem:[#allocation31_spill] sm:$0xff] }
 0x1cc   : > { %vm4017_vm15 = vnez %v4016_v3  ;;  %vm4020_vm4 = vnez %v4019_v8  ;;  %v482_v62 = vmul.f32 0.2, %v3418_v19  ;;  %v474_v63 = vmul.f32 0.2, %v442_v55 }
 0x1cd   : > { %v3442_v24 = vsel %vm4017_vm15, %v499_v39, -1e+30  ;;  %v3446_v25 = vsel %vm4020_vm4, %v500_v53, -1e+30  ;;  %v475_v12 = vmul.f32 0.2, %v443_v33  ;;  %735 = vmax.xlane.f32.xlu0 %v734_v32  ;;  %v446_v37 = vadd.f32 %v3221_v57, %v389_v1 }
 0x1ce   : > { %4018 = vst [vmem:[#allocation10_spill] sm:$0xff] %v3442_v24  ;;  %v737_v50 = vmax.f32 %v3432_v29, %v3442_v24  ;;  %v483_v14 = vmul.f32 0.2, %v3428_v35  ;;  %v447_v39 = vadd.f32 %v3223_v41, %v389_v1  ;;  %vm4022_vm5 = vnez %v4021_v38  ;;  %v4023_v32 = vld [vmem:[#allocation27_spill] sm:$0xff]  ;;  %v4025_v24 = vld [vmem:[#allocation28_spill] sm:$0xff] }
 0x1cf   : > { %v3456_v46 = vsel %vm4022_vm5, %v501_v13, -1e+30  ;;  %v506_v53 = vmax.f32 %v442_v55, %v474_v63  ;;  %v507_v45 = vmax.f32 %v443_v33, %v475_v12  ;;  %vm4024_vm6 = vnez %v4023_v32  ;;  %v394_v13 = vpop.permute.xlu0 %393 }
 0x1d0   : > { %738 = vmax.xlane.f32.xlu1 %v737_v50  ;;  %v740_v28 = vmax.f32 %v3446_v25, %v3456_v46  ;;  %v3462_v3 = vsel %vm4024_vm6, %v502_v60, -1e+30  ;;  %v509_v8 = vmax.f32 %v3400_v58, %v477_v0  ;;  %v478_v29 = vmul.f32 0.2, %v446_v37 }
 0x1d1   : > { %v479_v36 = vmul.f32 0.2, %v447_v39  ;;  %vm4026_vm9 = vnez %v4025_v24  ;;  %v448_v33 = vadd.f32 %v3221_v57, %v394_v13  ;;  %v449_v63 = vadd.f32 %v3223_v41, %v394_v13 }
 0x1d2   : > { %v3467_v1 = vsel %vm4026_vm9, %v503_v49, -1e+30  ;;  %741 = vmax.xlane.f32.xlu0 %v740_v28  ;;  %v3475_v60 = vsel %vm3111_vm2, %v504_v21, -1e+30  ;;  %v510_v58 = vmax.f32 %v446_v37, %v478_v29  ;;  %v3479_v24 = vsel %vm3115_vm3, %v505_v26, -1e+30 }
 0x1d3   : > { %v743_v55 = vmax.f32 %v3462_v3, %v3467_v1  ;;  %v511_v0 = vmax.f32 %v447_v39, %v479_v36  ;;  %vm4029_vm10 = vnez %v3962_v11  ;;  %v480_v38 = vmul.f32 0.2, %v448_v33 }
 0x1d4   : > { %v3483_v49 = vsel %vm4029_vm10, %v506_v53, -1e+30  ;;  %v481_v28 = vmul.f32 0.2, %v449_v63  ;;  %v746_v57 = vmax.f32 %v3475_v60, %v3479_v24  ;;  %vm4030_vm11 = vnez %v3964_v54 }
 0x1d5   : > { %744 = vmax.xlane.f32.xlu1 %v743_v55  ;;  %v3489_v41 = vsel %vm4030_vm11, %v507_v45, -1e+30  ;;  %v3495_v21 = vsel %vm3191_vm8, %v508_v51, -1e+30  ;;  %v3499_v11 = vsel %vm3195_vm1, %v509_v8, -1e+30  ;;  %v512_v29 = vmax.f32 %v448_v33, %v480_v38 }
 0x1d6   : > { %v749_v36 = vmax.f32 %v3483_v49, %v3489_v41  ;;  %v3503_v26 = vsel %vm3132_vm0, %v510_v58, -1e+30  ;;  %v513_v37 = vmax.f32 %v449_v63, %v481_v28  ;;  %747 = vmax.xlane.f32.xlu0 %v746_v57  ;;  %v3507_v54 = vsel %vm3136_vm7, %v511_v0, -1e+30 }
 0x1d7   : > { %v514_v39 = vmax.f32 %v3418_v19, %v482_v62  ;;  %v515_v23 = vmax.f32 %v3428_v35, %v483_v14  ;;  %v752_v40 = vmax.f32 %v3495_v21, %v3499_v11  ;;  %v755_v30 = vmax.f32 %v3503_v26, %v3507_v54 }
 0x1d8   : > { %v3517_v51 = vsel %vm3225_vm12, %v512_v29, -1e+30  ;;  %v3521_v7 = vsel %vm3229_vm13, %v513_v37, -1e+30  ;;  %vm4031_vm0 = vnez %v3971_v9  ;;  %vm4032_vm1 = vnez %v3975_v43 }
 0x1d9   : > { %750 = vmax.xlane.f32.xlu1 %v749_v36  ;;  %v758_v19 = vmax.f32 %v3517_v51, %v3521_v7  ;;  %v3527_v35 = vsel %vm4031_vm0, %v514_v39, -1e+30  ;;  %v3531_v62 = vsel %vm4032_vm1, %v515_v23, -1e+30  ;;  %vm1872_vm12 = vcmask 130048  }
 0x1da   : > { %753 = vmax.xlane.f32.xlu0 %v752_v40  ;;  %v761_v42 = vmax.f32 %v3527_v35, %v3531_v62  ;;  %vm1976_vm13 = vcmask 257024  }
 0x1dd   : > { %756 = vmax.xlane.f32.xlu1 %v755_v30 }
 0x1de   : > { %759 = vmax.xlane.f32.xlu0 %v758_v19 }
 0x1e1   : > { %762 = vmax.xlane.f32.xlu1 %v761_v42 }
 0x1f8   : > { %v1423_v14 = vpop.xlane.xlu1 %1422 }
 0x1f9   : > { %v1459_v53 = vsub.f32 %v3157_v5, %v1423_v14  ;;  %v1460_v9 = vsub.f32 %v3161_v18, %v1423_v14 }
 0x1fb   : > { %v1511_v8 = vmul.f32 1.442695, %v1459_v53  ;;  %v1513_v13 = vmul.f32 1.442695, %v1460_v9 }
 0x1fc   : > { %v1432_v45 = vpop.xlane.xlu1 %1431  ;;  %v1426_v32 = vpop.xlane.xlu0 %1425 }
 0x1fd   : > { %v1461_v43 = vsub.f32 %v3175_v56, %v1426_v32  ;;  %v1462_v55 = vsub.f32 %v3179_v10, %v1426_v32  ;;  %v1466_v33 = vsub.f32 %v3187_v17, %v1432_v45  ;;  %2328 = vpow2.f32 %v1511_v8 }
 0x1fe   : > { %2330 = vpow2.f32 %v1513_v13  ;;  %v1465_v28 = vsub.f32 %v3183_v15, %v1432_v45 }
 0x1ff   : > { %v1515_v63 = vmul.f32 1.442695, %v1461_v43  ;;  %v1517_v12 = vmul.f32 1.442695, %v1462_v55  ;;  %v1525_v5 = vmul.f32 1.442695, %v1466_v33 }
 0x200   : > { %v1429_v58 = vpop.xlane.xlu0 %1428  ;;  %v1438_v18 = vpop.xlane.xlu1 %1437  ;;  %v1523_v29 = vmul.f32 1.442695, %v1465_v28 }
 0x201   : > { %v1464_v0 = vsub.f32 %v3219_v22, %v1429_v58  ;;  %2332 = vpow2.f32 %v1515_v63  ;;  %v1463_v50 = vsub.f32 %v3215_v31, %v1429_v58  ;;  %v1470_v17 = vsub.f32 %v3209_v61, %v1438_v18 }
 0x202   : > { %2334 = vpow2.f32 %v1517_v12  ;;  %v1469_v15 = vsub.f32 %v3205_v16, %v1438_v18 }
 0x203   : > { %v1521_v38 = vmul.f32 1.442695, %v1464_v0  ;;  %2336 = vpow2.f32 %v1525_v5  ;;  %v1519_v57 = vmul.f32 1.442695, %v1463_v50  ;;  %v1533_v22 = vmul.f32 1.442695, %v1470_v17 }
 0x204   : > { %v1435_v56 = vpop.xlane.xlu0 %1434  ;;  %v1531_v42 = vmul.f32 1.442695, %v1469_v15  ;;  %v4033_v17 = vld [vmem:[#allocation4_spill] sm:$0xff] }
 0x205   : > { %v1468_v10 = vsub.f32 %v3251_v27, %v1435_v56  ;;  %2338 = vpow2.f32 %v1521_v38  ;;  %v1467_v39 = vsub.f32 %v3247_v59, %v1435_v56 }
 0x206   : > { %2340 = vpow2.f32 %v1519_v57 }
 0x207   : > { %v1529_v36 = vmul.f32 1.442695, %v1468_v10  ;;  %v2329_v37 = vpop.eup %2328  ;;  %v1527_v61 = vmul.f32 1.442695, %v1467_v39 }
 0x208   : > { %v2331_v31 = vpop.eup %2330 }
 0x209   : > { %2342 = vpow2.f32 %v1529_v36  ;;  %v721_v55 = vpop.xlane.xlu1 %720  ;;  %v4035_v36 = vld [vmem:[#allocation8_spill] sm:$0xff] }
 0x20a   : > { %2344 = vpow2.f32 %v1523_v29  ;;  %v766_v33 = vsub.f32 %v3267_v2, %v721_v55  ;;  %v767_v63 = vsub.f32 %v3271_v6, %v721_v55  ;;  %v4034_v2 = vld [vmem:[#allocation7_spill] sm:$0xff] }
 0x20b   : > { %v2333_v23 = vpop.eup %2332  ;;  %2346 = vpow2.f32 %v1533_v22 }
 0x20c   : > { %v2335_v40 = vpop.eup %2334  ;;  %v1545_v27 = vpack.c.bf16 %v2333_v23, %v2329_v37  ;;  %2348 = vpow2.f32 %v1527_v61  ;;  %v800_v12 = vmul.f32 1.442695, %v766_v33  ;;  %v802_v18 = vmul.f32 1.442695, %v767_v63 }
 0x20d   : > { %v1546_v30 = vpack.c.bf16 %v2335_v40, %v2331_v31  ;;  %v2337_v19 = vpop.eup %2336  ;;  %2350 = vpow2.f32 %v1531_v42  ;;  %v4036_v31 = vld [vmem:[#allocation6_spill] sm:$0xff] }
 0x20e   : > { %2352 = vpow2.f32 %v800_v12 }
 0x20f   : > { %1671 = vmatprep.mubr.bf16.mxu1 %v1546_v30  ;;  %v2339_v48 = vpop.eup %2338 }
 0x210   : > { %1672 = vmatmul.mubr.bf16.gmra.mrb[20].mxu1 %v1545_v27  ;;  %v1548_v14 = vpack.c.bf16 %v2337_v19, %v2339_v48  ;;  %v2341_v53 = vpop.eup %2340  ;;  %v4037_v27 = vld [vmem:[#allocation5_spill] sm:$0xff] }
 0x212   : > { %1679 = vmatprep.mubr.bf16.mxu1 %v1548_v14 }
 0x213   : > { %v2343_v59 = vpop.eup %2342 }
 0x214   : > { %v2345_v9 = vpop.eup %2344 }
 0x215   : > { %v2347_v45 = vpop.eup %2346  ;;  %v1547_v32 = vpack.c.bf16 %v2345_v9, %v2341_v53 }
 0x216   : > { %v1550_v16 = vpack.c.bf16 %v2347_v45, %v2343_v59  ;;  %v2349_v8 = vpop.eup %2348 }
 0x217   : > { %v2351_v43 = vpop.eup %2350 }
 0x218   : > { %1680 = vmatmul.mubr.bf16.gmra.mrb[24].mxu1 %v1547_v32  ;;  %v1549_v13 = vpack.c.bf16 %v2351_v43, %v2349_v8  ;;  %v2353_v14 = vpop.eup %2352 }
 0x219   : > { %1687 = vmatprep.mubr.bf16.mxu1 %v1550_v16 }
 0x220   : > { %1688 = vmatmul.mubr.bf16.gmra.mrb[28].mxu1 %v1549_v13 }
 0x24c   : > { %v718_v58 = vpop.xlane.xlu0 %717 }
 0x24d   : > { %v764_v0 = vsub.f32 %v3319_v4, %v718_v58  ;;  %v765_v5 = vsub.f32 %v3327_v20, %v718_v58 }
 0x24f   : > { %v796_v50 = vmul.f32 1.442695, %v764_v0  ;;  %v798_v38 = vmul.f32 1.442695, %v765_v5 }
 0x250   : > { %v724_v56 = vpop.xlane.xlu0 %723 }
 0x251   : > { %2354 = vpow2.f32 %v796_v50  ;;  %v768_v10 = vsub.f32 %v3309_v47, %v724_v56  ;;  %v769_v57 = vsub.f32 %v4033_v17, %v724_v56 }
 0x252   : > { %v727_v28 = vpop.xlane.xlu1 %726  ;;  %2356 = vpow2.f32 %v798_v38 }
 0x253   : > { %v770_v6 = vsub.f32 %v4034_v2, %v727_v28  ;;  %v771_v29 = vsub.f32 %v4035_v36, %v727_v28  ;;  %2358 = vpow2.f32 %v802_v18  ;;  %v806_v22 = vmul.f32 1.442695, %v769_v57  ;;  %v4039_v18 = vld [vmem:[#allocation9_spill] sm:$0xff]  ;;  %v4040_v28 = vld [vmem:[#allocation11_spill] sm:$0xff] }
 0x254   : > { %v730_v20 = vpop.xlane.xlu0 %729  ;;  %v804_v37 = vmul.f32 1.442695, %v768_v10 }
 0x255   : > { %v810_v4 = vmul.f32 1.442695, %v771_v29  ;;  %v773_v23 = vsub.f32 %v4036_v31, %v730_v20  ;;  %v808_v15 = vmul.f32 1.442695, %v770_v6  ;;  %v772_v61 = vsub.f32 %v4037_v27, %v730_v20 }
 0x257   : > { %v733_v39 = vpop.xlane.xlu1 %732  ;;  %2360 = vpow2.f32 %v810_v4  ;;  %v814_v30 = vmul.f32 1.442695, %v773_v23  ;;  %v812_v43 = vmul.f32 1.442695, %v772_v61 }
 0x258   : > { %v775_v40 = vsub.f32 %v3409_v34, %v733_v39  ;;  %2362 = vpow2.f32 %v806_v22  ;;  %v774_v42 = vsub.f32 %v3397_v52, %v733_v39  ;;  %v4038_v34 = vld [vmem:[#allocation10_spill] sm:$0xff] }
 0x259   : > { %2364 = vpow2.f32 %v804_v37 }
 0x25a   : > { %v818_v47 = vmul.f32 1.442695, %v775_v40  ;;  %v736_v19 = vpop.xlane.xlu0 %735  ;;  %v2205_v48 = vpop.f32.mrb[0].mxu1  ;;  %2366 = vpow2.f32 %v808_v15  ;;  %v816_v52 = vmul.f32 1.442695, %v774_v42 }
 0x25b   : > { %v777_v59 = vsub.f32 %v3422_v44, %v736_v19  ;;  %v2206_v9 = vpop.f32.mrb[1].mxu1  ;;  %v2355_v45 = vpop.eup %2354  ;;  %v776_v50 = vsub.f32 %v4039_v18, %v736_v19 }
 0x25c   : > { %2368 = vpow2.f32 %v818_v47  ;;  %v2208_v16 = vpop.f32.mrb[2].mxu1  ;;  %v2357_v8 = vpop.eup %2356  ;;  %v3561_v13 = vadd.f32 %v2206_v9, %v2205_v48  ;;  %v860_v63 = vpack.c.bf16 %v2353_v14, %v2355_v45 }
 0x25d   : > { %v739_v53 = vpop.xlane.xlu1 %738  ;;  %2370 = vpow2.f32 %v814_v30  ;;  %v2209_v55 = vpop.f32.mrb[3].mxu1  ;;  %v822_v12 = vmul.f32 1.442695, %v777_v59  ;;  %v820_v20 = vmul.f32 1.442695, %v776_v50 }
 0x25e   : > { %v779_v32 = vsub.f32 %v4038_v34, %v739_v53  ;;  %v2359_v33 = vpop.eup %2358  ;;  %v3563_v0 = vadd.f32 %v2209_v55, %v2208_v16  ;;  %1698 = vperm.xlu0 %2270, %v3561_v13   ;;  %2372 = vpow2.f32 %v812_v43  ;;  %v778_v10 = vsub.f32 %v4040_v28, %v739_v53 }
 0x25f   : > { %v861_v58 = vpack.c.bf16 %v2359_v33, %v2357_v8  ;;  %v742_v5 = vpop.xlane.xlu0 %741  ;;  %2374 = vpow2.f32 %v816_v52 }
 0x260   : > { %v826_v44 = vmul.f32 1.442695, %v779_v32  ;;  %1703 = vperm.xlu1 %2271, %v3563_v0   ;;  %2376 = vpow2.f32 %v822_v12  ;;  %v781_v2 = vsub.f32 %v3456_v46, %v742_v5  ;;  %v824_v15 = vmul.f32 1.442695, %v778_v10 }
 0x261   : > { %1004 = vmatprep.mubr.bf16.mxu0 %v861_v58  ;;  %v2361_v56 = vpop.eup %2360 }
 0x262   : > { %v745_v38 = vpop.xlane.xlu1 %744  ;;  %1005 = vmatmul.mubr.bf16.vlgmr.msra.gmra.mrb[0].mxu0 %v860_v63  ;;  %v2211_v17 = vpop.f32.mrb[4].mxu1  ;;  %2378 = vpow2.f32 %v826_v44  ;;  %v830_v47 = vmul.f32 1.442695, %v781_v2 }
 0x263   : > { %v2363_v57 = vpop.eup %2362  ;;  %v2212_v6 = vpop.f32.mrb[5].mxu1  ;;  %v783_v29 = vsub.f32 %v3467_v1, %v745_v38  ;;  %2380 = vpow2.f32 %v820_v20  ;;  %v780_v1 = vsub.f32 %v3446_v25, %v742_v5  ;;  %v782_v48 = vsub.f32 %v3462_v3, %v745_v38 }
 0x264   : > { %v2365_v36 = vpop.eup %2364  ;;  %v2214_v4 = vpop.f32.mrb[6].mxu1  ;;  %v863_v37 = vpack.c.bf16 %v2361_v56, %v2363_v57  ;;  %v3571_v39 = vadd.f32 %v2212_v6, %v2211_v17  ;;  %2382 = vpow2.f32 %v824_v15 }
 0x265   : > { %v2367_v22 = vpop.eup %2366  ;;  %v2215_v31 = vpop.f32.mrb[7].mxu1  ;;  %v834_v46 = vmul.f32 1.442695, %v783_v29  ;;  %2384 = vpow2.f32 %v830_v47  ;;  %v828_v16 = vmul.f32 1.442695, %v780_v1 }
 0x266   : > { %v2369_v23 = vpop.eup %2368  ;;  %1012 = vmatprep.mubr.bf16.mxu0 %v863_v37  ;;  %v3573_v27 = vadd.f32 %v2215_v31, %v2214_v4  ;;  %1708 = vperm.xlu1 %2271, %v3571_v39   ;;  %v748_v61 = vpop.xlane.xlu0 %747  ;;  %v862_v30 = vpack.c.bf16 %v2367_v22, %v2365_v36  ;;  %v832_v55 = vmul.f32 1.442695, %v782_v48 }
 0x267   : > { %v2371_v40 = vpop.eup %2370  ;;  %v751_v19 = vpop.xlane.xlu1 %750  ;;  %v785_v59 = vsub.f32 %v3479_v24, %v748_v61  ;;  %2386 = vpow2.f32 %v834_v46  ;;  %v784_v58 = vsub.f32 %v3475_v60, %v748_v61 }
 0x268   : > { %v865_v42 = vpack.c.bf16 %v2369_v23, %v2371_v40  ;;  %v2373_v53 = vpop.eup %2372  ;;  %v787_v34 = vsub.f32 %v3489_v41, %v751_v19  ;;  %2388 = vpow2.f32 %v828_v16  ;;  %v786_v5 = vsub.f32 %v3483_v49, %v751_v19 }
 0x269   : > { %v2375_v45 = vpop.eup %2374  ;;  %v838_v52 = vmul.f32 1.442695, %v785_v59  ;;  %2390 = vpow2.f32 %v832_v55  ;;  %v836_v2 = vmul.f32 1.442695, %v784_v58 }
 0x26a   : > { %1013 = vmatmul.mubr.bf16.gmra.mrb[4].mxu0 %v862_v30  ;;  %v2217_v14 = vpop.f32.mrb[8].mxu1  ;;  %1713 = vperm.xlu1 %2271, %v3573_v27   ;;  %v2377_v32 = vpop.eup %2376  ;;  %v842_v24 = vmul.f32 1.442695, %v787_v34  ;;  %v864_v12 = vpack.c.bf16 %v2375_v45, %v2373_v53  ;;  %v840_v36 = vmul.f32 1.442695, %v786_v5 }
 0x26b   : > { %1020 = vmatprep.mubr.bf16.mxu0 %v865_v42  ;;  %v2218_v9 = vpop.f32.mrb[9].mxu1  ;;  %v754_v63 = vpop.xlane.xlu0 %753  ;;  %2392 = vpow2.f32 %v838_v52 }
 0x26c   : > { %v2220_v25 = vpop.f32.mrb[10].mxu1  ;;  %v3581_v8 = vadd.f32 %v2218_v9, %v2217_v14  ;;  %v2379_v43 = vpop.eup %2378  ;;  %v789_v38 = vsub.f32 %v3499_v11, %v754_v63  ;;  %2394 = vpow2.f32 %v842_v24  ;;  %v788_v37 = vsub.f32 %v3495_v21, %v754_v63 }
 0x26d   : > { %v2221_v3 = vpop.f32.mrb[11].mxu1  ;;  %v757_v41 = vpop.xlane.xlu1 %756  ;;  %v867_v44 = vpack.c.bf16 %v2379_v43, %v2377_v32  ;;  %2396 = vpow2.f32 %v836_v2 }
 0x26e   : > { %v3583_v33 = vadd.f32 %v2221_v3, %v2220_v25  ;;  %1718 = vperm.xlu1 %2271, %v3581_v8   ;;  %v2381_v50 = vpop.eup %2380  ;;  %v791_v10 = vsub.f32 %v3507_v54, %v757_v41  ;;  %v846_v4 = vmul.f32 1.442695, %v789_v38  ;;  %2398 = vpow2.f32 %v840_v36 }
 0x26f   : > { %v2383_v28 = vpop.eup %2382  ;;  %v760_v22 = vpop.xlane.xlu0 %759  ;;  %v790_v23 = vsub.f32 %v3503_v26, %v757_v41  ;;  %v844_v30 = vmul.f32 1.442695, %v788_v37 }
 0x270   : > { %v2385_v57 = vpop.eup %2384  ;;  %v850_v11 = vmul.f32 1.442695, %v791_v10  ;;  %v866_v20 = vpack.c.bf16 %v2383_v28, %v2381_v50  ;;  %2400 = vpow2.f32 %v846_v4  ;;  %v793_v40 = vsub.f32 %v3521_v7, %v760_v22 }
 0x271   : > { %v2387_v6 = vpop.eup %2386  ;;  %v763_v54 = vpop.xlane.xlu1 %762  ;;  %v848_v1 = vmul.f32 1.442695, %v790_v23  ;;  %v792_v14 = vsub.f32 %v3517_v51, %v760_v22 }
 0x272   : > { %1021 = vmatmul.mubr.bf16.gmra.mrb[8].mxu0 %v864_v12  ;;  %v2223_v18 = vpop.f32.mrb[12].mxu1  ;;  %1723 = vperm.xlu1 %2271, %v3583_v33   ;;  %v869_v31 = vpack.c.bf16 %v2387_v6, %v2385_v57  ;;  %v2389_v15 = vpop.eup %2388  ;;  %2402 = vpow2.f32 %v850_v11  ;;  %v795_v46 = vsub.f32 %v3531_v62, %v763_v54  ;;  %v854_v19 = vmul.f32 1.442695, %v793_v40 }
 0x273   : > { %1028 = vmatprep.mubr.bf16.mxu0 %v867_v44  ;;  %v2224_v56 = vpop.f32.mrb[13].mxu1  ;;  %v2391_v47 = vpop.eup %2390  ;;  %2404 = vpow2.f32 %v844_v30  ;;  %v794_v53 = vsub.f32 %v3527_v35, %v763_v54  ;;  %v852_v45 = vmul.f32 1.442695, %v792_v14 }
 0x274   : > { %v3591_v60 = vadd.f32 %v2224_v56, %v2223_v18  ;;  %v2226_v17 = vpop.f32.mrb[14].mxu1  ;;  %v858_v42 = vmul.f32 1.442695, %v795_v46  ;;  %v868_v48 = vpack.c.bf16 %v2391_v47, %v2389_v15  ;;  %2406 = vpow2.f32 %v848_v1 }
 0x275   : > { %v2227_v49 = vpop.f32.mrb[15].mxu1  ;;  %v2393_v61 = vpop.eup %2392  ;;  %2408 = vpow2.f32 %v854_v19  ;;  %v856_v34 = vmul.f32 1.442695, %v794_v53 }
 0x276   : > { %v3593_v29 = vadd.f32 %v2227_v49, %v2226_v17  ;;  %1728 = vperm.xlu1 %2271, %v3591_v60   ;;  %v2395_v21 = vpop.eup %2394  ;;  %2410 = vpow2.f32 %v858_v42 }
 0x277   : > { %v871_v26 = vpack.c.bf16 %v2395_v21, %v2393_v61  ;;  %v2397_v7 = vpop.eup %2396  ;;  %2412 = vpow2.f32 %v852_v45 }
 0x278   : > { %v2399_v59 = vpop.eup %2398  ;;  %2414 = vpow2.f32 %v856_v34 }
 0x279   : > { %v870_v25 = vpack.c.bf16 %v2399_v59, %v2397_v7 }
 0x27a   : > { %1029 = vmatmul.mubr.bf16.gmra.mrb[12].mxu0 %v866_v20  ;;  %1733 = vperm.xlu1 %2271, %v3593_v29   ;;  %v2401_v62 = vpop.eup %2400 }
 0x27b   : > { %1036 = vmatprep.mubr.bf16.mxu0 %v869_v31 }
 0x27c   : > { %v2403_v9 = vpop.eup %2402 }
 0x27d   : > { %v873_v32 = vpack.c.bf16 %v2403_v9, %v2401_v62  ;;  %v2405_v16 = vpop.eup %2404 }
 0x27e   : > { %v2407_v51 = vpop.eup %2406 }
 0x27f   : > { %v2409_v3 = vpop.eup %2408  ;;  %v872_v55 = vpack.c.bf16 %v2407_v51, %v2405_v16 }
 0x280   : > { %v2411_v43 = vpop.eup %2410 }
 0x281   : > { %v875_v35 = vpack.c.bf16 %v2411_v43, %v2409_v3  ;;  %v2413_v52 = vpop.eup %2412 }
 0x282   : > { %1037 = vmatmul.mubr.bf16.gmra.mrb[16].mxu0 %v868_v48  ;;  %v2415_v24 = vpop.eup %2414 }
 0x283   : > { %1044 = vmatprep.mubr.bf16.mxu0 %v871_v26  ;;  %v874_v63 = vpack.c.bf16 %v2415_v24, %v2413_v52 }
 0x28a   : > { %1045 = vmatmul.mubr.bf16.gmra.mrb[20].mxu0 %v870_v25 }
 0x28b   : > { %1052 = vmatprep.mubr.bf16.mxu0 %v873_v32 }
 0x292   : > { %1053 = vmatmul.mubr.bf16.gmra.mrb[24].mxu0 %v872_v55 }
 0x293   : > { %1060 = vmatprep.mubr.bf16.mxu0 %v875_v35 }
 0x29a   : > { %1061 = vmatmul.mubr.bf16.gmra.mrb[28].mxu0 %v874_v63 }
 0x29c   : > { %v2229_v12 = vpop.f32.mrb[16].mxu1 }
 0x29d   : > { %v2230_v58 = vpop.f32.mrb[17].mxu1 }
 0x29e   : > { %v3603_v41 = vadd.f32 %v2230_v58, %v2229_v12  ;;  %v2232_v44 = vpop.f32.mrb[18].mxu1 }
 0x29f   : > { %v2233_v5 = vpop.f32.mrb[19].mxu1 }
 0x2a0   : > { %v3605_v18 = vadd.f32 %v2233_v5, %v2232_v44  ;;  %1738 = vperm.xlu1 %2271, %v3603_v41  }
 0x2a2   : > { %1743 = vperm.xlu0 %2270, %v3605_v18  }
 0x2df   : > { %v1704_v9 = vpop.permute.xlu1 %1703 }
 0x2e3   : > { %v2235_v50 = vpop.f32.mrb[20].mxu1 }
 0x2e4   : > { %v2236_v38 = vpop.f32.mrb[21].mxu1 }
 0x2e5   : > { %v3609_v56 = vadd.f32 %v2236_v38, %v2235_v50  ;;  %v2238_v28 = vpop.f32.mrb[22].mxu1  ;;  %v1709_v51 = vpop.permute.xlu1 %1708 }
 0x2e6   : > { %v2239_v10 = vpop.f32.mrb[23].mxu1 }
 0x2e7   : > { %v3611_v17 = vadd.f32 %v2239_v10, %v2238_v28  ;;  %1748 = vperm.xlu1 %2271, %v3609_v56  }
 0x2e9   : > { %1753 = vperm.xlu0 %2270, %v3611_v17   ;;  %v1714_v35 = vpop.permute.xlu1 %1713 }
 0x2eb   : > { %v2241_v57 = vpop.f32.mrb[24].mxu1 }
 0x2ec   : > { %v2242_v2 = vpop.f32.mrb[25].mxu1 }
 0x2ed   : > { %v3615_v49 = vadd.f32 %v2242_v2, %v2241_v57  ;;  %v2244_v6 = vpop.f32.mrb[26].mxu1  ;;  %v1719_v58 = vpop.permute.xlu1 %1718 }
 0x2ee   : > { %v2245_v36 = vpop.f32.mrb[27].mxu1  ;;  %v1699_v57 = vpop.permute.xlu0 %1698 }
 0x2ef   : > { %v3617_v4 = vadd.f32 %v2245_v36, %v2244_v6  ;;  %1758 = vperm.xlu1 %2271, %v3615_v49   ;;  %2416 = vrcp.f32 %v1699_v57 }
 0x2f0   : > { %2418 = vrcp.f32 %v1704_v9 }
 0x2f1   : > { %1763 = vperm.xlu0 %2270, %v3617_v4   ;;  %v1724_v2 = vpop.permute.xlu1 %1723  ;;  %2420 = vrcp.f32 %v1709_v51 }
 0x2f2   : > { %2422 = vrcp.f32 %v1714_v35 }
 0x2f3   : > { %v2247_v11 = vpop.f32.mrb[28].mxu1  ;;  %2424 = vrcp.f32 %v1719_v58 }
 0x2f4   : > { %v2248_v22 = vpop.f32.mrb[29].mxu1  ;;  %2426 = vrcp.f32 %v1724_v2 }
 0x2f5   : > { %v3621_v20 = vadd.f32 %v2248_v22, %v2247_v11  ;;  %v2250_v37 = vpop.f32.mrb[30].mxu1 }
 0x2f6   : > { %v2251_v54 = vpop.f32.mrb[31].mxu1 }
 0x2f7   : > { %v3623_v31 = vadd.f32 %v2251_v54, %v2250_v37  ;;  %1768 = vperm.xlu1 %2271, %v3621_v20   ;;  %v1729_v54 = vpop.permute.xlu1 %1728 }
 0x2f8   : > { %2428 = vrcp.f32 %v1729_v54 }
 0x2f9   : > { %1773 = vperm.xlu0 %2270, %v3623_v31  }
 0x335   : > { %v2141_v23 = vpop.f32.mrb[0].mxu0 }
 0x336   : > { %v2142_v15 = vpop.f32.mrb[1].mxu0 }
 0x337   : > { %v3627_v40 = vadd.f32 %v2142_v15, %v2141_v23  ;;  %v2144_v47 = vpop.f32.mrb[2].mxu0 }
 0x338   : > { %v2145_v46 = vpop.f32.mrb[3].mxu0 }
 0x339   : > { %v3629_v61 = vadd.f32 %v2145_v46, %v2144_v47  ;;  %1071 = vperm.xlu1 %2271, %v3627_v40   ;;  %v1734_v46 = vpop.permute.xlu1 %1733 }
 0x33a   : > { %2430 = vrcp.f32 %v1734_v46 }
 0x33b   : > { %1076 = vperm.xlu0 %2270, %v3629_v61  }
 0x33d   : > { %v2147_v30 = vpop.f32.mrb[4].mxu0 }
 0x33e   : > { %v2148_v21 = vpop.f32.mrb[5].mxu0 }
 0x33f   : > { %v3633_v1 = vadd.f32 %v2148_v21, %v2147_v30  ;;  %v2150_v19 = vpop.f32.mrb[6].mxu0 }
 0x340   : > { %v2151_v42 = vpop.f32.mrb[7].mxu0 }
 0x341   : > { %v3635_v48 = vadd.f32 %v2151_v42, %v2150_v19  ;;  %1081 = vperm.xlu1 %2271, %v3633_v1   ;;  %v2417_v19 = vpop.eup %2416 }
 0x343   : > { %1086 = vperm.xlu0 %2270, %v3635_v48  }
 0x345   : > { %v2153_v26 = vpop.f32.mrb[8].mxu0 }
 0x346   : > { %v2154_v14 = vpop.f32.mrb[9].mxu0 }
 0x347   : > { %v3639_v7 = vadd.f32 %v2154_v14, %v2153_v26  ;;  %v2156_v53 = vpop.f32.mrb[10].mxu0  ;;  %v2419_v14 = vpop.eup %2418 }
 0x348   : > { %v2157_v59 = vpop.f32.mrb[11].mxu0  ;;  %v2421_v9 = vpop.eup %2420 }
 0x349   : > { %v3641_v62 = vadd.f32 %v2157_v59, %v2156_v53  ;;  %1091 = vperm.xlu1 %2271, %v3639_v7   ;;  %v1739_v53 = vpop.permute.xlu1 %1738  ;;  %v1777_v59 = vmul.f32 %v2417_v19, %v3561_v13  ;;  %v1781_v51 = vmul.f32 %v2421_v9, %v3571_v39 }
 0x34a   : > { %2432 = vrcp.f32 %v1739_v53 }
 0x34b   : > { %1096 = vperm.xlu0 %2270, %v3641_v62  }
 0x34d   : > { %v2159_v45 = vpop.f32.mrb[12].mxu0 }
 0x34e   : > { %v2160_v34 = vpop.f32.mrb[13].mxu0 }
 0x34f   : > { %v3645_v25 = vadd.f32 %v2160_v34, %v2159_v45  ;;  %v2162_v32 = vpop.f32.mrb[14].mxu0  ;;  %v1744_v45 = vpop.permute.xlu0 %1743  ;;  %v1779_v34 = vmul.f32 %v2419_v14, %v3563_v0 }
 0x350   : > { %v2163_v16 = vpop.f32.mrb[15].mxu0  ;;  %2434 = vrcp.f32 %v1744_v45 }
 0x351   : > { %v3647_v3 = vadd.f32 %v2163_v16, %v2162_v32  ;;  %1101 = vperm.xlu1 %2271, %v3645_v25   ;;  %v2423_v32 = vpop.eup %2422 }
 0x352   : > { %v1783_v13 = vmul.f32 %v2423_v32, %v3573_v27 }
 0x353   : > { %1106 = vperm.xlu0 %2270, %v3647_v3  }
 0x355   : > { %v2165_v43 = vpop.f32.mrb[16].mxu0 }
 0x356   : > { %v2166_v55 = vpop.f32.mrb[17].mxu0 }
 0x357   : > { %v3651_v52 = vadd.f32 %v2166_v55, %v2165_v43  ;;  %v2168_v24 = vpop.f32.mrb[18].mxu0  ;;  %v2425_v43 = vpop.eup %2424 }
 0x358   : > { %v2169_v63 = vpop.f32.mrb[19].mxu0  ;;  %v2427_v35 = vpop.eup %2426  ;;  %v1785_v0 = vmul.f32 %v2425_v43, %v3581_v8 }
 0x359   : > { %v3653_v12 = vadd.f32 %v2169_v63, %v2168_v24  ;;  %1111 = vperm.xlu1 %2271, %v3651_v52   ;;  %v2429_v63 = vpop.eup %2428  ;;  %v1787_v39 = vmul.f32 %v2427_v35, %v3583_v33 }
 0x35a   : > { %v1789_v27 = vmul.f32 %v2429_v63, %v3591_v60 }
 0x35b   : > { %1116 = vperm.xlu0 %2270, %v3653_v12  }
 0x35d   : > { %v2171_v44 = vpop.f32.mrb[20].mxu0 }
 0x35e   : > { %v2172_v5 = vpop.f32.mrb[21].mxu0 }
 0x35f   : > { %v3657_v50 = vadd.f32 %v2172_v5, %v2171_v44  ;;  %v2174_v38 = vpop.f32.mrb[22].mxu0  ;;  %v2431_v44 = vpop.eup %2430 }
 0x360   : > { %v2175_v28 = vpop.f32.mrb[23].mxu0  ;;  %v1791_v8 = vmul.f32 %v2431_v44, %v3593_v29 }
 0x361   : > { %v3659_v10 = vadd.f32 %v2175_v28, %v2174_v38  ;;  %1121 = vperm.xlu1 %2271, %v3657_v50   ;;  %v2433_v38 = vpop.eup %2432 }
 0x362   : > { %v2435_v57 = vpop.eup %2434  ;;  %v1793_v33 = vmul.f32 %v2433_v38, %v3603_v41 }
 0x363   : > { %1126 = vperm.xlu0 %2270, %v3659_v10  }
 0x365   : > { %v2177_v6 = vpop.f32.mrb[24].mxu0 }
 0x366   : > { %v2178_v36 = vpop.f32.mrb[25].mxu0  ;;  %v1749_v16 = vpop.permute.xlu1 %1748 }
 0x367   : > { %v3663_v11 = vadd.f32 %v2178_v36, %v2177_v6  ;;  %v2180_v22 = vpop.f32.mrb[26].mxu0  ;;  %2436 = vrcp.f32 %v1749_v16  ;;  %v1795_v6 = vmul.f32 %v2435_v57, %v3605_v18 }
 0x368   : > { %v2181_v37 = vpop.f32.mrb[27].mxu0  ;;  %v1754_v55 = vpop.permute.xlu0 %1753 }
 0x369   : > { %v3665_v23 = vadd.f32 %v2181_v37, %v2180_v22  ;;  %1131 = vperm.xlu1 %2271, %v3663_v11   ;;  %2438 = vrcp.f32 %v1754_v55  ;;  %v3713_v55 = vld [vmem:[%s3808_s4] ss:$0 sm:$0xff] }
 0x36b   : > { %1136 = vperm.xlu0 %2270, %v3665_v23  }
 0x36d   : > { %v2183_v15 = vpop.f32.mrb[28].mxu0 }
 0x36e   : > { %v2184_v47 = vpop.f32.mrb[29].mxu0  ;;  %v1759_v24 = vpop.permute.xlu1 %1758 }
 0x36f   : > { %v3669_v30 = vadd.f32 %v2184_v47, %v2183_v15  ;;  %v2186_v21 = vpop.f32.mrb[30].mxu0  ;;  %2440 = vrcp.f32 %v1759_v24 }
 0x370   : > { %v2187_v42 = vpop.f32.mrb[31].mxu0  ;;  %v1764_v58 = vpop.permute.xlu0 %1763 }
 0x371   : > { %v3671_v26 = vadd.f32 %v2187_v42, %v2186_v21  ;;  %1141 = vperm.xlu1 %2271, %v3669_v30   ;;  %2442 = vrcp.f32 %v1764_v58  ;;  %v2437_v2 = vpop.eup %2436 }
 0x372   : > { %v1797_v36 = vmul.f32 %v2437_v2, %v3609_v56 }
 0x373   : > { %1146 = vperm.xlu0 %2270, %v3671_v26   ;;  %v2439_v60 = vpop.eup %2438 }
 0x374   : > { %v1799_v29 = vmul.f32 %v2439_v60, %v3611_v17 }
 0x375   : > { %1824 = vrot.lane.b32.xlu1 %v1777_v59, %s2492_s17 }
 0x376   : > { %v1769_v5 = vpop.permute.xlu1 %1768 }
 0x377   : > { %1826 = vrot.lane.b32.xlu0 %v1779_v34, %s2492_s17  ;;  %2444 = vrcp.f32 %v1769_v5 }
 0x378   : > { %v1774_v28 = vpop.permute.xlu0 %1773 }
 0x379   : > { %1828 = vrot.lane.b32.xlu1 %v1781_v51, %s2492_s17  ;;  %2446 = vrcp.f32 %v1774_v28  ;;  %v2441_v22 = vpop.eup %2440 }
 0x37a   : > { %v1801_v41 = vmul.f32 %v2441_v22, %v3615_v49 }
 0x37b   : > { %1830 = vrot.lane.b32.xlu0 %v1783_v13, %s2492_s17  ;;  %v2443_v37 = vpop.eup %2442 }
 0x37c   : > { %v1803_v18 = vmul.f32 %v2443_v37, %v3617_v4 }
 0x37d   : > { %1832 = vrot.lane.b32.xlu1 %v1785_v0, %s2492_s17 }
 0x37f   : > { %1834 = vrot.lane.b32.xlu0 %v1787_v39, %s2492_s17 }
 0x381   : > { %1836 = vrot.lane.b32.xlu1 %v1789_v27, %s2492_s17  ;;  %v2445_v54 = vpop.eup %2444 }
 0x382   : > { %v1805_v56 = vmul.f32 %v2445_v54, %v3621_v20 }
 0x383   : > { %1838 = vrot.lane.b32.xlu0 %v1791_v8, %s2492_s17  ;;  %v2447_v15 = vpop.eup %2446 }
 0x384   : > { %v1807_v47 = vmul.f32 %v2447_v15, %v3623_v31 }
 0x385   : > { %1840 = vrot.lane.b32.xlu1 %v1793_v33, %s2492_s17 }
 0x387   : > { %1842 = vrot.lane.b32.xlu0 %v1795_v6, %s2492_s17 }
 0x389   : > { %1844 = vrot.lane.b32.xlu1 %v1797_v36, %s2492_s17 }
 0x38b   : > { %1846 = vrot.lane.b32.xlu0 %v1799_v29, %s2492_s17 }
 0x38d   : > { %1848 = vrot.lane.b32.xlu1 %v1801_v41, %s2492_s17 }
 0x38f   : > { %1850 = vrot.lane.b32.xlu0 %v1803_v18, %s2492_s17 }
 0x391   : > { %1852 = vrot.lane.b32.xlu1 %v1805_v56, %s2492_s17 }
 0x393   : > { %1854 = vrot.lane.b32.xlu0 %v1807_v47, %s2492_s17 }
 0x3b8   : > { %v1072_v17 = vpop.permute.xlu1 %1071 }
 0x3b9   : > { %2448 = vrcp.f32 %v1072_v17 }
 0x3ba   : > { %v1077_v46 = vpop.permute.xlu0 %1076 }
 0x3bb   : > { %2450 = vrcp.f32 %v1077_v46 }
 0x3c0   : > { %v1082_v21 = vpop.permute.xlu1 %1081 }
 0x3c1   : > { %2452 = vrcp.f32 %v1082_v21 }
 0x3c2   : > { %v1087_v49 = vpop.permute.xlu0 %1086 }
 0x3c3   : > { %2454 = vrcp.f32 %v1087_v49  ;;  %v2449_v34 = vpop.eup %2448 }
 0x3c4   : > { %v1150_v43 = vmul.f32 %v2449_v34, %v3627_v40 }
 0x3c5   : > { %v2451_v16 = vpop.eup %2450 }
 0x3c6   : > { %v1152_v0 = vmul.f32 %v2451_v16, %v3629_v61 }
 0x3c8   : > { %v1092_v19 = vpop.permute.xlu1 %1091 }
 0x3c9   : > { %2456 = vrcp.f32 %v1092_v19 }
 0x3ca   : > { %v1097_v42 = vpop.permute.xlu0 %1096 }
 0x3cb   : > { %2458 = vrcp.f32 %v1097_v42  ;;  %v2453_v13 = vpop.eup %2452 }
 0x3cc   : > { %v1154_v44 = vmul.f32 %v2453_v13, %v3633_v1 }
 0x3cd   : > { %v2455_v63 = vpop.eup %2454 }
 0x3ce   : > { %v1156_v8 = vmul.f32 %v2455_v63, %v3635_v48 }
 0x3d0   : > { %v1102_v14 = vpop.permute.xlu1 %1101 }
 0x3d1   : > { %2460 = vrcp.f32 %v1102_v14 }
 0x3d2   : > { %v1107_v53 = vpop.permute.xlu0 %1106 }
 0x3d3   : > { %2462 = vrcp.f32 %v1107_v53  ;;  %v2457_v5 = vpop.eup %2456 }
 0x3d4   : > { %v1158_v60 = vmul.f32 %v2457_v5, %v3639_v7 }
 0x3d5   : > { %v2459_v57 = vpop.eup %2458 }
 0x3d6   : > { %v1160_v41 = vmul.f32 %v2459_v57, %v3641_v62 }
 0x3d8   : > { %v1112_v4 = vpop.permute.xlu1 %1111 }
 0x3d9   : > { %2464 = vrcp.f32 %v1112_v4 }
 0x3da   : > { %v1117_v59 = vpop.permute.xlu0 %1116 }
 0x3db   : > { %2466 = vrcp.f32 %v1117_v59  ;;  %v2461_v36 = vpop.eup %2460 }
 0x3dc   : > { %v1162_v47 = vmul.f32 %v2461_v36, %v3645_v25 }
 0x3dd   : > { %v2463_v54 = vpop.eup %2462 }
 0x3de   : > { %v1164_v19 = vmul.f32 %v2463_v54, %v3647_v3 }
 0x3e0   : > { %v1122_v9 = vpop.permute.xlu1 %1121 }
 0x3e1   : > { %2468 = vrcp.f32 %v1122_v9 }
 0x3e2   : > { %v1127_v20 = vpop.permute.xlu0 %1126 }
 0x3e3   : > { %2470 = vrcp.f32 %v1127_v20  ;;  %v2465_v17 = vpop.eup %2464 }
 0x3e4   : > { %v1166_v59 = vmul.f32 %v2465_v17, %v3651_v52 }
 0x3e5   : > { %v2467_v42 = vpop.eup %2466 }
 0x3e6   : > { %v1168_v34 = vmul.f32 %v2467_v42, %v3653_v12 }
 0x3e8   : > { %v1132_v31 = vpop.permute.xlu1 %1131 }
 0x3e9   : > { %2472 = vrcp.f32 %v1132_v31 }
 0x3ea   : > { %v1137_v45 = vpop.permute.xlu0 %1136 }
 0x3eb   : > { %2474 = vrcp.f32 %v1137_v45  ;;  %v2469_v9 = vpop.eup %2468 }
 0x3ec   : > { %v1170_v13 = vmul.f32 %v2469_v9, %v3657_v50 }
 0x3f0   : > { %v1142_v32 = vpop.permute.xlu1 %1141 }
 0x3f1   : > { %2476 = vrcp.f32 %v1142_v32  ;;  %v2471_v32 = vpop.eup %2470 }
 0x3f2   : > { %v3707_v51 = vpop.permute.xlu0 %1146 }
 0x3f3   : > { %2478 = vrcp.f32 %v3707_v51 }
 0x3f4   : > { %v1825_v35 = vpop.permute.xlu1 %1824 }
 0x3f5   : > { %v1873_v24 = vsel %vm1872_vm12, %v1150_v43, %v1825_v35  ;;  %v2473_v35 = vpop.eup %2472 }
 0x3f6   : > { %v1896_v58 = vadd.f32 %v3713_v55, %v1873_v24  ;;  %v1827_v39 = vpop.permute.xlu0 %1826 }
 0x3f7   : > { %v1874_v40 = vsel %vm1872_vm12, %v1152_v0, %v1827_v39  ;;  %v2475_v39 = vpop.eup %2474 }
 0x3f8   : > { %v2109_v61 = vpack.c.bf16 %v1896_v58, %v1896_v58  ;;  %v1897_v27 = vadd.f32 %v3713_v55, %v1874_v40  ;;  %v1829_v38 = vpop.permute.xlu1 %1828  ;;  %v1172_v58 = vmul.f32 %v2471_v32, %v3659_v10  ;;  %v1176_v57 = vmul.f32 %v2475_v39, %v3665_v23 }
 0x3f9   : > { %v1875_v28 = vsel %vm1872_vm12, %v1154_v44, %v1829_v38 }
 0x3fa   : > { %1977 = vst.msk [vmem:[%s3722_s25] sm:$0xf] %vm1976_vm13, %v2109_v61  ;;  %v2110_v33 = vpack.c.bf16 %v1897_v27, %v1897_v27  ;;  %v1898_v2 = vadd.f32 %v3713_v55, %v1875_v28  ;;  %v1831_v1 = vpop.permute.xlu0 %1830  ;;  %v1174_v61 = vmul.f32 %v2473_v35, %v3663_v11 }
 0x3fb   : > { %v1876_v6 = vsel %vm1872_vm12, %v1156_v8, %v1831_v1  ;;  %v2477_v27 = vpop.eup %2476 }
 0x3fc   : > { %1978 = vst.msk [vmem:[%s3722_s25 + $0x4] sm:$0xf] %vm1976_vm13, %v2110_v33  ;;  %v2111_v22 = vpack.c.bf16 %v1898_v2, %v1898_v2  ;;  %v1899_v48 = vadd.f32 %v3713_v55, %v1876_v6  ;;  %v1833_v29 = vpop.permute.xlu1 %1832 }
 0x3fd   : > { %v1877_v37 = vsel %vm1872_vm12, %v1158_v60, %v1833_v29  ;;  %v2479_v33 = vpop.eup %2478  ;;  %v1178_v60 = vmul.f32 %v2477_v27, %v3669_v30 }
 0x3fe   : > { %1979 = vst.msk [vmem:[%s3722_s25 + $0x8] sm:$0xf] %vm1976_vm13, %v2111_v22  ;;  %v2112_v18 = vpack.c.bf16 %v1899_v48, %v1899_v48  ;;  %v1900_v7 = vadd.f32 %v3713_v55, %v1877_v37  ;;  %v1835_v15 = vpop.permute.xlu0 %1834  ;;  %v1180_v29 = vmul.f32 %v2479_v33, %v3671_v26 }
 0x3ff   : > { %v1878_v56 = vsel %vm1872_vm12, %v1160_v41, %v1835_v15 }
 0x400   : > { %1980 = vst.msk [vmem:[%s3722_s25 + $0xc] sm:$0xf] %vm1976_vm13, %v2112_v18  ;;  %v2113_v46 = vpack.c.bf16 %v1900_v7, %v1900_v7  ;;  %v1901_v62 = vadd.f32 %v3713_v55, %v1878_v56  ;;  %v1837_v21 = vpop.permute.xlu1 %1836 }
 0x401   : > { %v1879_v49 = vsel %vm1872_vm12, %v1162_v47, %v1837_v21 }
 0x402   : > { %1981 = vst.msk [vmem:[%s3722_s25 + $0x10] sm:$0xf] %vm1976_vm13, %v2113_v46  ;;  %v2114_v14 = vpack.c.bf16 %v1901_v62, %v1901_v62  ;;  %v1902_v25 = vadd.f32 %v3713_v55, %v1879_v49  ;;  %v1839_v53 = vpop.permute.xlu0 %1838 }
 0x403   : > { %v1880_v4 = vsel %vm1872_vm12, %v1164_v19, %v1839_v53 }
 0x404   : > { %1982 = vst.msk [vmem:[%s3722_s25 + $0x14] sm:$0xf] %vm1976_vm13, %v2114_v14  ;;  %v2115_v3 = vpack.c.bf16 %v1902_v25, %v1902_v25  ;;  %v1903_v20 = vadd.f32 %v3713_v55, %v1880_v4  ;;  %v1841_v31 = vpop.permute.xlu1 %1840 }
 0x405   : > { %v1881_v45 = vsel %vm1872_vm12, %v1166_v59, %v1841_v31 }
 0x406   : > { %1983 = vst.msk [vmem:[%s3722_s25 + $0x18] sm:$0xf] %vm1976_vm13, %v2115_v3  ;;  %v2116_v16 = vpack.c.bf16 %v1903_v20, %v1903_v20  ;;  %v1904_v52 = vadd.f32 %v3713_v55, %v1881_v45  ;;  %v1843_v43 = vpop.permute.xlu0 %1842 }
 0x407   : > { %v1882_v51 = vsel %vm1872_vm12, %v1168_v34, %v1843_v43 }
 0x408   : > { %1984 = vst.msk [vmem:[%s3722_s25 + $0x1c] sm:$0xf] %vm1976_vm13, %v2116_v16  ;;  %v2117_v24 = vpack.c.bf16 %v1904_v52, %v1904_v52  ;;  %v1905_v0 = vadd.f32 %v3713_v55, %v1882_v51  ;;  %v1845_v12 = vpop.permute.xlu1 %1844 }
 0x409   : > { %v1883_v63 = vsel %vm1872_vm12, %v1170_v13, %v1845_v12 }
 0x40a   : > { %1985 = vst.msk [vmem:[%s3722_s25 + $0x20] sm:$0xf] %vm1976_vm13, %v2117_v24  ;;  %v2118_v40 = vpack.c.bf16 %v1905_v0, %v1905_v0  ;;  %v1906_v44 = vadd.f32 %v3713_v55, %v1883_v63  ;;  %v1847_v50 = vpop.permute.xlu0 %1846 }
 0x40b   : > { %v1884_v5 = vsel %vm1872_vm12, %v1172_v58, %v1847_v50 }
 0x40c   : > { %1986 = vst.msk [vmem:[%s3722_s25 + $0x24] sm:$0xf] %vm1976_vm13, %v2118_v40  ;;  %v2119_v38 = vpack.c.bf16 %v1906_v44, %v1906_v44  ;;  %v1907_v28 = vadd.f32 %v3713_v55, %v1884_v5  ;;  %v1849_v10 = vpop.permute.xlu1 %1848 }
 0x40d   : > { %v1885_v8 = vsel %vm1872_vm12, %v1174_v61, %v1849_v10 }
 0x40e   : > { %1987 = vst.msk [vmem:[%s3722_s25 + $0x28] sm:$0xf] %vm1976_vm13, %v2119_v38  ;;  %v2120_v2 = vpack.c.bf16 %v1907_v28, %v1907_v28  ;;  %v1908_v1 = vadd.f32 %v3713_v55, %v1885_v8  ;;  %v1851_v11 = vpop.permute.xlu0 %1850 }
 0x40f   : > { %v1886_v6 = vsel %vm1872_vm12, %v1176_v57, %v1851_v11 }
 0x410   : > { %1988 = vst.msk [vmem:[%s3722_s25 + $0x2c] sm:$0xf] %vm1976_vm13, %v2120_v2  ;;  %v2121_v36 = vpack.c.bf16 %v1908_v1, %v1908_v1  ;;  %v1909_v22 = vadd.f32 %v3713_v55, %v1886_v6  ;;  %v1853_v23 = vpop.permute.xlu1 %1852 }
 0x411   : > { %v1887_v48 = vsel %vm1872_vm12, %v1178_v60, %v1853_v23 }
 0x412   : > { %1989 = vst.msk [vmem:[%s3722_s25 + $0x30] sm:$0xf] %vm1976_vm13, %v2121_v36  ;;  %v2122_v37 = vpack.c.bf16 %v1909_v22, %v1909_v22  ;;  %v1910_v41 = vadd.f32 %v3713_v55, %v1887_v48  ;;  %v1855_v54 = vpop.permute.xlu0 %1854 }
 0x413   : > { %v1888_v18 = vsel %vm1872_vm12, %v1180_v29, %v1855_v54 }
 0x414   : > { %1990 = vst.msk [vmem:[%s3722_s25 + $0x34] sm:$0xf] %vm1976_vm13, %v2122_v37  ;;  %v2123_v30 = vpack.c.bf16 %v1910_v41, %v1910_v41  ;;  %v1911_v7 = vadd.f32 %v3713_v55, %v1888_v18 }
 0x416   : > { %1991 = vst.msk [vmem:[%s3722_s25 + $0x38] sm:$0xf] %vm1976_vm13, %v2123_v30  ;;  %v2124_v15 = vpack.c.bf16 %v1911_v7, %v1911_v7 }
 0x418   : > { %1992 = vst.msk [vmem:[%s3722_s25 + $0x3c] sm:$0xf] %vm1976_vm13, %v2124_v15 }
 0x419 PF: > { %s15_s18 = sadd.s32 1, %s2486_s18  }
 0x41a   : > { %p12_p5 = scmp.ge.s32.totalorder %s15_s18, 4  }
 0x41c   :  { %14 = sbr.rel (!%p12_p5) target bundleno = 1 (0x1), region = 73 }

// kernel: skipgat_forward.7
= control target key start
LH: loop header
LB: loop body
LE: loop exit
PB: predicated region body
PF: predicated region fallthrough
CT: control target
= control target key end

     0   :  { %s2527_s21 = smov 0   ;;  %s3833_s0 = inlined_call_operand.vmem [shape: f32[256,2], index: 0, kind: input, shape index: {}]   ;;  %s3834_s1 = inlined_call_operand.vmem [shape: f32[2,256], index: 1, kind: input, shape index: {}]   ;;  %s3835_s2 = inlined_call_operand.vmem [shape: bf16[256,10], index: 2, kind: input, shape index: {}]   ;;  %s3836_s3 = inlined_call_operand.vmem [shape: s8[256,256], index: 3, kind: input, shape index: {}]   ;;  %s3837_s4 = inlined_call_operand.vmem [shape: f32[1,8], index: 4, kind: input, shape index: {}]   ;;  %s3838_s5 = inlined_call_operand.vmem [shape: f32[256,8], index: 5, kind: input, shape index: {}]   ;;  %s3839_s6 = inlined_call_operand.vmem [shape: f32[256,8], index: 6, kind: output, shape index: {}]  }
   0x1 LB: > { %s2090_s22 = sadd.s32 4294967295, %s2485_s21   ;;  %p2094_p0 = scmp.ge.s32.totalorder %s2485_s21, 1  ;;  %s2485_s21 = sphi %s2527_s21, %s16_s21  }
   0x2   : > { %p236_p1 = scmp.lt.s32.totalorder %s2485_s21, 3 }
   0x4   : > { %p237_p2 = pnand %p2094_p0, %p236_p1 }
   0x6   : > { %240 = sbr.rel (%p237_p2) target bundleno = 1049 (0x419), region = 44 }
   0xd   : > { %s2095_s23 = sshll.u32 %s2090_s22, 4  ;;  %v2487_v0 = vmov 1   ;;  %v2540_v1 = vld [vmem:[%s3835_s2 + $0x40] sm:$0xff]   ;;  %v2565_v5 = vld [vmem:[%s3835_s2 + $0x48] sm:$0xff]   ;;  %v2588_v9 = vld [vmem:[%s3835_s2 + $0x10] sm:$0xff]   ;;  %s2097_s16 = sshll.u32 %s2090_s22, 2 }
   0xe   : > { %2266 = vset.pattern.permute.xlu1 %v2487_v0  ;;  %2265 = vset.pattern.permute.xlu0 %v2487_v0  ;;  %p278_p3 = scmp.lt.s32.totalorder %s2095_s23, 31  ;;  %v2547_v2 = vld [vmem:[%s3835_s2] sm:$0xff]   ;;  %v2579_v8 = vld [vmem:[%s3835_s2 + $0x8] sm:$0xff]   ;;  %v2593_v10 = vld [vmem:[%s3835_s2 + $0x50] sm:$0xff]   ;;  %p284_p4 = scmp.lt.s32.totalorder %s2097_s16, 7  ;;  %v3840_v28 = vmov 0  }
   0xf   : > { %2124 = vmatprep.subr.bf16.mxu0 %v2540_v1  ;;  %v2606_v13 = vld [vmem:[%s3835_s2 + $0x58] sm:$0xff]   ;;  %s2489_s27 = smov 123   ;;  %v2701_v57 = vld [vmem:[%s3835_s2 + $0x60] sm:$0xff]  }
  0x10   : > { %s4072_s23 = smov (!%p278_p3, %s2095_s23), 31  ;;  %2125 = vmatpush3.bf16.msra.mxu0 %v2547_v2  ;;  %v2621_v16 = vld [vmem:[%s3835_s2 + $0x18] sm:$0xff]   ;;  %s4074_s16 = smov (!%p284_p4, %s2097_s16), 7  ;;  %v2706_v62 = vld [vmem:[%s3835_s2 + $0x20] sm:$0xff]  }
  0x11   : > { %s2542_s26 = sshll.u32 %s4072_s23, 3  ;;  %2126 = vmatprep.subr.bf16.mxu0 %v2565_v5  ;;  %s2123_s22 = sshll.u32 %s4074_s16, 4 }
  0x12   : > { %s2553_s7 = scalar_lea.vmem %s3833_s0, %s2542_s26  ;;  %s2652_s25 = scalar_lea.vmem %s3836_s3, %s2123_s22 }
  0x13   : > { %v2557_v3 = vld [vmem:[%s2553_s7 + $0x10] sm:$0xff]  ;;  %v2560_v4 = vld [vmem:[%s2553_s7] sm:$0xff]  ;;  %v2571_v6 = vld [vmem:[%s2553_s7 + $0x18] sm:$0xff]  ;;  %s2491_s23 = smov 4   ;;  %s3735_s8 = scalar_lea.vmem %s3839_s6, %s2542_s26 }
  0x14   : > { %1239 = vperm.xlu1 %2266, %v2557_v3   ;;  %1231 = vperm.xlu0 %2265, %v2560_v4   ;;  %v2574_v7 = vld [vmem:[%s2553_s7 + $0x8] sm:$0xff]  ;;  %v2599_v12 = vld [vmem:[%s2553_s7 + $0x20] sm:$0xff]  ;;  %v2610_v14 = vld [vmem:[%s2553_s7 + $0x38] sm:$0xff] }
  0x15   : > { %2127 = vmatpush3.bf16.msra.mxu0 %v2579_v8  ;;  %v2596_v11 = vld [vmem:[%s2553_s7 + $0x28] sm:$0xff]  ;;  %v2616_v15 = vld [vmem:[%s2553_s7 + $0x30] sm:$0xff]  ;;  %v2631_v18 = vld [vmem:[%s2553_s7 + $0x40] sm:$0xff] }
  0x16   : > { %2128 = vmatprep.subr.bf16.mxu0 %v2593_v10  ;;  %v2625_v17 = vld [vmem:[%s2553_s7 + $0x48] sm:$0xff]  ;;  %v2636_v19 = vld [vmem:[%s2553_s7 + $0x58] sm:$0xff]  ;;  %v2639_v20 = vld [vmem:[%s2553_s7 + $0x50] sm:$0xff] }
  0x17   : > { %3902 = vst [vmem:[#allocation2_spill] sm:$0xff] %v2636_v19  ;;  %v2644_v21 = vld [vmem:[%s2553_s7 + $0x68] sm:$0xff]  ;;  %v2647_v22 = vld [vmem:[%s2553_s7 + $0x60] sm:$0xff]  ;;  %v2659_v25 = vld [vmem:[%s2553_s7 + $0x78] sm:$0xff] }
  0x18   : > { %1243 = vperm.xlu1 %2266, %v2571_v6   ;;  %1235 = vperm.xlu0 %2265, %v2574_v7   ;;  %3903 = vst [vmem:[#allocation3_spill] sm:$0xff] %v2644_v21  ;;  %v309_v23 = vld [vmem:[%s2652_s25 + $0x20] sm:$0xff]  ;;  %v310_v24 = vld [vmem:[%s2652_s25 + $0x28] sm:$0xff]  ;;  %v2662_v26 = vld [vmem:[%s2553_s7 + $0x70] sm:$0xff] }
  0x19   : > { %2129 = vmatpush3.bf16.msra.mxu0 %v2588_v9  ;;  %3904 = vst [vmem:[#allocation4_spill] sm:$0xff] %v2662_v26  ;;  %vm317_vm0 = vnez %v309_v23  ;;  %vm318_vm1 = vnez %v310_v24  ;;  %v311_v27 = vld [vmem:[%s2652_s25 + $0x30] sm:$0xff]  ;;  %v312_v36 = vld [vmem:[%s2652_s25 + $0x38] sm:$0xff] }
  0x1a   : > { %2130 = vmatprep.subr.bf16.mxu0 %v2606_v13  ;;  %v569_v29 = vsel %vm317_vm0, 16843009, %v3840_v28  ;;  %v570_v30 = vsel %vm318_vm1, 16843009, %v3840_v28  ;;  %vm319_vm2 = vnez %v311_v27  ;;  %vm320_vm3 = vnez %v312_v36 }
  0x1b   : > { %v591_v31 = vunpack.c.1.s8 %v569_v29  ;;  %v592_v32 = vunpack.c.1.s8 %v570_v30  ;;  %v589_v33 = vunpack.c.0.s8 %v569_v29  ;;  %v590_v34 = vunpack.c.0.s8 %v570_v30 }
  0x1c   : > { %1251 = vperm.xlu1 %2266, %v2596_v11   ;;  %1247 = vperm.xlu0 %2265, %v2599_v12   ;;  %v593_v35 = vunpack.c.2.s8 %v569_v29  ;;  %v594_v38 = vunpack.c.2.s8 %v570_v30  ;;  %v595_v39 = vunpack.c.3.s8 %v569_v29  ;;  %v596_v41 = vunpack.c.3.s8 %v570_v30 }
  0x1d   : > { %2131 = vmatpush3.bf16.msra.mxu0 %v2621_v16  ;;  %v623_v37 = vpack.c.b16 %v592_v32, %v591_v31  ;;  %v621_v40 = vpack.c.b16 %v590_v34, %v589_v33  ;;  %v571_v44 = vsel %vm319_vm2, 16843009, %v3840_v28  ;;  %v572_v48 = vsel %vm320_vm3, 16843009, %v3840_v28  ;;  %v305_v31 = vld [vmem:[%s2652_s25] sm:$0xff]  ;;  %v306_v32 = vld [vmem:[%s2652_s25 + $0x8] sm:$0xff] }
  0x1e   : > { %v625_v43 = vpack.c.b16 %v594_v38, %v593_v35  ;;  %v627_v46 = vpack.c.b16 %v596_v41, %v595_v39  ;;  %v599_v49 = vunpack.c.1.s8 %v571_v44  ;;  %v600_v52 = vunpack.c.1.s8 %v572_v48  ;;  %2132 = vmatprep.subr.bf16.mxu0 %v2701_v57  ;;  %v2743_v33 = vld [vmem:[%s3835_s2 + $0x70] sm:$0xff]   ;;  %v2757_v41 = vld [vmem:[%s3835_s2 + $0x78] sm:$0xff]  }
  0x1f   : > { %v624_v42 = vpack.c.b8 %v623_v37, %v623_v37  ;;  %v622_v45 = vpack.c.b8 %v621_v40, %v621_v40  ;;  %v603_v59 = vunpack.c.3.s8 %v571_v44  ;;  %v604_v60 = vunpack.c.3.s8 %v572_v48  ;;  %v2748_v34 = vld [vmem:[%s3835_s2 + $0x30] sm:$0xff]  }
  0x20   : > { %1259 = vperm.xlu1 %2266, %v2610_v14   ;;  %1255 = vperm.xlu0 %2265, %v2616_v15   ;;  %v626_v47 = vpack.c.b8 %v625_v43, %v625_v43  ;;  %v628_v51 = vpack.c.b8 %v627_v46, %v627_v46  ;;  %v631_v56 = vpack.c.b16 %v600_v52, %v599_v49  ;;  %v597_v61 = vunpack.c.0.s8 %v571_v44  ;;  %v307_v43 = vld [vmem:[%s2652_s25 + $0x10] sm:$0xff] }
  0x21   : > { %vm646_vm4 = vnez %v624_v42  ;;  %vm645_vm5 = vnez %v622_v45  ;;  %v598_v63 = vunpack.c.0.s8 %v572_v48  ;;  %v601_v0 = vunpack.c.2.s8 %v571_v44  ;;  %2133 = vmatpush3.bf16.msra.mxu0 %v2706_v62  ;;  %v308_v44 = vld [vmem:[%s2652_s25 + $0x18] sm:$0xff] }
  0x22   : > { %v2683_v50 = vsel %vm646_vm4, 16843009, %v3840_v28  ;;  %v2686_v53 = vsel %vm645_vm5, 16843009, %v3840_v28  ;;  %vm647_vm6 = vnez %v626_v47  ;;  %vm648_vm7 = vnez %v628_v51  ;;  %v2764_v45 = vld [vmem:[%s3835_s2 + $0x38] sm:$0xff]  }
  0x23   : > { %v2689_v54 = vsel %vm647_vm6, 16843009, %v3840_v28  ;;  %v2696_v55 = vsel %vm648_vm7, 16843009, %v3840_v28  ;;  %v632_v58 = vpack.c.b8 %v631_v56, %v631_v56  ;;  %vm313_vm12 = vnez %v305_v31 }
  0x24   : > { %1267 = vperm.xlu1 %2266, %v2625_v17   ;;  %1263 = vperm.xlu0 %2265, %v2631_v18   ;;  %3905 = vst [vmem:[#allocation5_spill] sm:$0xff] %v2689_v54  ;;  %3906 = vst [vmem:[#allocation6_spill] sm:$0xff] %v2696_v55  ;;  %vm314_vm13 = vnez %v306_v32  ;;  %v565_v35 = vsel %vm313_vm12, 16843009, %v3840_v28  ;;  %v451_v42 = vlaneseq  ;;  %vm315_vm14 = vnez %v307_v43 }
  0x25   : > { %vm650_vm8 = vnez %v632_v58  ;;  %v566_v36 = vsel %vm314_vm13, 16843009, %v3840_v28  ;;  %v573_v37 = vunpack.c.0.s8 %v565_v35  ;;  %v577_v39 = vunpack.c.2.s8 %v565_v35 }
  0x26   : > { %v574_v38 = vunpack.c.0.s8 %v566_v36  ;;  %v578_v40 = vunpack.c.2.s8 %v566_v36  ;;  %v575_v46 = vunpack.c.1.s8 %v565_v35  ;;  %v576_v47 = vunpack.c.1.s8 %v566_v36 }
  0x27   : > { %v580_v49 = vunpack.c.3.s8 %v566_v36  ;;  %vm316_vm15 = vnez %v308_v44  ;;  %v2768_v56 = vshrl.u32 %v451_v42, 7 }
  0x28   : > { %1275 = vperm.xlu1 %2266, %v2636_v19   ;;  %1271 = vperm.xlu0 %2265, %v2639_v20   ;;  %v605_v51 = vpack.c.b16 %v574_v38, %v573_v37  ;;  %v609_v52 = vpack.c.b16 %v578_v40, %v577_v39  ;;  %v607_v58 = vpack.c.b16 %v576_v47, %v575_v46 }
  0x29   : > { %3911 = vst [vmem:[#allocation11_spill] sm:$0xff] %v2768_v56 }
  0x2c   : > { %1283 = vperm.xlu1 %2266, %v2644_v21   ;;  %1279 = vperm.xlu0 %2265, %v2647_v22  }
  0x30   : > { %1291 = vperm.xlu1 %2266, %v2659_v25   ;;  %1287 = vperm.xlu0 %2265, %v2662_v26  }
  0x34   : > { %1600 = vrot.lane.b32.xlu1 %v2547_v2, %s2489_s27  ;;  %1616 = vrot.lane.b32.xlu0 %v2540_v1, %s2489_s27  ;;  %v2716_v1 = vld [vmem:[%s3835_s2 + $0x68] sm:$0xff]   ;;  %v635_v2 = vpack.c.b16 %v604_v60, %v603_v59  ;;  %v2771_v60 = vsel %vm315_vm14, 16843009, %v3840_v28 }
  0x35   : > { %2267 = vset.pattern.permute.xlu1 %v3840_v28  ;;  %2268 = vset.pattern.permute.xlu0 %v3840_v28  ;;  %v583_v31 = vunpack.c.1.s8 %v2771_v60 }
  0x36   : > { %2134 = vmatprep.subr.bf16.mxu0 %v2716_v1 }
  0x38   : > { %1618 = vrot.lane.b32.xlu1 %v2565_v5, %s2489_s27  ;;  %1602 = vrot.lane.b32.xlu0 %v2579_v8, %s2489_s27  ;;  %v602_v5 = vunpack.c.2.s8 %v572_v48  ;;  %v2719_v8 = vsel %vm650_vm8, 16843009, %v3840_v28  ;;  %v579_v48 = vunpack.c.3.s8 %v565_v35 }
  0x39   : > { %3907 = vst [vmem:[#allocation7_spill] sm:$0xff] %v2719_v8 }
  0x3a   : > { %v611_v59 = vpack.c.b16 %v580_v49, %v579_v48 }
  0x3c   : > { %1604 = vrot.lane.b32.xlu1 %v2588_v9, %s2489_s27  ;;  %1620 = vrot.lane.b32.xlu0 %v2593_v10, %s2489_s27  ;;  %v629_v9 = vpack.c.b16 %v598_v63, %v597_v61  ;;  %v636_v10 = vpack.c.b8 %v635_v2, %v635_v2  ;;  %v2774_v61 = vsel %vm316_vm15, 16843009, %v3840_v28  ;;  %v606_v63 = vpack.c.b8 %v605_v51, %v605_v51 }
  0x3d   : > { %v1296_v2 = vsub.s32 1, %v2768_v56  ;;  %v584_v32 = vunpack.c.1.s8 %v2774_v61 }
  0x3e   : > { %v630_v23 = vpack.c.b8 %v629_v9, %v629_v9  ;;  %vm652_vm9 = vnez %v636_v10  ;;  %v2781_v9 = vld [vmem:[%s3834_s1] sm:$0xf]  ;;  %v608_v10 = vpack.c.b8 %v607_v58, %v607_v58  ;;  %vm637_vm0 = vnez %v606_v63 }
  0x3f   : > { %v2729_v27 = vsel %vm652_vm9, 16843009, %v3840_v28  ;;  %3912 = vst [vmem:[#allocation12_spill] sm:$0xff] %v2781_v9  ;;  %v1297_v35 = vrot.slane %v2781_v9, %v1296_v2  ;;  %v653_v38 = vsel %vm637_vm0, 16843009, %v3840_v28  ;;  %v615_v40 = vpack.c.b16 %v584_v32, %v583_v31 }
  0x40   : > { %1622 = vrot.lane.b32.xlu1 %v2606_v13, %s2489_s27  ;;  %1606 = vrot.lane.b32.xlu0 %v2621_v16, %s2489_s27  ;;  %v633_v13 = vpack.c.b16 %v602_v5, %v601_v0  ;;  %v2726_v16 = vld [vmem:[%s3835_s2 + $0x28] sm:$0xff]   ;;  %3908 = vst [vmem:[#allocation8_spill] sm:$0xff] %v2729_v27  ;;  %vm649_vm10 = vnez %v630_v23  ;;  %v610_v0 = vpack.c.b8 %v609_v52, %v609_v52  ;;  %v1300_v5 = vsub.s32 3, %v2768_v56 }
  0x41   : > { %2135 = vmatpush3.bf16.msra.mxu0 %v2726_v16  ;;  %v2733_v29 = vsel %vm649_vm10, 16843009, %v3840_v28  ;;  %v581_v23 = vunpack.c.0.s8 %v2771_v60  ;;  %vm638_vm2 = vnez %v608_v10  ;;  %v2791_v42 = vrot.slane %v1297_v35, %v1296_v2 }
  0x42   : > { %v634_v24 = vpack.c.b8 %v633_v13, %v633_v13  ;;  %3909 = vst [vmem:[#allocation9_spill] sm:$0xff] %v2733_v29  ;;  %2136 = vmatprep.subr.bf16.mxu0 %v2743_v33  ;;  %v612_v13 = vpack.c.b8 %v611_v59, %v611_v59  ;;  %vm639_vm1 = vnez %v610_v0  ;;  %v1301_v36 = vrot.slane %v2781_v9, %v1300_v5 }
  0x43   : > { %v655_v39 = vsel %vm639_vm1, 16843009, %v3840_v28  ;;  %v654_v44 = vsel %vm638_vm2, 16843009, %v3840_v28  ;;  %v669_v47 = vunpack.c.0.s8 %v653_v38  ;;  %v670_v48 = vunpack.c.1.s8 %v653_v38 }
  0x44   : > { %vm651_vm11 = vnez %v634_v24  ;;  %v582_v24 = vunpack.c.0.s8 %v2774_v61  ;;  %vm640_vm3 = vnez %v612_v13  ;;  %v2793_v43 = vrot.slane %v1301_v36, %v1296_v2 }
  0x45   : > { %v2736_v30 = vsel %vm651_vm11, 16843009, %v3840_v28  ;;  %2137 = vmatpush3.bf16.msra.mxu0 %v2748_v34  ;;  %v656_v46 = vsel %vm640_vm3, 16843009, %v3840_v28  ;;  %v673_v49 = vunpack.c.0.s8 %v655_v39  ;;  %v674_v52 = vunpack.c.1.s8 %v655_v39 }
  0x46   : > { %3910 = vst [vmem:[#allocation10_spill] sm:$0xff] %v2736_v30  ;;  %2138 = vmatprep.subr.bf16.mxu0 %v2757_v41  ;;  %v613_v37 = vpack.c.b16 %v582_v24, %v581_v23  ;;  %v616_v58 = vpack.c.b8 %v615_v40, %v615_v40  ;;  %v671_v0 = vunpack.c.0.s8 %v654_v44  ;;  %v672_v5 = vunpack.c.1.s8 %v654_v44 }
  0x47   : > { %v675_v10 = vunpack.c.0.s8 %v656_v46  ;;  %v676_v13 = vunpack.c.1.s8 %v656_v46  ;;  %vm2801_vm4 = vcmp.ne.s32.totalorder %v669_v47, 0  ;;  %v3913_v32 = vmov 0 }
  0x48   : > { %v614_v51 = vpack.c.b8 %v613_v37, %v613_v37  ;;  %v3914_v32 = vsel %vm2801_vm4, 4294967295, %v3913_v32  ;;  %vm2805_vm5 = vcmp.ne.s32.totalorder %v670_v48, 0  ;;  %v3916_v35 = vmov 0 }
  0x49   : > { %2139 = vmatpush3.bf16.msra.mxu0 %v2764_v45  ;;  %3915 = vst [vmem:[#allocation13_spill] sm:$0xff] %v3914_v32  ;;  %v3917_v35 = vsel %vm2805_vm5, 4294967295, %v3916_v35  ;;  %vm2809_vm6 = vcmp.ne.s32.totalorder %v673_v49, 0  ;;  %v3919_v36 = vmov 0  ;;  %vm2817_vm8 = vnez %v616_v58 }
  0x4a   : > { %3918 = vst [vmem:[#allocation14_spill] sm:$0xff] %v3917_v35  ;;  %v3920_v36 = vsel %vm2809_vm6, 4294967295, %v3919_v36  ;;  %vm2813_vm7 = vnez %v614_v51  ;;  %vm2821_vm9 = vcmp.ne.s32.totalorder %v674_v52, 0  ;;  %vm2825_vm10 = vcmp.ne.s32.totalorder %v671_v0, 0 }
  0x4b   : > { %3921 = vst [vmem:[#allocation15_spill] sm:$0xff] %v3920_v36  ;;  %vm2829_vm11 = vcmp.ne.s32.totalorder %v672_v5, 0  ;;  %vm2836_vm12 = vcmp.ne.s32.totalorder %v675_v10, 0  ;;  %v3933_v9 = vmov 0  ;;  %vm2840_vm13 = vcmp.ne.s32.totalorder %v676_v13, 0 }
  0x4c   : > { %v3934_v9 = vsel %vm2836_vm12, 4294967295, %v3933_v9  ;;  %v3936_v52 = vmov 0  ;;  %v3939_v0 = vmov 0   ;;  %v3940_v36 = vmov 0 }
  0x4d   : > { %3935 = vst [vmem:[#allocation17_spill] sm:$0xff] %v3934_v9  ;;  %v3937_v52 = vsel %vm2840_vm13, 4294967295, %v3936_v52  ;;  %v657_v5 = vsel %vm2813_vm7, 16843009, %v3939_v0 }
  0x4e   : > { %3938 = vst [vmem:[#allocation18_spill] sm:$0xff] %v3937_v52 }
  0x93   : > { %v1240_v59 = vpop.permute.xlu1 %1239  ;;  %v1232_v63 = vpop.permute.xlu0 %1231 }
  0x94   : > { %v1316_v23 = vadd.f32 %v2791_v42, %v1240_v59  ;;  %v1317_v2 = vadd.f32 %v2793_v43, %v1240_v59  ;;  %v1312_v24 = vadd.f32 %v2791_v42, %v1232_v63  ;;  %v1313_v31 = vadd.f32 %v2793_v43, %v1232_v63 }
  0x95   : > { %v3926_v59 = vmov 0 }
  0x96   : > { %v1348_v38 = vmul.f32 0.2, %v1316_v23  ;;  %v1349_v39 = vmul.f32 0.2, %v1317_v2  ;;  %v1344_v40 = vmul.f32 0.2, %v1312_v24 }
  0x97   : > { %v1345_v46 = vmul.f32 0.2, %v1313_v31  ;;  %v1244_v47 = vpop.permute.xlu1 %1243  ;;  %v1236_v48 = vpop.permute.xlu0 %1235  ;;  %v3927_v59 = vsel %vm2821_vm9, 4294967295, %v3926_v59 }
  0x98   : > { %3928 = vst [vmem:[#allocation16_spill] sm:$0xff] %v3927_v59  ;;  %v1318_v58 = vadd.f32 %v2791_v42, %v1244_v47  ;;  %v1314_v63 = vadd.f32 %v2791_v42, %v1236_v48  ;;  %v1315_v28 = vadd.f32 %v2793_v43, %v1236_v48  ;;  %v1319_v30 = vadd.f32 %v2793_v43, %v1244_v47 }
  0x99   : > { %v1376_v56 = vmax.f32 %v1312_v24, %v1344_v40  ;;  %v1377_v29 = vmax.f32 %v1313_v31, %v1345_v46  ;;  %v658_v48 = vsel %vm2817_vm8, 16843009, %v3939_v0  ;;  %v1380_v8 = vmax.f32 %v1316_v23, %v1348_v38 }
  0x9a   : > { %v1350_v10 = vmul.f32 0.2, %v1318_v58  ;;  %v1346_v27 = vmul.f32 0.2, %v1314_v63  ;;  %v1381_v55 = vmax.f32 %v1317_v2, %v1349_v39  ;;  %v1347_v13 = vmul.f32 0.2, %v1315_v28 }
  0x9b   : > { %v1252_v54 = vpop.permute.xlu1 %1251  ;;  %v1248_v26 = vpop.permute.xlu0 %1247  ;;  %v2853_v21 = vsel %vm2801_vm4, %v1376_v56, -1e+30  ;;  %v2857_v37 = vsel %vm2805_vm5, %v1377_v29, -1e+30  ;;  %v677_v24 = vunpack.c.0.s8 %v657_v5  ;;  %v1351_v2 = vmul.f32 0.2, %v1319_v30 }
  0x9c   : > { %v1322_v31 = vadd.f32 %v2791_v42, %v1252_v54  ;;  %v1323_v40 = vadd.f32 %v2793_v43, %v1252_v54  ;;  %v1320_v44 = vadd.f32 %v2791_v42, %v1248_v26  ;;  %v1321_v23 = vadd.f32 %v2793_v43, %v1248_v26 }
  0x9d   : > { %v1440_v38 = vmax.f32 %v2853_v21, %v2857_v37  ;;  %v1378_v39 = vmax.f32 %v1314_v63, %v1346_v27  ;;  %v678_v56 = vunpack.c.1.s8 %v657_v5  ;;  %v2867_v29 = vsel %vm2809_vm6, %v1380_v8, -1e+30 }
  0x9e   : > { %v1352_v46 = vmul.f32 0.2, %v1320_v44  ;;  %v2871_v47 = vsel %vm2821_vm9, %v1381_v55, -1e+30  ;;  %v679_v54 = vunpack.c.0.s8 %v658_v48  ;;  %v1353_v35 = vmul.f32 0.2, %v1321_v23 }
  0x9f   : > { %1441 = vmax.xlane.f32.xlu1 %v1440_v38  ;;  %v2873_v32 = vpop.permute.xlu1 %1259  ;;  %v2875_v26 = vpop.permute.xlu0 %1255  ;;  %v1379_v19 = vmax.f32 %v1315_v28, %v1347_v13  ;;  %v2879_v27 = vsel %vm2825_vm10, %v1378_v39, -1e+30  ;;  %v1382_v63 = vmax.f32 %v1318_v58, %v1350_v10  ;;  %v1354_v5 = vmul.f32 0.2, %v1322_v31 }
  0xa0   : > { %v1355_v8 = vmul.f32 0.2, %v1323_v40  ;;  %vm2881_vm14 = vcmp.ne.s32.totalorder %v677_v24, 0  ;;  %v680_v55 = vunpack.c.1.s8 %v658_v48  ;;  %v1446_v38 = vmax.f32 %v2867_v29, %v2871_v47 }
  0xa1   : > { %v3941_v36 = vsel %vm2881_vm14, 4294967295, %v3940_v36  ;;  %v2889_v59 = vsel %vm2829_vm11, %v1379_v19, -1e+30  ;;  %v1383_v28 = vmax.f32 %v1319_v30, %v1351_v2  ;;  %v1384_v13 = vmax.f32 %v1320_v44, %v1352_v46 }
  0xa2   : > { %3942 = vst [vmem:[#allocation19_spill] sm:$0xff] %v3941_v36  ;;  %v1443_v39 = vmax.f32 %v2879_v27, %v2889_v59  ;;  %vm2893_vm15 = vcmp.ne.s32.totalorder %v678_v56, 0  ;;  %v3943_v58 = vmov 0  ;;  %v2903_v24 = vsel %vm2836_vm12, %v1382_v63, -1e+30 }
  0xa3   : > { %v3944_v58 = vsel %vm2893_vm15, 4294967295, %v3943_v58  ;;  %1447 = vmax.xlane.f32.xlu1 %v1446_v38  ;;  %v2897_v10 = vpop.permute.xlu1 %1267  ;;  %v2899_v48 = vpop.permute.xlu0 %1263  ;;  %v2907_v19 = vsel %vm2840_vm13, %v1383_v28, -1e+30  ;;  %v1385_v30 = vmax.f32 %v1321_v23, %v1353_v35  ;;  %v2911_v44 = vsel %vm2881_vm14, %v1384_v13, -1e+30 }
  0xa4   : > { %3945 = vst [vmem:[#allocation20_spill] sm:$0xff] %v3944_v58  ;;  %1444 = vmax.xlane.f32.xlu0 %v1443_v39  ;;  %vm2913_vm0 = vcmp.ne.s32.totalorder %v679_v54, 0  ;;  %v3946_v2 = vmov 0  ;;  %vm2917_vm1 = vcmp.ne.s32.totalorder %v680_v55, 0  ;;  %v3949_v56 = vmov 0 }
  0xa5   : > { %v3947_v2 = vsel %vm2913_vm0, 4294967295, %v3946_v2  ;;  %v3950_v56 = vsel %vm2917_vm1, 4294967295, %v3949_v56  ;;  %v2923_v46 = vsel %vm2893_vm15, %v1385_v30, -1e+30  ;;  %v1386_v63 = vmax.f32 %v1322_v31, %v1354_v5 }
  0xa6   : > { %3948 = vst [vmem:[#allocation21_spill] sm:$0xff] %v3947_v2  ;;  %3951 = vst [vmem:[#allocation22_spill] sm:$0xff] %v3950_v56  ;;  %v1387_v38 = vmax.f32 %v1323_v40, %v1355_v8  ;;  %v1449_v35 = vmax.f32 %v2903_v24, %v2907_v19  ;;  %v1452_v23 = vmax.f32 %v2911_v44, %v2923_v46 }
  0xa7   : > { %v2929_v54 = vpop.permute.xlu1 %1275  ;;  %v2931_v28 = vpop.permute.xlu0 %1271  ;;  %v2935_v55 = vsel %vm2913_vm0, %v1386_v63, -1e+30 }
  0xa8   : > { %v2939_v13 = vsel %vm2917_vm1, %v1387_v38, -1e+30  ;;  %1450 = vmax.xlane.f32.xlu0 %v1449_v35  ;;  %1453 = vmax.xlane.f32.xlu1 %v1452_v23 }
  0xa9   : > { %v1455_v31 = vmax.f32 %v2935_v55, %v2939_v13 }
  0xab   : > { %v2943_v40 = vpop.permute.xlu1 %1283  ;;  %v2945_v5 = vpop.permute.xlu0 %1279 }
  0xac   : > { %1456 = vmax.xlane.f32.xlu0 %v1455_v31 }
  0xaf   : > { %v2947_v8 = vpop.permute.xlu1 %1291  ;;  %v2949_v39 = vpop.permute.xlu0 %1287 }
  0xb3   : > { %v1601_v30 = vpop.permute.xlu1 %1600  ;;  %v1617_v63 = vpop.permute.xlu0 %1616 }
  0xb4   : > { %2188 = vmatprep.subr.bf16.mxu1 %v1617_v63  ;;  %v586_v63 = vunpack.c.2.s8 %v2774_v61 }
  0xb5   : > { %2189 = vmatpush3.bf16.msra.mxu1 %v1601_v30  ;;  %v585_v30 = vunpack.c.2.s8 %v2771_v60 }
  0xb7   : > { %v1619_v38 = vpop.permute.xlu1 %1618  ;;  %v1603_v56 = vpop.permute.xlu0 %1602 }
  0xb8   : > { %2190 = vmatprep.subr.bf16.mxu1 %v1619_v38 }
  0xb9   : > { %1608 = vrot.lane.b32.xlu1 %v2706_v62, %s2489_s27  ;;  %2191 = vmatpush3.bf16.msra.mxu1 %v1603_v56  ;;  %v617_v62 = vpack.c.b16 %v586_v63, %v585_v30  ;;  %v587_v56 = vunpack.c.3.s8 %v2771_v60  ;;  %v1327_v60 = vadd.f32 %v2793_v43, %v2873_v32 }
  0xbb   : > { %v1605_v35 = vpop.permute.xlu1 %1604  ;;  %v1621_v23 = vpop.permute.xlu0 %1620  ;;  %v618_v38 = vpack.c.b8 %v617_v62, %v617_v62 }
  0xbc   : > { %2192 = vmatprep.subr.bf16.mxu1 %v1621_v23 }
  0xbd   : > { %1626 = vrot.lane.b32.xlu1 %v2716_v1, %s2489_s27  ;;  %2193 = vmatpush3.bf16.msra.mxu1 %v1605_v35  ;;  %v588_v1 = vunpack.c.3.s8 %v2774_v61  ;;  %vm643_vm2 = vnez %v618_v38  ;;  %v1359_v38 = vmul.f32 0.2, %v1327_v60 }
  0xbf   : > { %v1623_v31 = vpop.permute.xlu1 %1622  ;;  %v1607_v2 = vpop.permute.xlu0 %1606  ;;  %v619_v35 = vpack.c.b16 %v588_v1, %v587_v56 }
  0xc0   : > { %2194 = vmatprep.subr.bf16.mxu1 %v1623_v31  ;;  %v659_v31 = vsel %vm643_vm2, 16843009, %v3939_v0 }
  0xc1   : > { %2195 = vmatpush3.bf16.msra.mxu1 %v1607_v2  ;;  %v620_v23 = vpack.c.b8 %v619_v35, %v619_v35  ;;  %v1324_v2 = vadd.f32 %v2791_v42, %v2875_v26  ;;  %v681_v63 = vunpack.c.0.s8 %v659_v31  ;;  %v682_v62 = vunpack.c.1.s8 %v659_v31 }
  0xc2   : > { %1624 = vrot.lane.b32.xlu0 %v2701_v57, %s2489_s27  ;;  %v1325_v57 = vadd.f32 %v2793_v43, %v2875_v26  ;;  %v3952_v26 = vmov 0  ;;  %v3958_v31 = vmov 0 }
  0xc3   : > { %vm644_vm3 = vnez %v620_v23  ;;  %v1356_v61 = vmul.f32 0.2, %v1324_v2  ;;  %vm2973_vm7 = vcmp.ne.s32.totalorder %v681_v63, 0  ;;  %vm2977_vm8 = vcmp.ne.s32.totalorder %v682_v62, 0 }
  0xc4   : > { %v1357_v30 = vmul.f32 0.2, %v1325_v57  ;;  %v660_v56 = vsel %vm644_vm3, 16843009, %v3939_v0  ;;  %v3953_v26 = vsel %vm2973_vm7, 4294967295, %v3952_v26  ;;  %v3955_v23 = vmov 0 }
  0xc5   : > { %v1388_v35 = vmax.f32 %v1324_v2, %v1356_v61  ;;  %3954 = vst [vmem:[#allocation23_spill] sm:$0xff] %v3953_v26  ;;  %v3956_v23 = vsel %vm2977_vm8, 4294967295, %v3955_v23  ;;  %v683_v9 = vunpack.c.0.s8 %v660_v56  ;;  %v3961_v61 = vmov 0 }
  0xc6   : > { %1610 = vrot.lane.b32.xlu0 %v2726_v16, %s2489_s27  ;;  %v1326_v16 = vadd.f32 %v2791_v42, %v2873_v32  ;;  %v1389_v52 = vmax.f32 %v1325_v57, %v1357_v30  ;;  %3957 = vst [vmem:[#allocation24_spill] sm:$0xff] %v3956_v23  ;;  %v684_v32 = vunpack.c.1.s8 %v660_v56  ;;  %v1391_v57 = vmax.f32 %v1327_v60, %v1359_v38 }
  0xc7   : > { %v2983_v58 = vsel %vm2973_vm7, %v1388_v35, -1e+30  ;;  %vm2989_vm2 = vcmp.ne.s32.totalorder %v683_v9, 0  ;;  %v687_v60 = vunpack.c.0.s8 %v2683_v50  ;;  %v3964_v56 = vmov 0 }
  0xc8   : > { %v1358_v1 = vmul.f32 0.2, %v1326_v16  ;;  %v2987_v0 = vsel %vm2977_vm8, %v1389_v52, -1e+30  ;;  %v3959_v31 = vsel %vm2989_vm2, 4294967295, %v3958_v31  ;;  %vm2993_vm3 = vcmp.ne.s32.totalorder %v684_v32, 0 }
  0xc9   : > { %3960 = vst [vmem:[#allocation25_spill] sm:$0xff] %v3959_v31  ;;  %v3962_v61 = vsel %vm2993_vm3, 4294967295, %v3961_v61  ;;  %v1458_v30 = vmax.f32 %v2983_v58, %v2987_v0  ;;  %v3005_v52 = vsel %vm2993_vm3, %v1391_v57, -1e+30  ;;  %vm3030_vm3 = vcmp.ne.s32.totalorder %v687_v60, 0 }
  0xca   : > { %v1390_v2 = vmax.f32 %v1326_v16, %v1358_v1  ;;  %3963 = vst [vmem:[#allocation26_spill] sm:$0xff] %v3962_v61  ;;  %v1330_v16 = vadd.f32 %v2791_v42, %v2897_v10  ;;  %v3965_v56 = vsel %vm3030_vm3, 4294967295, %v3964_v56  ;;  %v686_v32 = vunpack.c.1.s8 %v2686_v53 }
  0xcb   : > { %3966 = vst [vmem:[#allocation27_spill] sm:$0xff] %v3965_v56 }
  0xcc   : > { %v3001_v63 = vsel %vm2989_vm2, %v1390_v2, -1e+30 }
  0xcd   : > { %v1461_v9 = vmax.f32 %v3001_v63, %v3005_v52 }
  0xe1   : > { %1459 = vmax.xlane.f32.xlu1 %v1458_v30 }
  0xe5   : > { %1462 = vmax.xlane.f32.xlu0 %v1461_v9  ;;  %v3971_v9 = vmov 0 }
  0xf2   : > { %377 = vperm.xlu1 %2267, %v2574_v7   ;;  %v1362_v7 = vmul.f32 0.2, %v1330_v16 }
  0xf4   : > { %v1394_v62 = vmax.f32 %v1330_v16, %v1362_v7  ;;  %v3974_v16 = vmov 0 }
  0xf6   : > { %382 = vperm.xlu1 %2267, %v2557_v3   ;;  %v1331_v3 = vadd.f32 %v2793_v43, %v2897_v10  ;;  %v3967_v10 = vmov 0 }
  0xfa   : > { %392 = vperm.xlu1 %2267, %v2599_v12   ;;  %v1363_v12 = vmul.f32 0.2, %v1331_v3 }
  0xfb   : > { %1628 = vrot.lane.b32.xlu0 %v2743_v33, %s2489_s27  ;;  %v688_v33 = vunpack.c.1.s8 %v2683_v50  ;;  %v3040_v50 = vsel %vm3030_vm3, %v1394_v62, -1e+30  ;;  %vm3054_vm3 = vcmp.ne.s32.totalorder %v686_v32, 0 }
  0xfc   : > { %v3975_v16 = vsel %vm3054_vm3, 4294967295, %v3974_v16 }
  0xfd   : > { %vm3034_vm2 = vcmp.ne.s32.totalorder %v688_v33, 0  ;;  %3976 = vst [vmem:[#allocation31_spill] sm:$0xff] %v3975_v16  ;;  %v1336_v16 = vadd.f32 %v2791_v42, %v2945_v5 }
  0xfe   : > { %1612 = vrot.lane.b32.xlu1 %v2748_v34, %s2489_s27  ;;  %v1328_v34 = vadd.f32 %v2791_v42, %v2899_v48  ;;  %v3968_v10 = vsel %vm3034_vm2, 4294967295, %v3967_v10 }
  0xff   : > { %1614 = vrot.lane.b32.xlu0 %v2764_v45, %s2489_s27  ;;  %v1329_v45 = vadd.f32 %v2793_v43, %v2899_v48  ;;  %3969 = vst [vmem:[#allocation28_spill] sm:$0xff] %v3968_v10  ;;  %v685_v48 = vunpack.c.0.s8 %v2686_v53  ;;  %v1368_v26 = vmul.f32 0.2, %v1336_v16 }
 0x100   : > { %v1360_v1 = vmul.f32 0.2, %v1328_v34 }
 0x101   : > { %v1361_v38 = vmul.f32 0.2, %v1329_v45  ;;  %vm3050_vm8 = vcmp.ne.s32.totalorder %v685_v48, 0 }
 0x102   : > { %1630 = vrot.lane.b32.xlu1 %v2757_v41, %s2489_s27  ;;  %v1395_v41 = vmax.f32 %v1331_v3, %v1363_v12  ;;  %v1392_v57 = vmax.f32 %v1328_v34, %v1360_v1  ;;  %v3972_v9 = vsel %vm3050_vm8, 4294967295, %v3971_v9  ;;  %s3719_s27 = scalar_lea.vmem %s3838_s5, %s2542_s26 }
 0x103   : > { %v1393_v30 = vmax.f32 %v1329_v45, %v1361_v38  ;;  %3973 = vst [vmem:[#allocation30_spill] sm:$0xff] %v3972_v9  ;;  %v4000_v9 = vmov 0 }
 0x104   : > { %v3044_v35 = vsel %vm3034_vm2, %v1395_v41, -1e+30  ;;  %v3060_v3 = vsel %vm3050_vm8, %v1392_v57, -1e+30  ;;  %v1333_v57 = vadd.f32 %v2793_v43, %v2931_v28 }
 0x105   : > { %3970 = vst [vmem:[#allocation29_spill] sm:$0xff] %v3044_v35  ;;  %v1467_v2 = vmax.f32 %v3040_v50, %v3044_v35  ;;  %3977 = vst [vmem:[#allocation32_spill] sm:$0xff] %v3060_v3  ;;  %v3064_v53 = vsel %vm3054_vm3, %v1393_v30, -1e+30 }
 0x106   : > { %3978 = vst [vmem:[#allocation33_spill] sm:$0xff] %v3064_v53  ;;  %v1464_v7 = vmax.f32 %v3060_v3, %v3064_v53  ;;  %v4003_v3 = vld [vmem:[#allocation11_spill] sm:$0xff] }
 0x107   : > { %v453_v35 = vsub.s32 0, %v4003_v3 }
 0x11e   : > { %1468 = vmax.xlane.f32.xlu0 %v1467_v2 }
 0x126   : > { %1465 = vmax.xlane.f32.xlu1 %v1464_v7 }
 0x12c   : > { %v3068_v12 = vpop.xlane.xlu1 %1441 }
 0x12d   : > { %v1489_v60 = vsub.f32 %v2857_v37, %v3068_v12 }
 0x12f   : > { %v1522_v62 = vmul.f32 1.442695, %v1489_v60 }
 0x130   : > { %v3072_v33 = vpop.xlane.xlu1 %1447 }
 0x131   : > { %v3074_v34 = vpop.xlane.xlu0 %1444  ;;  %2287 = vpow2.f32 %v1522_v62 }
 0x132   : > { %v1491_v45 = vsub.f32 %v2889_v59, %v3074_v34 }
 0x134   : > { %v1526_v41 = vmul.f32 1.442695, %v1491_v45  ;;  %372 = vperm.xlu0 %2268, %v2560_v4   ;;  %v3984_v45 = vld [vmem:[#allocation7_spill] sm:$0xff] }
 0x135   : > { %v3079_v1 = vpop.xlane.xlu1 %1453  ;;  %v3081_v38 = vpop.xlane.xlu0 %1450  ;;  %v695_v62 = vunpack.c.0.s8 %v3984_v45 }
 0x136   : > { %2289 = vpow2.f32 %v1526_v41  ;;  %v696_v41 = vunpack.c.1.s8 %v3984_v45 }
 0x137   : > { %402 = vperm.xlu1 %2267, %v2616_v15   ;;  %vm3136_vm0 = vcmp.ne.s32.totalorder %v695_v62, 0 }
 0x138   : > { %387 = vperm.xlu0 %2268, %v2571_v6   ;;  %vm3140_vm7 = vcmp.ne.s32.totalorder %v696_v41, 0  ;;  %v4002_v41 = vld [vmem:[#allocation9_spill] sm:$0xff] }
 0x139   : > { %v3085_v37 = vpop.xlane.xlu0 %1456  ;;  %v1609_v48 = vpop.permute.xlu1 %1608  ;;  %v693_v61 = vunpack.c.0.s8 %v4002_v41  ;;  %v694_v31 = vunpack.c.1.s8 %v4002_v41 }
 0x13b   : > { %412 = vperm.xlu1 %2267, %v2631_v18   ;;  %v2288_v4 = vpop.eup %2287  ;;  %v3980_v18 = vld [vmem:[#allocation3_spill] sm:$0xff] }
 0x13c   : > { %397 = vperm.xlu0 %2268, %v2596_v11   ;;  %v3979_v11 = vld [vmem:[#allocation2_spill] sm:$0xff] }
 0x13d   : > { %v1625_v59 = vpop.permute.xlu0 %1624  ;;  %v1627_v32 = vpop.permute.xlu1 %1626 }
 0x13e   : > { %2196 = vmatprep.subr.bf16.mxu1 %v1625_v59  ;;  %v1335_v59 = vadd.f32 %v2793_v43, %v2929_v54 }
 0x13f   : > { %422 = vperm.xlu1 %2267, %v2639_v20   ;;  %2197 = vmatpush3.bf16.msra.mxu1 %v1609_v48  ;;  %v3981_v20 = vld [vmem:[#allocation4_spill] sm:$0xff]  ;;  %v1334_v48 = vadd.f32 %v2791_v42, %v2929_v54  ;;  %v3993_v54 = vmov 0 }
 0x140   : > { %407 = vperm.xlu0 %2268, %v2610_v14   ;;  %2198 = vmatprep.subr.bf16.mxu1 %v1627_v32  ;;  %v2290_v2 = vpop.eup %2289  ;;  %v1332_v14 = vadd.f32 %v2791_v42, %v2931_v28  ;;  %v1365_v28 = vmul.f32 0.2, %v1333_v57 }
 0x141   : > { %v1611_v15 = vpop.permute.xlu0 %1610  ;;  %v1585_v6 = vpack.c.bf16 %v2290_v2, %v2288_v4  ;;  %v1338_v4 = vadd.f32 %v2791_v42, %v2943_v40  ;;  %v3985_v2 = vmov 0 }
 0x142   : > { %v1364_v32 = vmul.f32 0.2, %v1332_v14  ;;  %v1397_v45 = vmax.f32 %v1333_v57, %v1365_v28  ;;  %v1341_v28 = vadd.f32 %v2793_v43, %v2949_v39 }
 0x143   : > { %432 = vperm.xlu1 %2267, %v2647_v22   ;;  %2199 = vmatpush3.bf16.msra.mxu1 %v1611_v15  ;;  %v3982_v22 = vld [vmem:[#allocation5_spill] sm:$0xff]  ;;  %v1339_v15 = vadd.f32 %v2793_v43, %v2943_v40  ;;  %v1342_v40 = vadd.f32 %v2791_v42, %v2947_v8  ;;  %v1370_v10 = vmul.f32 0.2, %v1338_v4 }
 0x144   : > { %417 = vperm.xlu0 %2268, %v2625_v17   ;;  %1680 = vmatprep.mubr.bf16.mxu1 %v1585_v6  ;;  %v689_v30 = vunpack.c.0.s8 %v3982_v22  ;;  %v690_v7 = vunpack.c.1.s8 %v3982_v22  ;;  %v3983_v17 = vld [vmem:[#allocation6_spill] sm:$0xff]  ;;  %v3988_v6 = vmov 0  ;;  %v1343_v22 = vadd.f32 %v2793_v43, %v2947_v8 }
 0x145   : > { %v691_v60 = vunpack.c.0.s8 %v3983_v17  ;;  %v1371_v56 = vmul.f32 0.2, %v1339_v15  ;;  %v1337_v8 = vadd.f32 %v2793_v43, %v2945_v5  ;;  %v1402_v36 = vmax.f32 %v1338_v4, %v1370_v10 }
 0x146   : > { %vm3115_vm2 = vcmp.ne.s32.totalorder %v689_v30, 0  ;;  %vm3119_vm3 = vcmp.ne.s32.totalorder %v690_v7, 0  ;;  %v1375_v57 = vmul.f32 0.2, %v1343_v22  ;;  %v4004_v43 = vmov 0 }
 0x147   : > { %447 = vperm.xlu1 %2267, %v2659_v25   ;;  %v692_v25 = vunpack.c.1.s8 %v3983_v17  ;;  %v3986_v2 = vsel %vm3115_vm2, 4294967295, %v3985_v2  ;;  %v3989_v6 = vsel %vm3119_vm3, 4294967295, %v3988_v6  ;;  %vm3123_vm8 = vcmp.ne.s32.totalorder %v691_v60, 0 }
 0x148   : > { %427 = vperm.xlu0 %2268, %v3979_v11   ;;  %3987 = vst [vmem:[#allocation2_spill] sm:$0xff] %v3986_v2  ;;  %3990 = vst [vmem:[#allocation3_spill] sm:$0xff] %v3989_v6  ;;  %v3991_v11 = vmov 0  ;;  %v1366_v17 = vmul.f32 0.2, %v1334_v48  ;;  %v1403_v53 = vmax.f32 %v1339_v15, %v1371_v56  ;;  %v1407_v4 = vmax.f32 %v1343_v22, %v1375_v57 }
 0x149   : > { %v3992_v11 = vsel %vm3123_vm8, 4294967295, %v3991_v11  ;;  %vm3127_vm1 = vcmp.ne.s32.totalorder %v692_v25, 0  ;;  %v1367_v60 = vmul.f32 0.2, %v1335_v59  ;;  %v1396_v25 = vmax.f32 %v1332_v14, %v1364_v32 }
 0x14a   : > { %v3994_v54 = vsel %vm3127_vm1, 4294967295, %v3993_v54  ;;  %v1374_v14 = vmul.f32 0.2, %v1342_v40  ;;  %v1340_v32 = vadd.f32 %v2791_v42, %v2949_v39  ;;  %v1369_v41 = vmul.f32 0.2, %v1337_v8  ;;  %v4006_v39 = vld [vmem:[#allocation10_spill] sm:$0xff] }
 0x14b   : > { %v3161_v5 = vsel %vm3115_vm2, %v1396_v25, -1e+30  ;;  %v1399_v23 = vmax.f32 %v1335_v59, %v1367_v60  ;;  %v457_v42 = vsub.s32 2, %v4003_v3  ;;  %v697_v25 = vunpack.c.0.s8 %v4006_v39 }
 0x14c   : > { %437 = vperm.xlu0 %2268, %v3980_v18   ;;  %v3995_v18 = vld [vmem:[#allocation8_spill] sm:$0xff]  ;;  %v1372_v2 = vmul.f32 0.2, %v1340_v32  ;;  %v1373_v6 = vmul.f32 0.2, %v1341_v28  ;;  %v698_v59 = vunpack.c.1.s8 %v4006_v39  ;;  %v1406_v3 = vmax.f32 %v1342_v40, %v1374_v14 }
 0x14d   : > { %v700_v62 = vunpack.c.1.s8 %v3995_v18  ;;  %v3183_v10 = vsel %vm3127_vm1, %v1399_v23, -1e+30  ;;  %v3187_v15 = vsel %vm3136_vm0, %v1402_v36, -1e+30  ;;  %v1400_v60 = vmax.f32 %v1336_v16, %v1368_v26 }
 0x14e   : > { %vm3199_vm1 = vcmp.ne.s32.totalorder %v694_v31, 0  ;;  %v1405_v14 = vmax.f32 %v1341_v28, %v1373_v6 }
 0x14f   : > { %vm3169_vm12 = vcmp.ne.s32.totalorder %v700_v62, 0  ;;  %v4007_v62 = vld [vmem:[#allocation12_spill] sm:$0xff] }
 0x150   : > { %442 = vperm.xlu0 %2268, %v3981_v20   ;;  %v699_v20 = vunpack.c.0.s8 %v3995_v18  ;;  %v3165_v18 = vsel %vm3119_vm3, %v1397_v45, -1e+30  ;;  %v4005_v43 = vsel %vm3169_vm12, 4294967295, %v4004_v43  ;;  %v1401_v45 = vmax.f32 %v1337_v8, %v1369_v41 }
 0x151   : > { %v458_v39 = vrot.slane %v4007_v62, %v457_v42  ;;  %v1404_v8 = vmax.f32 %v1340_v32, %v1372_v2  ;;  %v1495_v2 = vsub.f32 %v2907_v19, %v3081_v38  ;;  %v1488_v32 = vsub.f32 %v2853_v21, %v3068_v12 }
 0x152   : > { %vm3149_vm13 = vcmp.ne.s32.totalorder %v699_v20, 0  ;;  %v1398_v20 = vmax.f32 %v1334_v48, %v1366_v17  ;;  %v1470_v48 = vmax.f32 %v3161_v5, %v3165_v18  ;;  %v3191_v17 = vsel %vm3140_vm7, %v1403_v53, -1e+30 }
 0x153   : > { %v4001_v9 = vsel %vm3149_vm13, 4294967295, %v4000_v9  ;;  %v1479_v26 = vmax.f32 %v3187_v15, %v3191_v17  ;;  %v3209_v16 = vsel %vm3149_vm13, %v1406_v3, -1e+30  ;;  %v3223_v22 = vsel %vm3199_vm1, %v1401_v45, -1e+30 }
 0x154   : > { %v3179_v56 = vsel %vm3123_vm8, %v1398_v20, -1e+30  ;;  %v454_v20 = vrot.slane %v4007_v62, %v453_v35  ;;  %vm3195_vm8 = vcmp.ne.s32.totalorder %v693_v61, 0  ;;  %v3213_v61 = vsel %vm3169_vm12, %v1407_v4, -1e+30 }
 0x155   : > { %v1473_v36 = vmax.f32 %v3179_v56, %v3183_v10  ;;  %v3219_v31 = vsel %vm3195_vm8, %v1400_v60, -1e+30  ;;  %v3227_v41 = vrot.slane %v458_v39, %v453_v35  ;;  %vm3229_vm12 = vcmp.ne.s32.totalorder %v697_v25, 0 }
 0x156   : > { %v3225_v57 = vrot.slane %v454_v20, %v453_v35  ;;  %vm3233_vm13 = vcmp.ne.s32.totalorder %v698_v59, 0  ;;  %v1490_v3 = vsub.f32 %v2879_v27, %v3074_v34  ;;  %v1485_v6 = vmax.f32 %v3209_v16, %v3213_v61 }
 0x157   : > { %v1476_v35 = vmax.f32 %v3219_v31, %v3223_v22  ;;  %v3251_v59 = vsel %vm3229_vm12, %v1404_v8, -1e+30  ;;  %v3255_v27 = vsel %vm3233_vm13, %v1405_v14, -1e+30  ;;  %v1493_v19 = vsub.f32 %v2871_v47, %v3072_v33 }
 0x158   : > { %v1524_v21 = vmul.f32 1.442695, %v1490_v3  ;;  %v1534_v12 = vmul.f32 1.442695, %v1495_v2  ;;  %v1482_v62 = vmax.f32 %v3251_v59, %v3255_v27  ;;  %v1520_v20 = vmul.f32 1.442695, %v1488_v32 }
 0x159   : > { %v1494_v14 = vsub.f32 %v2903_v24, %v3081_v38  ;;  %v1499_v3 = vsub.f32 %v2939_v13, %v3085_v37  ;;  %v1497_v13 = vsub.f32 %v2923_v46, %v3079_v1  ;;  %v1496_v46 = vsub.f32 %v2911_v44, %v3079_v1 }
 0x15a   : > { %2291 = vpow2.f32 %v1524_v21 }
 0x15b   : > { %2293 = vpow2.f32 %v1534_v12  ;;  %v1532_v49 = vmul.f32 1.442695, %v1494_v14  ;;  %v1542_v38 = vmul.f32 1.442695, %v1499_v3 }
 0x15c   : > { %2295 = vpow2.f32 %v1520_v20 }
 0x16b   : > { %1471 = vmax.xlane.f32.xlu1 %v1470_v48  ;;  %v2490_v48 = vmov 4  }
 0x16c   : > { %2269 = vset.pattern.permute.xlu0 %v2490_v48  ;;  %2270 = vset.pattern.permute.xlu1 %v2490_v48 }
 0x16e   : > { %v3215_v53 = vpop.xlane.xlu1 %1459 }
 0x16f   : > { %1474 = vmax.xlane.f32.xlu0 %v1473_v36  ;;  %1480 = vmax.xlane.f32.xlu1 %v1479_v26  ;;  %v1530_v26 = vmul.f32 1.442695, %v1493_v19  ;;  %v1538_v19 = vmul.f32 1.442695, %v1497_v13  ;;  %v1501_v12 = vsub.f32 %v2987_v0, %v3215_v53  ;;  %v1500_v0 = vsub.f32 %v2983_v58, %v3215_v53 }
 0x171   : > { %2297 = vpow2.f32 %v1530_v26  ;;  %v1546_v26 = vmul.f32 1.442695, %v1501_v12 }
 0x172   : > { %v378_v28 = vpop.permute.xlu1 %377  ;;  %v3247_v25 = vpop.xlane.xlu0 %1462  ;;  %2299 = vpow2.f32 %v1532_v49 }
 0x173   : > { %v471_v34 = vadd.f32 %v3225_v57, %v378_v28  ;;  %v472_v4 = vadd.f32 %v3227_v41, %v378_v28  ;;  %1486 = vmax.xlane.f32.xlu1 %v1485_v6  ;;  %1477 = vmax.xlane.f32.xlu0 %v1476_v35  ;;  %v1492_v35 = vsub.f32 %v2867_v29, %v3072_v33  ;;  %2301 = vpow2.f32 %v1542_v38 }
 0x174   : > { %v1498_v29 = vsub.f32 %v2935_v55, %v3085_v37  ;;  %v1503_v33 = vsub.f32 %v3005_v52, %v3247_v25  ;;  %v1536_v52 = vmul.f32 1.442695, %v1496_v46  ;;  %v1502_v44 = vsub.f32 %v3001_v63, %v3247_v25 }
 0x175   : > { %v503_v60 = vmul.f32 0.2, %v471_v34  ;;  %v504_v45 = vmul.f32 0.2, %v472_v4  ;;  %v1528_v28 = vmul.f32 1.442695, %v1492_v35 }
 0x176   : > { %v3263_v39 = vpop.permute.xlu1 %382  ;;  %v1629_v36 = vpop.permute.xlu0 %1628  ;;  %v1550_v37 = vmul.f32 1.442695, %v1503_v33  ;;  %v1548_v14 = vmul.f32 1.442695, %v1502_v44 }
 0x177   : > { %v535_v8 = vmax.f32 %v471_v34, %v503_v60  ;;  %v536_v47 = vmax.f32 %v472_v4, %v504_v45  ;;  %1483 = vmax.xlane.f32.xlu0 %v1482_v62  ;;  %2200 = vmatprep.subr.bf16.mxu1 %v1629_v36  ;;  %v2292_v34 = vpop.eup %2291  ;;  %2303 = vpow2.f32 %v1528_v28  ;;  %v1540_v62 = vmul.f32 1.442695, %v1498_v29 }
 0x178   : > { %v2294_v21 = vpop.eup %2293  ;;  %2305 = vpow2.f32 %v1538_v19  ;;  %v473_v29 = vadd.f32 %v3225_v57, %v3263_v39 }
 0x179   : > { %v3271_v2 = vsel %vm2825_vm10, %v535_v8, -1e+30  ;;  %v3275_v6 = vsel %vm2829_vm11, %v536_v47, -1e+30  ;;  %v2296_v45 = vpop.eup %2295  ;;  %2307 = vpow2.f32 %v1540_v62 }
 0x17a   : > { %v3279_v32 = vpop.permute.xlu1 %392  ;;  %v768_v24 = vmax.f32 %v3271_v2, %v3275_v6  ;;  %v1615_v60 = vpop.permute.xlu0 %1614  ;;  %v1584_v20 = vpack.c.bf16 %v2292_v34, %v2296_v45  ;;  %2309 = vpow2.f32 %v1550_v37  ;;  %v505_v33 = vmul.f32 0.2, %v473_v29  ;;  %v4016_v37 = vld [vmem:[#allocation29_spill] sm:$0xff] }
 0x17b   : > { %v2298_v55 = vpop.eup %2297  ;;  %2311 = vpow2.f32 %v1536_v52  ;;  %v474_v34 = vadd.f32 %v3227_v41, %v3263_v39  ;;  %v477_v46 = vadd.f32 %v3225_v57, %v3279_v32  ;;  %v4018_v39 = vld [vmem:[#allocation33_spill] sm:$0xff] }
 0x17c   : > { %769 = vmax.xlane.f32.xlu1 %v768_v24  ;;  %v1587_v36 = vpack.c.bf16 %v2294_v21, %v2298_v55  ;;  %v2300_v1 = vpop.eup %2299  ;;  %2313 = vpow2.f32 %v1546_v26  ;;  %v1544_v24 = vmul.f32 1.442695, %v1500_v0  ;;  %v537_v12 = vmax.f32 %v473_v29, %v505_v33  ;;  %v4017_v26 = vld [vmem:[#allocation32_spill] sm:$0xff] }
 0x17d   : > { %v2302_v8 = vpop.eup %2301  ;;  %2315 = vpow2.f32 %v1548_v14  ;;  %v509_v45 = vmul.f32 0.2, %v477_v46 }
 0x17e   : > { %v1613_v51 = vpop.permute.xlu1 %1612  ;;  %2317 = vpow2.f32 %v1544_v24 }
 0x17f   : > { %2201 = vmatpush3.bf16.msra.mxu1 %v1613_v51  ;;  %v541_v24 = vmax.f32 %v477_v46, %v509_v45 }
 0x181   : > { %v2304_v47 = vpop.eup %2303 }
 0x182   : > { %v1631_v4 = vpop.permute.xlu1 %1630  ;;  %v2306_v3 = vpop.eup %2305  ;;  %v1586_v35 = vpack.c.bf16 %v2300_v1, %v2304_v47  ;;  %v3313_v47 = vsel %vm2809_vm6, %v537_v12, -1e+30 }
 0x183   : > { %2202 = vmatprep.subr.bf16.mxu1 %v1631_v4  ;;  %v1589_v13 = vpack.c.bf16 %v2302_v8, %v2306_v3  ;;  %v2308_v49 = vpop.eup %2307  ;;  %v478_v4 = vadd.f32 %v3227_v41, %v3279_v32 }
 0x184   : > { %2203 = vmatpush3.bf16.msra.mxu1 %v1615_v60  ;;  %v2310_v63 = vpop.eup %2309  ;;  %v506_v60 = vmul.f32 0.2, %v474_v34 }
 0x185   : > { %v2312_v25 = vpop.eup %2311  ;;  %v510_v62 = vmul.f32 0.2, %v478_v4 }
 0x186   : > { %v2314_v38 = vpop.eup %2313  ;;  %v1588_v28 = vpack.c.bf16 %v2308_v49, %v2312_v25  ;;  %v538_v14 = vmax.f32 %v474_v34, %v506_v60 }
 0x187   : > { %1681 = vmatmul.mubr.bf16.vlgmr.msra.gmra.mrb[0].mxu1 %v1584_v20  ;;  %v1591_v51 = vpack.c.bf16 %v2310_v63, %v2314_v38  ;;  %v2316_v58 = vpop.eup %2315 }
 0x188   : > { %1688 = vmatprep.mubr.bf16.mxu1 %v1587_v36  ;;  %v2318_v53 = vpop.eup %2317  ;;  %v3327_v12 = vsel %vm2821_vm9, %v538_v14, -1e+30 }
 0x189   : > { %v1590_v19 = vpack.c.bf16 %v2316_v58, %v2318_v53  ;;  %4022 = vst [vmem:[#allocation4_spill] sm:$0xff] %v3327_v12 }
 0x18f   : > { %1689 = vmatmul.mubr.bf16.gmra.mrb[4].mxu1 %v1586_v35 }
 0x190   : > { %1696 = vmatprep.mubr.bf16.mxu1 %v1589_v13  ;;  %v542_v13 = vmax.f32 %v478_v4, %v510_v62 }
 0x197   : > { %1697 = vmatmul.mubr.bf16.gmra.mrb[8].mxu1 %v1588_v28 }
 0x198   : > { %1704 = vmatprep.mubr.bf16.mxu1 %v1591_v51 }
 0x19f   : > { %1705 = vmatmul.mubr.bf16.gmra.mrb[12].mxu1 %v1590_v19 }
 0x1ab   : > { %v1469_v21 = vpop.xlane.xlu0 %1468 }
 0x1ac   : > { %v1506_v55 = vsub.f32 %v3040_v50, %v1469_v21  ;;  %v1507_v20 = vsub.f32 %v4016_v37, %v1469_v21  ;;  %v4034_v37 = vld [vmem:[#allocation23_spill] sm:$0xff] }
 0x1ad   : > { %vm4035_vm6 = vnez %v4034_v37 }
 0x1ae   : > { %v1558_v49 = vmul.f32 1.442695, %v1507_v20  ;;  %v1556_v28 = vmul.f32 1.442695, %v1506_v55 }
 0x1b3   : > { %v1466_v52 = vpop.xlane.xlu1 %1465  ;;  %v373_v36 = vpop.permute.xlu0 %372 }
 0x1b4   : > { %v1504_v44 = vsub.f32 %v4017_v26, %v1466_v52  ;;  %v1505_v1 = vsub.f32 %v4018_v39, %v1466_v52  ;;  %v469_v0 = vadd.f32 %v3225_v57, %v373_v36  ;;  %v470_v8 = vadd.f32 %v3227_v41, %v373_v36 }
 0x1b5   : > { %v3338_v26 = vsel %vm2881_vm14, %v541_v24, -1e+30  ;;  %v3342_v39 = vsel %vm2893_vm15, %v542_v13, -1e+30 }
 0x1b6   : > { %v1552_v3 = vmul.f32 1.442695, %v1504_v44  ;;  %v1554_v35 = vmul.f32 1.442695, %v1505_v1  ;;  %v501_v50 = vmul.f32 0.2, %v469_v0 }
 0x1b7   : > { %v502_v63 = vmul.f32 0.2, %v470_v8  ;;  %v403_v25 = vpop.permute.xlu1 %402  ;;  %v388_v38 = vpop.permute.xlu0 %387  ;;  %4025 = vst [vmem:[#allocation5_spill] sm:$0xff] %v3338_v26  ;;  %4027 = vst [vmem:[#allocation6_spill] sm:$0xff] %v3342_v39 }
 0x1b8   : > { %v533_v51 = vmax.f32 %v469_v0, %v501_v50  ;;  %v481_v58 = vadd.f32 %v3225_v57, %v403_v25  ;;  %v3317_v53 = vadd.f32 %v3227_v41, %v403_v25  ;;  %2319 = vpow2.f32 %v1554_v35 }
 0x1b9   : > { %v534_v19 = vmax.f32 %v470_v8, %v502_v63  ;;  %v475_v29 = vadd.f32 %v3225_v57, %v388_v38  ;;  %v476_v33 = vadd.f32 %v3227_v41, %v388_v38  ;;  %2321 = vpow2.f32 %v1552_v3 }
 0x1ba   : > { %v513_v34 = vmul.f32 0.2, %v481_v58  ;;  %v3323_v4 = vsel %vm2801_vm4, %v533_v51, -1e+30  ;;  %2323 = vpow2.f32 %v1558_v49  ;;  %v3345_v1 = vmul.f32 0.2, %v3317_v53 }
 0x1bb   : > { %v507_v60 = vmul.f32 0.2, %v475_v29  ;;  %v508_v45 = vmul.f32 0.2, %v476_v33  ;;  %v413_v62 = vpop.permute.xlu1 %412  ;;  %v398_v55 = vpop.permute.xlu0 %397  ;;  %v3331_v20 = vsel %vm2805_vm5, %v534_v19, -1e+30  ;;  %2325 = vpow2.f32 %v1556_v28 }
 0x1bc   : > { %v3334_v52 = vadd.f32 %v3225_v57, %v413_v62  ;;  %v479_v8 = vadd.f32 %v3225_v57, %v398_v55  ;;  %v480_v32 = vadd.f32 %v3227_v41, %v398_v55  ;;  %v545_v14 = vmax.f32 %v481_v58, %v513_v34  ;;  %v4028_v58 = vld [vmem:[#allocation17_spill] sm:$0xff] }
 0x1bd   : > { %v539_v0 = vmax.f32 %v475_v29, %v507_v60  ;;  %v540_v3 = vmax.f32 %v476_v33, %v508_v45  ;;  %v3350_v35 = vadd.f32 %v3227_v41, %v413_v62  ;;  %v765_v50 = vmax.f32 %v3323_v4, %v3331_v20  ;;  %v4031_v62 = vld [vmem:[#allocation18_spill] sm:$0xff] }
 0x1be   : > { %v3355_v24 = vmul.f32 0.2, %v3334_v52  ;;  %v511_v13 = vmul.f32 0.2, %v479_v8  ;;  %v512_v49 = vmul.f32 0.2, %v480_v32  ;;  %v771_v38 = vmax.f32 %v3313_v47, %v3327_v12 }
 0x1bf   : > { %v423_v63 = vpop.permute.xlu1 %422  ;;  %v408_v25 = vpop.permute.xlu0 %407  ;;  %766 = vmax.xlane.f32.xlu0 %v765_v50  ;;  %vm4029_vm4 = vnez %v4028_v58  ;;  %v777_v29 = vmax.f32 %v3338_v26, %v3342_v39  ;;  %v546_v33 = vmax.f32 %v3317_v53, %v3345_v1  ;;  %v3376_v60 = vmul.f32 0.2, %v3350_v35 }
 0x1c0   : > { %v3360_v28 = vadd.f32 %v3225_v57, %v423_v63  ;;  %v3363_v51 = vadd.f32 %v3227_v41, %v423_v63  ;;  %v3367_v19 = vsel %vm4029_vm4, %v539_v0, -1e+30  ;;  %v543_v34 = vmax.f32 %v479_v8, %v511_v13  ;;  %v4037_v63 = vld [vmem:[#allocation21_spill] sm:$0xff] }
 0x1c1   : > { %4030 = vst [vmem:[#allocation7_spill] sm:$0xff] %v3367_v19  ;;  %v483_v46 = vadd.f32 %v3225_v57, %v408_v25  ;;  %v484_v21 = vadd.f32 %v3227_v41, %v408_v25  ;;  %v544_v45 = vmax.f32 %v480_v32, %v512_v49  ;;  %vm4032_vm5 = vnez %v4031_v62 }
 0x1c2   : > { %v3380_v55 = vsel %vm4032_vm5, %v540_v3, -1e+30  ;;  %v3384_v36 = vsel %vm4035_vm6, %v545_v14, -1e+30  ;;  %v2320_v44 = vpop.eup %2319  ;;  %v549_v53 = vmax.f32 %v3334_v52, %v3355_v24  ;;  %v3391_v49 = vmul.f32 0.2, %v3360_v28 }
 0x1c3   : > { %4033 = vst [vmem:[#allocation8_spill] sm:$0xff] %v3380_v55  ;;  %4036 = vst [vmem:[#allocation9_spill] sm:$0xff] %v3384_v36  ;;  %v515_v1 = vmul.f32 0.2, %v483_v46  ;;  %v516_v0 = vmul.f32 0.2, %v484_v21  ;;  %v774_v8 = vmax.f32 %v3367_v19, %v3380_v55  ;;  %v433_v50 = vpop.permute.xlu1 %432  ;;  %v418_v13 = vpop.permute.xlu0 %417  ;;  %772 = vmax.xlane.f32.xlu0 %v771_v38  ;;  %vm4038_vm9 = vnez %v4037_v63 }
 0x1c4   : > { %v2322_v32 = vpop.eup %2321  ;;  %v3394_v3 = vmul.f32 0.2, %v3363_v51  ;;  %v3397_v14 = vadd.f32 %v3225_v57, %v433_v50  ;;  %v3401_v52 = vsel %vm4038_vm9, %v543_v34, -1e+30  ;;  %v3404_v58 = vadd.f32 %v3227_v41, %v433_v50  ;;  %v4039_v19 = vld [vmem:[#allocation22_spill] sm:$0xff] }
 0x1c5   : > { %v2324_v24 = vpop.eup %2323  ;;  %v547_v25 = vmax.f32 %v483_v46, %v515_v1  ;;  %775 = vmax.xlane.f32.xlu1 %v774_v8  ;;  %v487_v62 = vadd.f32 %v3225_v57, %v418_v13  ;;  %v488_v37 = vadd.f32 %v3227_v41, %v418_v13  ;;  %v548_v39 = vmax.f32 %v484_v21, %v516_v0 }
 0x1c6   : > { %v2326_v26 = vpop.eup %2325  ;;  %v3409_v38 = vmul.f32 0.2, %v3397_v14  ;;  %v1593_v55 = vpack.c.bf16 %v2324_v24, %v2320_v44  ;;  %vm4040_vm10 = vnez %v4039_v19  ;;  %v550_v13 = vmax.f32 %v3350_v35, %v3376_v60 }
 0x1c7   : > { %v3413_v34 = vsel %vm4040_vm10, %v544_v45, -1e+30  ;;  %v519_v63 = vmul.f32 0.2, %v487_v62  ;;  %v520_v46 = vmul.f32 0.2, %v488_v37  ;;  %v1592_v8 = vpack.c.bf16 %v2326_v26, %v2322_v32  ;;  %v448_v50 = vpop.permute.xlu1 %447  ;;  %v428_v12 = vpop.permute.xlu0 %427  ;;  %778 = vmax.xlane.f32.xlu0 %v777_v29 }
 0x1c8   : > { %v780_v1 = vmax.f32 %v3401_v52, %v3413_v34  ;;  %v553_v21 = vmax.f32 %v3360_v28, %v3391_v49  ;;  %1712 = vmatprep.mubr.bf16.mxu1 %v1593_v55  ;;  %v3422_v19 = vadd.f32 %v3225_v57, %v448_v50  ;;  %v4041_v45 = vld [vmem:[#allocation24_spill] sm:$0xff]  ;;  %v554_v26 = vmax.f32 %v3363_v51, %v3394_v3  ;;  %v4043_v28 = vld [vmem:[#allocation25_spill] sm:$0xff]  ;;  %v4046_v3 = vld [vmem:[#allocation26_spill] sm:$0xff] }
 0x1c9   : > { %vm4042_vm11 = vnez %v4041_v45  ;;  %v526_v0 = vmul.f32 0.2, %v3404_v58  ;;  %1713 = vmatmul.mubr.bf16.gmra.mrb[16].mxu1 %v1592_v8  ;;  %v3432_v35 = vadd.f32 %v3227_v41, %v448_v50  ;;  %vm4044_vm14 = vnez %v4043_v28  ;;  %v4049_v8 = vld [vmem:[#allocation30_spill] sm:$0xff] }
 0x1ca   : > { %v3426_v44 = vsel %vm4042_vm11, %v546_v33, -1e+30  ;;  %781 = vmax.xlane.f32.xlu1 %v780_v1  ;;  %v3436_v29 = vsel %vm4044_vm14, %v547_v25, -1e+30  ;;  %v551_v60 = vmax.f32 %v487_v62, %v519_v63  ;;  %v491_v55 = vadd.f32 %v3225_v57, %v428_v12 }
 0x1cb   : > { %4045 = vst [vmem:[#allocation11_spill] sm:$0xff] %v3436_v29  ;;  %v492_v33 = vadd.f32 %v3227_v41, %v428_v12  ;;  %v783_v32 = vmax.f32 %v3384_v36, %v3426_v44  ;;  %v557_v51 = vmax.f32 %v3397_v14, %v3409_v38  ;;  %v552_v49 = vmax.f32 %v488_v37, %v520_v46  ;;  %v438_v1 = vpop.permute.xlu0 %437  ;;  %v4051_v38 = vld [vmem:[#allocation31_spill] sm:$0xff] }
 0x1cc   : > { %vm4047_vm15 = vnez %v4046_v3  ;;  %vm4050_vm4 = vnez %v4049_v8  ;;  %v531_v62 = vmul.f32 0.2, %v3422_v19  ;;  %v523_v63 = vmul.f32 0.2, %v491_v55 }
 0x1cd   : > { %v3446_v24 = vsel %vm4047_vm15, %v548_v39, -1e+30  ;;  %v3450_v25 = vsel %vm4050_vm4, %v549_v53, -1e+30  ;;  %v524_v12 = vmul.f32 0.2, %v492_v33  ;;  %784 = vmax.xlane.f32.xlu0 %v783_v32  ;;  %v495_v37 = vadd.f32 %v3225_v57, %v438_v1 }
 0x1ce   : > { %4048 = vst [vmem:[#allocation10_spill] sm:$0xff] %v3446_v24  ;;  %v786_v50 = vmax.f32 %v3436_v29, %v3446_v24  ;;  %v532_v14 = vmul.f32 0.2, %v3432_v35  ;;  %v496_v39 = vadd.f32 %v3227_v41, %v438_v1  ;;  %vm4052_vm5 = vnez %v4051_v38  ;;  %v4053_v32 = vld [vmem:[#allocation27_spill] sm:$0xff]  ;;  %v4055_v24 = vld [vmem:[#allocation28_spill] sm:$0xff] }
 0x1cf   : > { %v3460_v46 = vsel %vm4052_vm5, %v550_v13, -1e+30  ;;  %v555_v53 = vmax.f32 %v491_v55, %v523_v63  ;;  %v556_v45 = vmax.f32 %v492_v33, %v524_v12  ;;  %vm4054_vm6 = vnez %v4053_v32  ;;  %v443_v13 = vpop.permute.xlu0 %442 }
 0x1d0   : > { %787 = vmax.xlane.f32.xlu1 %v786_v50  ;;  %v789_v28 = vmax.f32 %v3450_v25, %v3460_v46  ;;  %v3466_v3 = vsel %vm4054_vm6, %v551_v60, -1e+30  ;;  %v558_v8 = vmax.f32 %v3404_v58, %v526_v0  ;;  %v527_v29 = vmul.f32 0.2, %v495_v37 }
 0x1d1   : > { %v528_v36 = vmul.f32 0.2, %v496_v39  ;;  %vm4056_vm9 = vnez %v4055_v24  ;;  %v497_v33 = vadd.f32 %v3225_v57, %v443_v13  ;;  %v498_v63 = vadd.f32 %v3227_v41, %v443_v13 }
 0x1d2   : > { %v3471_v1 = vsel %vm4056_vm9, %v552_v49, -1e+30  ;;  %790 = vmax.xlane.f32.xlu0 %v789_v28  ;;  %v3479_v60 = vsel %vm3115_vm2, %v553_v21, -1e+30  ;;  %v559_v58 = vmax.f32 %v495_v37, %v527_v29  ;;  %v3483_v24 = vsel %vm3119_vm3, %v554_v26, -1e+30 }
 0x1d3   : > { %v792_v55 = vmax.f32 %v3466_v3, %v3471_v1  ;;  %v560_v0 = vmax.f32 %v496_v39, %v528_v36  ;;  %vm4059_vm10 = vnez %v3992_v11  ;;  %v529_v38 = vmul.f32 0.2, %v497_v33 }
 0x1d4   : > { %v3487_v49 = vsel %vm4059_vm10, %v555_v53, -1e+30  ;;  %v530_v28 = vmul.f32 0.2, %v498_v63  ;;  %v795_v57 = vmax.f32 %v3479_v60, %v3483_v24  ;;  %vm4060_vm11 = vnez %v3994_v54 }
 0x1d5   : > { %793 = vmax.xlane.f32.xlu1 %v792_v55  ;;  %v3493_v41 = vsel %vm4060_vm11, %v556_v45, -1e+30  ;;  %v3499_v21 = vsel %vm3195_vm8, %v557_v51, -1e+30  ;;  %v3503_v11 = vsel %vm3199_vm1, %v558_v8, -1e+30  ;;  %v561_v29 = vmax.f32 %v497_v33, %v529_v38 }
 0x1d6   : > { %v798_v36 = vmax.f32 %v3487_v49, %v3493_v41  ;;  %v3507_v26 = vsel %vm3136_vm0, %v559_v58, -1e+30  ;;  %v562_v37 = vmax.f32 %v498_v63, %v530_v28  ;;  %796 = vmax.xlane.f32.xlu0 %v795_v57  ;;  %v3511_v54 = vsel %vm3140_vm7, %v560_v0, -1e+30 }
 0x1d7   : > { %v563_v39 = vmax.f32 %v3422_v19, %v531_v62  ;;  %v564_v23 = vmax.f32 %v3432_v35, %v532_v14  ;;  %v801_v40 = vmax.f32 %v3499_v21, %v3503_v11  ;;  %v804_v30 = vmax.f32 %v3507_v26, %v3511_v54 }
 0x1d8   : > { %v3521_v51 = vsel %vm3229_vm12, %v561_v29, -1e+30  ;;  %v3525_v7 = vsel %vm3233_vm13, %v562_v37, -1e+30  ;;  %vm4061_vm0 = vnez %v4001_v9  ;;  %vm4062_vm1 = vnez %v4005_v43 }
 0x1d9   : > { %799 = vmax.xlane.f32.xlu1 %v798_v36  ;;  %v807_v19 = vmax.f32 %v3521_v51, %v3525_v7  ;;  %v3531_v35 = vsel %vm4061_vm0, %v563_v39, -1e+30  ;;  %v3535_v62 = vsel %vm4062_vm1, %v564_v23, -1e+30  ;;  %vm1921_vm12 = vcmask 31744  }
 0x1da   : > { %802 = vmax.xlane.f32.xlu0 %v801_v40  ;;  %v810_v42 = vmax.f32 %v3531_v35, %v3535_v62  ;;  %vm1993_vm13 = vcmask 64512  }
 0x1dd   : > { %805 = vmax.xlane.f32.xlu1 %v804_v30 }
 0x1de   : > { %808 = vmax.xlane.f32.xlu0 %v807_v19 }
 0x1e1   : > { %811 = vmax.xlane.f32.xlu1 %v810_v42 }
 0x1f8   : > { %v1472_v14 = vpop.xlane.xlu1 %1471 }
 0x1f9   : > { %v1508_v53 = vsub.f32 %v3161_v5, %v1472_v14  ;;  %v1509_v9 = vsub.f32 %v3165_v18, %v1472_v14 }
 0x1fb   : > { %v1560_v8 = vmul.f32 1.442695, %v1508_v53  ;;  %v1562_v13 = vmul.f32 1.442695, %v1509_v9 }
 0x1fc   : > { %v1481_v45 = vpop.xlane.xlu1 %1480  ;;  %v1475_v32 = vpop.xlane.xlu0 %1474 }
 0x1fd   : > { %v1510_v43 = vsub.f32 %v3179_v56, %v1475_v32  ;;  %v1511_v55 = vsub.f32 %v3183_v10, %v1475_v32  ;;  %v1515_v33 = vsub.f32 %v3191_v17, %v1481_v45  ;;  %2327 = vpow2.f32 %v1560_v8 }
 0x1fe   : > { %2329 = vpow2.f32 %v1562_v13  ;;  %v1514_v28 = vsub.f32 %v3187_v15, %v1481_v45 }
 0x1ff   : > { %v1564_v63 = vmul.f32 1.442695, %v1510_v43  ;;  %v1566_v12 = vmul.f32 1.442695, %v1511_v55  ;;  %v1574_v5 = vmul.f32 1.442695, %v1515_v33 }
 0x200   : > { %v1478_v58 = vpop.xlane.xlu0 %1477  ;;  %v1487_v18 = vpop.xlane.xlu1 %1486  ;;  %v1572_v29 = vmul.f32 1.442695, %v1514_v28 }
 0x201   : > { %v1513_v0 = vsub.f32 %v3223_v22, %v1478_v58  ;;  %2331 = vpow2.f32 %v1564_v63  ;;  %v1512_v50 = vsub.f32 %v3219_v31, %v1478_v58  ;;  %v1519_v17 = vsub.f32 %v3213_v61, %v1487_v18 }
 0x202   : > { %2333 = vpow2.f32 %v1566_v12  ;;  %v1518_v15 = vsub.f32 %v3209_v16, %v1487_v18 }
 0x203   : > { %v1570_v38 = vmul.f32 1.442695, %v1513_v0  ;;  %2335 = vpow2.f32 %v1574_v5  ;;  %v1568_v57 = vmul.f32 1.442695, %v1512_v50  ;;  %v1582_v22 = vmul.f32 1.442695, %v1519_v17 }
 0x204   : > { %v1484_v56 = vpop.xlane.xlu0 %1483  ;;  %v1580_v42 = vmul.f32 1.442695, %v1518_v15  ;;  %v4063_v17 = vld [vmem:[#allocation4_spill] sm:$0xff] }
 0x205   : > { %v1517_v10 = vsub.f32 %v3255_v27, %v1484_v56  ;;  %2337 = vpow2.f32 %v1570_v38  ;;  %v1516_v39 = vsub.f32 %v3251_v59, %v1484_v56 }
 0x206   : > { %2339 = vpow2.f32 %v1568_v57 }
 0x207   : > { %v1578_v36 = vmul.f32 1.442695, %v1517_v10  ;;  %v2328_v37 = vpop.eup %2327  ;;  %v1576_v61 = vmul.f32 1.442695, %v1516_v39 }
 0x208   : > { %v2330_v31 = vpop.eup %2329 }
 0x209   : > { %2341 = vpow2.f32 %v1578_v36  ;;  %v770_v55 = vpop.xlane.xlu1 %769  ;;  %v4065_v36 = vld [vmem:[#allocation8_spill] sm:$0xff] }
 0x20a   : > { %2343 = vpow2.f32 %v1572_v29  ;;  %v815_v33 = vsub.f32 %v3271_v2, %v770_v55  ;;  %v816_v63 = vsub.f32 %v3275_v6, %v770_v55  ;;  %v4064_v2 = vld [vmem:[#allocation7_spill] sm:$0xff] }
 0x20b   : > { %v2332_v23 = vpop.eup %2331  ;;  %2345 = vpow2.f32 %v1582_v22 }
 0x20c   : > { %v2334_v40 = vpop.eup %2333  ;;  %v1594_v27 = vpack.c.bf16 %v2332_v23, %v2328_v37  ;;  %2347 = vpow2.f32 %v1576_v61  ;;  %v849_v12 = vmul.f32 1.442695, %v815_v33  ;;  %v851_v18 = vmul.f32 1.442695, %v816_v63 }
 0x20d   : > { %v1595_v30 = vpack.c.bf16 %v2334_v40, %v2330_v31  ;;  %v2336_v19 = vpop.eup %2335  ;;  %2349 = vpow2.f32 %v1580_v42  ;;  %v4066_v31 = vld [vmem:[#allocation6_spill] sm:$0xff] }
 0x20e   : > { %2351 = vpow2.f32 %v849_v12 }
 0x20f   : > { %1720 = vmatprep.mubr.bf16.mxu1 %v1595_v30  ;;  %v2338_v48 = vpop.eup %2337 }
 0x210   : > { %1721 = vmatmul.mubr.bf16.gmra.mrb[20].mxu1 %v1594_v27  ;;  %v1597_v14 = vpack.c.bf16 %v2336_v19, %v2338_v48  ;;  %v2340_v53 = vpop.eup %2339  ;;  %v4067_v27 = vld [vmem:[#allocation5_spill] sm:$0xff] }
 0x212   : > { %1728 = vmatprep.mubr.bf16.mxu1 %v1597_v14 }
 0x213   : > { %v2342_v59 = vpop.eup %2341 }
 0x214   : > { %v2344_v9 = vpop.eup %2343 }
 0x215   : > { %v2346_v45 = vpop.eup %2345  ;;  %v1596_v32 = vpack.c.bf16 %v2344_v9, %v2340_v53 }
 0x216   : > { %v1599_v16 = vpack.c.bf16 %v2346_v45, %v2342_v59  ;;  %v2348_v8 = vpop.eup %2347 }
 0x217   : > { %v2350_v43 = vpop.eup %2349 }
 0x218   : > { %1729 = vmatmul.mubr.bf16.gmra.mrb[24].mxu1 %v1596_v32  ;;  %v1598_v13 = vpack.c.bf16 %v2350_v43, %v2348_v8  ;;  %v2352_v14 = vpop.eup %2351 }
 0x219   : > { %1736 = vmatprep.mubr.bf16.mxu1 %v1599_v16 }
 0x220   : > { %1737 = vmatmul.mubr.bf16.gmra.mrb[28].mxu1 %v1598_v13 }
 0x24c   : > { %v767_v58 = vpop.xlane.xlu0 %766 }
 0x24d   : > { %v813_v0 = vsub.f32 %v3323_v4, %v767_v58  ;;  %v814_v5 = vsub.f32 %v3331_v20, %v767_v58 }
 0x24f   : > { %v845_v50 = vmul.f32 1.442695, %v813_v0  ;;  %v847_v38 = vmul.f32 1.442695, %v814_v5 }
 0x250   : > { %v773_v56 = vpop.xlane.xlu0 %772 }
 0x251   : > { %2353 = vpow2.f32 %v845_v50  ;;  %v817_v10 = vsub.f32 %v3313_v47, %v773_v56  ;;  %v818_v57 = vsub.f32 %v4063_v17, %v773_v56 }
 0x252   : > { %v776_v28 = vpop.xlane.xlu1 %775  ;;  %2355 = vpow2.f32 %v847_v38 }
 0x253   : > { %v819_v6 = vsub.f32 %v4064_v2, %v776_v28  ;;  %v820_v29 = vsub.f32 %v4065_v36, %v776_v28  ;;  %2357 = vpow2.f32 %v851_v18  ;;  %v855_v22 = vmul.f32 1.442695, %v818_v57  ;;  %v4069_v18 = vld [vmem:[#allocation9_spill] sm:$0xff]  ;;  %v4070_v28 = vld [vmem:[#allocation11_spill] sm:$0xff] }
 0x254   : > { %v779_v20 = vpop.xlane.xlu0 %778  ;;  %v853_v37 = vmul.f32 1.442695, %v817_v10 }
 0x255   : > { %v859_v4 = vmul.f32 1.442695, %v820_v29  ;;  %v822_v23 = vsub.f32 %v4066_v31, %v779_v20  ;;  %v857_v15 = vmul.f32 1.442695, %v819_v6  ;;  %v821_v61 = vsub.f32 %v4067_v27, %v779_v20 }
 0x257   : > { %v782_v39 = vpop.xlane.xlu1 %781  ;;  %2359 = vpow2.f32 %v859_v4  ;;  %v863_v30 = vmul.f32 1.442695, %v822_v23  ;;  %v861_v43 = vmul.f32 1.442695, %v821_v61 }
 0x258   : > { %v824_v40 = vsub.f32 %v3413_v34, %v782_v39  ;;  %2361 = vpow2.f32 %v855_v22  ;;  %v823_v42 = vsub.f32 %v3401_v52, %v782_v39  ;;  %v4068_v34 = vld [vmem:[#allocation10_spill] sm:$0xff] }
 0x259   : > { %2363 = vpow2.f32 %v853_v37 }
 0x25a   : > { %v867_v47 = vmul.f32 1.442695, %v824_v40  ;;  %v785_v19 = vpop.xlane.xlu0 %784  ;;  %v2204_v48 = vpop.f32.mrb[0].mxu1  ;;  %2365 = vpow2.f32 %v857_v15  ;;  %v865_v52 = vmul.f32 1.442695, %v823_v42 }
 0x25b   : > { %v826_v59 = vsub.f32 %v3426_v44, %v785_v19  ;;  %v2205_v9 = vpop.f32.mrb[1].mxu1  ;;  %v2354_v45 = vpop.eup %2353  ;;  %v825_v50 = vsub.f32 %v4069_v18, %v785_v19 }
 0x25c   : > { %2367 = vpow2.f32 %v867_v47  ;;  %v2207_v16 = vpop.f32.mrb[2].mxu1  ;;  %v2356_v8 = vpop.eup %2355  ;;  %v3565_v13 = vadd.f32 %v2205_v9, %v2204_v48  ;;  %v909_v63 = vpack.c.bf16 %v2352_v14, %v2354_v45 }
 0x25d   : > { %v788_v53 = vpop.xlane.xlu1 %787  ;;  %2369 = vpow2.f32 %v863_v30  ;;  %v2208_v55 = vpop.f32.mrb[3].mxu1  ;;  %v871_v12 = vmul.f32 1.442695, %v826_v59  ;;  %v869_v20 = vmul.f32 1.442695, %v825_v50 }
 0x25e   : > { %v828_v32 = vsub.f32 %v4068_v34, %v788_v53  ;;  %v2358_v33 = vpop.eup %2357  ;;  %v3567_v0 = vadd.f32 %v2208_v55, %v2207_v16  ;;  %1747 = vperm.xlu0 %2269, %v3565_v13   ;;  %2371 = vpow2.f32 %v861_v43  ;;  %v827_v10 = vsub.f32 %v4070_v28, %v788_v53 }
 0x25f   : > { %v910_v58 = vpack.c.bf16 %v2358_v33, %v2356_v8  ;;  %v791_v5 = vpop.xlane.xlu0 %790  ;;  %2373 = vpow2.f32 %v865_v52 }
 0x260   : > { %v875_v44 = vmul.f32 1.442695, %v828_v32  ;;  %1752 = vperm.xlu1 %2270, %v3567_v0   ;;  %2375 = vpow2.f32 %v871_v12  ;;  %v830_v2 = vsub.f32 %v3460_v46, %v791_v5  ;;  %v873_v15 = vmul.f32 1.442695, %v827_v10 }
 0x261   : > { %1053 = vmatprep.mubr.bf16.mxu0 %v910_v58  ;;  %v2360_v56 = vpop.eup %2359 }
 0x262   : > { %v794_v38 = vpop.xlane.xlu1 %793  ;;  %1054 = vmatmul.mubr.bf16.vlgmr.msra.gmra.mrb[0].mxu0 %v909_v63  ;;  %v2210_v17 = vpop.f32.mrb[4].mxu1  ;;  %2377 = vpow2.f32 %v875_v44  ;;  %v879_v47 = vmul.f32 1.442695, %v830_v2 }
 0x263   : > { %v2362_v57 = vpop.eup %2361  ;;  %v2211_v6 = vpop.f32.mrb[5].mxu1  ;;  %v832_v29 = vsub.f32 %v3471_v1, %v794_v38  ;;  %2379 = vpow2.f32 %v869_v20  ;;  %v829_v1 = vsub.f32 %v3450_v25, %v791_v5  ;;  %v831_v48 = vsub.f32 %v3466_v3, %v794_v38 }
 0x264   : > { %v2364_v36 = vpop.eup %2363  ;;  %v2213_v4 = vpop.f32.mrb[6].mxu1  ;;  %v912_v37 = vpack.c.bf16 %v2360_v56, %v2362_v57  ;;  %v3575_v39 = vadd.f32 %v2211_v6, %v2210_v17  ;;  %2381 = vpow2.f32 %v873_v15 }
 0x265   : > { %v2366_v22 = vpop.eup %2365  ;;  %v2214_v31 = vpop.f32.mrb[7].mxu1  ;;  %v883_v46 = vmul.f32 1.442695, %v832_v29  ;;  %2383 = vpow2.f32 %v879_v47  ;;  %v877_v16 = vmul.f32 1.442695, %v829_v1 }
 0x266   : > { %v2368_v23 = vpop.eup %2367  ;;  %1061 = vmatprep.mubr.bf16.mxu0 %v912_v37  ;;  %v3577_v27 = vadd.f32 %v2214_v31, %v2213_v4  ;;  %1757 = vperm.xlu1 %2270, %v3575_v39   ;;  %v797_v61 = vpop.xlane.xlu0 %796  ;;  %v911_v30 = vpack.c.bf16 %v2366_v22, %v2364_v36  ;;  %v881_v55 = vmul.f32 1.442695, %v831_v48 }
 0x267   : > { %v2370_v40 = vpop.eup %2369  ;;  %v800_v19 = vpop.xlane.xlu1 %799  ;;  %v834_v59 = vsub.f32 %v3483_v24, %v797_v61  ;;  %2385 = vpow2.f32 %v883_v46  ;;  %v833_v58 = vsub.f32 %v3479_v60, %v797_v61 }
 0x268   : > { %v914_v42 = vpack.c.bf16 %v2368_v23, %v2370_v40  ;;  %v2372_v53 = vpop.eup %2371  ;;  %v836_v34 = vsub.f32 %v3493_v41, %v800_v19  ;;  %2387 = vpow2.f32 %v877_v16  ;;  %v835_v5 = vsub.f32 %v3487_v49, %v800_v19 }
 0x269   : > { %v2374_v45 = vpop.eup %2373  ;;  %v887_v52 = vmul.f32 1.442695, %v834_v59  ;;  %2389 = vpow2.f32 %v881_v55  ;;  %v885_v2 = vmul.f32 1.442695, %v833_v58 }
 0x26a   : > { %1062 = vmatmul.mubr.bf16.gmra.mrb[4].mxu0 %v911_v30  ;;  %v2216_v14 = vpop.f32.mrb[8].mxu1  ;;  %1762 = vperm.xlu1 %2270, %v3577_v27   ;;  %v2376_v32 = vpop.eup %2375  ;;  %v891_v24 = vmul.f32 1.442695, %v836_v34  ;;  %v913_v12 = vpack.c.bf16 %v2374_v45, %v2372_v53  ;;  %v889_v36 = vmul.f32 1.442695, %v835_v5 }
 0x26b   : > { %1069 = vmatprep.mubr.bf16.mxu0 %v914_v42  ;;  %v2217_v9 = vpop.f32.mrb[9].mxu1  ;;  %v803_v63 = vpop.xlane.xlu0 %802  ;;  %2391 = vpow2.f32 %v887_v52 }
 0x26c   : > { %v2219_v25 = vpop.f32.mrb[10].mxu1  ;;  %v3585_v8 = vadd.f32 %v2217_v9, %v2216_v14  ;;  %v2378_v43 = vpop.eup %2377  ;;  %v838_v38 = vsub.f32 %v3503_v11, %v803_v63  ;;  %2393 = vpow2.f32 %v891_v24  ;;  %v837_v37 = vsub.f32 %v3499_v21, %v803_v63 }
 0x26d   : > { %v2220_v3 = vpop.f32.mrb[11].mxu1  ;;  %v806_v41 = vpop.xlane.xlu1 %805  ;;  %v916_v44 = vpack.c.bf16 %v2378_v43, %v2376_v32  ;;  %2395 = vpow2.f32 %v885_v2 }
 0x26e   : > { %v3587_v33 = vadd.f32 %v2220_v3, %v2219_v25  ;;  %1767 = vperm.xlu1 %2270, %v3585_v8   ;;  %v2380_v50 = vpop.eup %2379  ;;  %v840_v10 = vsub.f32 %v3511_v54, %v806_v41  ;;  %v895_v4 = vmul.f32 1.442695, %v838_v38  ;;  %2397 = vpow2.f32 %v889_v36 }
 0x26f   : > { %v2382_v28 = vpop.eup %2381  ;;  %v809_v22 = vpop.xlane.xlu0 %808  ;;  %v839_v23 = vsub.f32 %v3507_v26, %v806_v41  ;;  %v893_v30 = vmul.f32 1.442695, %v837_v37 }
 0x270   : > { %v2384_v57 = vpop.eup %2383  ;;  %v899_v11 = vmul.f32 1.442695, %v840_v10  ;;  %v915_v20 = vpack.c.bf16 %v2382_v28, %v2380_v50  ;;  %2399 = vpow2.f32 %v895_v4  ;;  %v842_v40 = vsub.f32 %v3525_v7, %v809_v22 }
 0x271   : > { %v2386_v6 = vpop.eup %2385  ;;  %v812_v54 = vpop.xlane.xlu1 %811  ;;  %v897_v1 = vmul.f32 1.442695, %v839_v23  ;;  %v841_v14 = vsub.f32 %v3521_v51, %v809_v22 }
 0x272   : > { %1070 = vmatmul.mubr.bf16.gmra.mrb[8].mxu0 %v913_v12  ;;  %v2222_v18 = vpop.f32.mrb[12].mxu1  ;;  %1772 = vperm.xlu1 %2270, %v3587_v33   ;;  %v918_v31 = vpack.c.bf16 %v2386_v6, %v2384_v57  ;;  %v2388_v15 = vpop.eup %2387  ;;  %2401 = vpow2.f32 %v899_v11  ;;  %v844_v46 = vsub.f32 %v3535_v62, %v812_v54  ;;  %v903_v19 = vmul.f32 1.442695, %v842_v40 }
 0x273   : > { %1077 = vmatprep.mubr.bf16.mxu0 %v916_v44  ;;  %v2223_v56 = vpop.f32.mrb[13].mxu1  ;;  %v2390_v47 = vpop.eup %2389  ;;  %2403 = vpow2.f32 %v893_v30  ;;  %v843_v53 = vsub.f32 %v3531_v35, %v812_v54  ;;  %v901_v45 = vmul.f32 1.442695, %v841_v14 }
 0x274   : > { %v3595_v60 = vadd.f32 %v2223_v56, %v2222_v18  ;;  %v2225_v17 = vpop.f32.mrb[14].mxu1  ;;  %v907_v42 = vmul.f32 1.442695, %v844_v46  ;;  %v917_v48 = vpack.c.bf16 %v2390_v47, %v2388_v15  ;;  %2405 = vpow2.f32 %v897_v1 }
 0x275   : > { %v2226_v49 = vpop.f32.mrb[15].mxu1  ;;  %v2392_v61 = vpop.eup %2391  ;;  %2407 = vpow2.f32 %v903_v19  ;;  %v905_v34 = vmul.f32 1.442695, %v843_v53 }
 0x276   : > { %v3597_v29 = vadd.f32 %v2226_v49, %v2225_v17  ;;  %1777 = vperm.xlu1 %2270, %v3595_v60   ;;  %v2394_v21 = vpop.eup %2393  ;;  %2409 = vpow2.f32 %v907_v42 }
 0x277   : > { %v920_v26 = vpack.c.bf16 %v2394_v21, %v2392_v61  ;;  %v2396_v7 = vpop.eup %2395  ;;  %2411 = vpow2.f32 %v901_v45 }
 0x278   : > { %v2398_v59 = vpop.eup %2397  ;;  %2413 = vpow2.f32 %v905_v34 }
 0x279   : > { %v919_v25 = vpack.c.bf16 %v2398_v59, %v2396_v7 }
 0x27a   : > { %1078 = vmatmul.mubr.bf16.gmra.mrb[12].mxu0 %v915_v20  ;;  %1782 = vperm.xlu1 %2270, %v3597_v29   ;;  %v2400_v62 = vpop.eup %2399 }
 0x27b   : > { %1085 = vmatprep.mubr.bf16.mxu0 %v918_v31 }
 0x27c   : > { %v2402_v9 = vpop.eup %2401 }
 0x27d   : > { %v922_v32 = vpack.c.bf16 %v2402_v9, %v2400_v62  ;;  %v2404_v16 = vpop.eup %2403 }
 0x27e   : > { %v2406_v51 = vpop.eup %2405 }
 0x27f   : > { %v2408_v3 = vpop.eup %2407  ;;  %v921_v55 = vpack.c.bf16 %v2406_v51, %v2404_v16 }
 0x280   : > { %v2410_v43 = vpop.eup %2409 }
 0x281   : > { %v924_v35 = vpack.c.bf16 %v2410_v43, %v2408_v3  ;;  %v2412_v52 = vpop.eup %2411 }
 0x282   : > { %1086 = vmatmul.mubr.bf16.gmra.mrb[16].mxu0 %v917_v48  ;;  %v2414_v24 = vpop.eup %2413 }
 0x283   : > { %1093 = vmatprep.mubr.bf16.mxu0 %v920_v26  ;;  %v923_v63 = vpack.c.bf16 %v2414_v24, %v2412_v52 }
 0x28a   : > { %1094 = vmatmul.mubr.bf16.gmra.mrb[20].mxu0 %v919_v25 }
 0x28b   : > { %1101 = vmatprep.mubr.bf16.mxu0 %v922_v32 }
 0x292   : > { %1102 = vmatmul.mubr.bf16.gmra.mrb[24].mxu0 %v921_v55 }
 0x293   : > { %1109 = vmatprep.mubr.bf16.mxu0 %v924_v35 }
 0x29a   : > { %1110 = vmatmul.mubr.bf16.gmra.mrb[28].mxu0 %v923_v63 }
 0x29c   : > { %v2228_v12 = vpop.f32.mrb[16].mxu1 }
 0x29d   : > { %v2229_v58 = vpop.f32.mrb[17].mxu1 }
 0x29e   : > { %v3607_v41 = vadd.f32 %v2229_v58, %v2228_v12  ;;  %v2231_v44 = vpop.f32.mrb[18].mxu1 }
 0x29f   : > { %v2232_v5 = vpop.f32.mrb[19].mxu1 }
 0x2a0   : > { %v3609_v18 = vadd.f32 %v2232_v5, %v2231_v44  ;;  %1787 = vperm.xlu1 %2270, %v3607_v41  }
 0x2a2   : > { %1792 = vperm.xlu0 %2269, %v3609_v18  }
 0x2df   : > { %v1753_v9 = vpop.permute.xlu1 %1752 }
 0x2e3   : > { %v2234_v50 = vpop.f32.mrb[20].mxu1 }
 0x2e4   : > { %v2235_v38 = vpop.f32.mrb[21].mxu1 }
 0x2e5   : > { %v3613_v56 = vadd.f32 %v2235_v38, %v2234_v50  ;;  %v2237_v28 = vpop.f32.mrb[22].mxu1  ;;  %v1758_v51 = vpop.permute.xlu1 %1757 }
 0x2e6   : > { %v2238_v10 = vpop.f32.mrb[23].mxu1 }
 0x2e7   : > { %v3615_v17 = vadd.f32 %v2238_v10, %v2237_v28  ;;  %1797 = vperm.xlu1 %2270, %v3613_v56  }
 0x2e9   : > { %1802 = vperm.xlu0 %2269, %v3615_v17   ;;  %v1763_v35 = vpop.permute.xlu1 %1762 }
 0x2eb   : > { %v2240_v57 = vpop.f32.mrb[24].mxu1 }
 0x2ec   : > { %v2241_v2 = vpop.f32.mrb[25].mxu1 }
 0x2ed   : > { %v3619_v49 = vadd.f32 %v2241_v2, %v2240_v57  ;;  %v2243_v6 = vpop.f32.mrb[26].mxu1  ;;  %v1768_v58 = vpop.permute.xlu1 %1767 }
 0x2ee   : > { %v2244_v36 = vpop.f32.mrb[27].mxu1  ;;  %v1748_v57 = vpop.permute.xlu0 %1747 }
 0x2ef   : > { %v3621_v4 = vadd.f32 %v2244_v36, %v2243_v6  ;;  %1807 = vperm.xlu1 %2270, %v3619_v49   ;;  %2415 = vrcp.f32 %v1748_v57 }
 0x2f0   : > { %2417 = vrcp.f32 %v1753_v9 }
 0x2f1   : > { %1812 = vperm.xlu0 %2269, %v3621_v4   ;;  %v1773_v2 = vpop.permute.xlu1 %1772  ;;  %2419 = vrcp.f32 %v1758_v51 }
 0x2f2   : > { %2421 = vrcp.f32 %v1763_v35 }
 0x2f3   : > { %v2246_v11 = vpop.f32.mrb[28].mxu1  ;;  %2423 = vrcp.f32 %v1768_v58 }
 0x2f4   : > { %v2247_v22 = vpop.f32.mrb[29].mxu1  ;;  %2425 = vrcp.f32 %v1773_v2 }
 0x2f5   : > { %v3625_v20 = vadd.f32 %v2247_v22, %v2246_v11  ;;  %v2249_v37 = vpop.f32.mrb[30].mxu1 }
 0x2f6   : > { %v2250_v54 = vpop.f32.mrb[31].mxu1 }
 0x2f7   : > { %v3627_v31 = vadd.f32 %v2250_v54, %v2249_v37  ;;  %1817 = vperm.xlu1 %2270, %v3625_v20   ;;  %v1778_v54 = vpop.permute.xlu1 %1777 }
 0x2f8   : > { %2427 = vrcp.f32 %v1778_v54 }
 0x2f9   : > { %1822 = vperm.xlu0 %2269, %v3627_v31  }
 0x335   : > { %v2140_v23 = vpop.f32.mrb[0].mxu0 }
 0x336   : > { %v2141_v15 = vpop.f32.mrb[1].mxu0 }
 0x337   : > { %v3631_v40 = vadd.f32 %v2141_v15, %v2140_v23  ;;  %v2143_v47 = vpop.f32.mrb[2].mxu0 }
 0x338   : > { %v2144_v46 = vpop.f32.mrb[3].mxu0 }
 0x339   : > { %v3633_v61 = vadd.f32 %v2144_v46, %v2143_v47  ;;  %1120 = vperm.xlu1 %2270, %v3631_v40   ;;  %v1783_v46 = vpop.permute.xlu1 %1782 }
 0x33a   : > { %2429 = vrcp.f32 %v1783_v46 }
 0x33b   : > { %1125 = vperm.xlu0 %2269, %v3633_v61  }
 0x33d   : > { %v2146_v30 = vpop.f32.mrb[4].mxu0 }
 0x33e   : > { %v2147_v21 = vpop.f32.mrb[5].mxu0 }
 0x33f   : > { %v3637_v1 = vadd.f32 %v2147_v21, %v2146_v30  ;;  %v2149_v19 = vpop.f32.mrb[6].mxu0 }
 0x340   : > { %v2150_v42 = vpop.f32.mrb[7].mxu0 }
 0x341   : > { %v3639_v48 = vadd.f32 %v2150_v42, %v2149_v19  ;;  %1130 = vperm.xlu1 %2270, %v3637_v1   ;;  %v2416_v19 = vpop.eup %2415 }
 0x343   : > { %1135 = vperm.xlu0 %2269, %v3639_v48  }
 0x345   : > { %v2152_v26 = vpop.f32.mrb[8].mxu0 }
 0x346   : > { %v2153_v14 = vpop.f32.mrb[9].mxu0 }
 0x347   : > { %v3643_v7 = vadd.f32 %v2153_v14, %v2152_v26  ;;  %v2155_v53 = vpop.f32.mrb[10].mxu0  ;;  %v2418_v14 = vpop.eup %2417 }
 0x348   : > { %v2156_v59 = vpop.f32.mrb[11].mxu0  ;;  %v2420_v9 = vpop.eup %2419 }
 0x349   : > { %v3645_v62 = vadd.f32 %v2156_v59, %v2155_v53  ;;  %1140 = vperm.xlu1 %2270, %v3643_v7   ;;  %v1788_v53 = vpop.permute.xlu1 %1787  ;;  %v1826_v59 = vmul.f32 %v2416_v19, %v3565_v13  ;;  %v1830_v51 = vmul.f32 %v2420_v9, %v3575_v39 }
 0x34a   : > { %2431 = vrcp.f32 %v1788_v53 }
 0x34b   : > { %1145 = vperm.xlu0 %2269, %v3645_v62  }
 0x34d   : > { %v2158_v45 = vpop.f32.mrb[12].mxu0 }
 0x34e   : > { %v2159_v34 = vpop.f32.mrb[13].mxu0 }
 0x34f   : > { %v3649_v25 = vadd.f32 %v2159_v34, %v2158_v45  ;;  %v2161_v32 = vpop.f32.mrb[14].mxu0  ;;  %v1793_v45 = vpop.permute.xlu0 %1792  ;;  %v1828_v34 = vmul.f32 %v2418_v14, %v3567_v0 }
 0x350   : > { %v2162_v16 = vpop.f32.mrb[15].mxu0  ;;  %2433 = vrcp.f32 %v1793_v45 }
 0x351   : > { %v3651_v3 = vadd.f32 %v2162_v16, %v2161_v32  ;;  %1150 = vperm.xlu1 %2270, %v3649_v25   ;;  %v2422_v32 = vpop.eup %2421 }
 0x352   : > { %v1832_v13 = vmul.f32 %v2422_v32, %v3577_v27 }
 0x353   : > { %1155 = vperm.xlu0 %2269, %v3651_v3  }
 0x355   : > { %v2164_v43 = vpop.f32.mrb[16].mxu0 }
 0x356   : > { %v2165_v55 = vpop.f32.mrb[17].mxu0 }
 0x357   : > { %v3655_v52 = vadd.f32 %v2165_v55, %v2164_v43  ;;  %v2167_v24 = vpop.f32.mrb[18].mxu0  ;;  %v2424_v43 = vpop.eup %2423 }
 0x358   : > { %v2168_v63 = vpop.f32.mrb[19].mxu0  ;;  %v2426_v35 = vpop.eup %2425  ;;  %v1834_v0 = vmul.f32 %v2424_v43, %v3585_v8 }
 0x359   : > { %v3657_v12 = vadd.f32 %v2168_v63, %v2167_v24  ;;  %1160 = vperm.xlu1 %2270, %v3655_v52   ;;  %v2428_v63 = vpop.eup %2427  ;;  %v1836_v39 = vmul.f32 %v2426_v35, %v3587_v33 }
 0x35a   : > { %v1838_v27 = vmul.f32 %v2428_v63, %v3595_v60 }
 0x35b   : > { %1165 = vperm.xlu0 %2269, %v3657_v12  }
 0x35d   : > { %v2170_v44 = vpop.f32.mrb[20].mxu0 }
 0x35e   : > { %v2171_v5 = vpop.f32.mrb[21].mxu0 }
 0x35f   : > { %v3661_v50 = vadd.f32 %v2171_v5, %v2170_v44  ;;  %v2173_v38 = vpop.f32.mrb[22].mxu0  ;;  %v2430_v44 = vpop.eup %2429 }
 0x360   : > { %v2174_v28 = vpop.f32.mrb[23].mxu0  ;;  %v1840_v8 = vmul.f32 %v2430_v44, %v3597_v29 }
 0x361   : > { %v3663_v10 = vadd.f32 %v2174_v28, %v2173_v38  ;;  %1170 = vperm.xlu1 %2270, %v3661_v50   ;;  %v2432_v38 = vpop.eup %2431 }
 0x362   : > { %v2434_v57 = vpop.eup %2433  ;;  %v1842_v33 = vmul.f32 %v2432_v38, %v3607_v41 }
 0x363   : > { %1175 = vperm.xlu0 %2269, %v3663_v10  }
 0x365   : > { %v2176_v6 = vpop.f32.mrb[24].mxu0 }
 0x366   : > { %v2177_v36 = vpop.f32.mrb[25].mxu0  ;;  %v1798_v16 = vpop.permute.xlu1 %1797 }
 0x367   : > { %v3667_v11 = vadd.f32 %v2177_v36, %v2176_v6  ;;  %v2179_v22 = vpop.f32.mrb[26].mxu0  ;;  %2435 = vrcp.f32 %v1798_v16  ;;  %v1844_v6 = vmul.f32 %v2434_v57, %v3609_v18  ;;  %v1963_v57 = vld [vmem:[%s3719_s27 + $0x10] sm:$0xff] }
 0x368   : > { %v2180_v37 = vpop.f32.mrb[27].mxu0  ;;  %v1803_v55 = vpop.permute.xlu0 %1802 }
 0x369   : > { %v3669_v23 = vadd.f32 %v2180_v37, %v2179_v22  ;;  %1180 = vperm.xlu1 %2270, %v3667_v11   ;;  %2437 = vrcp.f32 %v1803_v55  ;;  %v3725_v55 = vld [vmem:[%s3837_s4] ss:$0 sm:$0xff] }
 0x36b   : > { %1185 = vperm.xlu0 %2269, %v3669_v23  }
 0x36d   : > { %v2182_v15 = vpop.f32.mrb[28].mxu0 }
 0x36e   : > { %v2183_v47 = vpop.f32.mrb[29].mxu0  ;;  %v1808_v24 = vpop.permute.xlu1 %1807 }
 0x36f   : > { %v3673_v30 = vadd.f32 %v2183_v47, %v2182_v15  ;;  %v2185_v21 = vpop.f32.mrb[30].mxu0  ;;  %2439 = vrcp.f32 %v1808_v24  ;;  %v1961_v24 = vld [vmem:[%s3719_s27] sm:$0xff] }
 0x370   : > { %v2186_v42 = vpop.f32.mrb[31].mxu0  ;;  %v1813_v58 = vpop.permute.xlu0 %1812 }
 0x371   : > { %v3675_v26 = vadd.f32 %v2186_v42, %v2185_v21  ;;  %1190 = vperm.xlu1 %2270, %v3673_v30   ;;  %2441 = vrcp.f32 %v1813_v58  ;;  %v2436_v2 = vpop.eup %2435 }
 0x372   : > { %v1846_v36 = vmul.f32 %v2436_v2, %v3613_v56 }
 0x373   : > { %1195 = vperm.xlu0 %2269, %v3675_v26   ;;  %v2438_v60 = vpop.eup %2437 }
 0x374   : > { %v1848_v29 = vmul.f32 %v2438_v60, %v3615_v17 }
 0x375   : > { %1873 = vrot.lane.b32.xlu1 %v1826_v59, %s2491_s23 }
 0x376   : > { %v1818_v5 = vpop.permute.xlu1 %1817 }
 0x377   : > { %1875 = vrot.lane.b32.xlu0 %v1828_v34, %s2491_s23  ;;  %2443 = vrcp.f32 %v1818_v5 }
 0x378   : > { %v1823_v28 = vpop.permute.xlu0 %1822 }
 0x379   : > { %1877 = vrot.lane.b32.xlu1 %v1830_v51, %s2491_s23  ;;  %2445 = vrcp.f32 %v1823_v28  ;;  %v2440_v22 = vpop.eup %2439 }
 0x37a   : > { %v1850_v41 = vmul.f32 %v2440_v22, %v3619_v49  ;;  %v1964_v22 = vld [vmem:[%s3719_s27 + $0x18] sm:$0xff] }
 0x37b   : > { %1879 = vrot.lane.b32.xlu0 %v1832_v13, %s2491_s23  ;;  %v2442_v37 = vpop.eup %2441 }
 0x37c   : > { %v1852_v18 = vmul.f32 %v2442_v37, %v3621_v4 }
 0x37d   : > { %1881 = vrot.lane.b32.xlu1 %v1834_v0, %s2491_s23 }
 0x37f   : > { %1883 = vrot.lane.b32.xlu0 %v1836_v39, %s2491_s23 }
 0x381   : > { %1885 = vrot.lane.b32.xlu1 %v1838_v27, %s2491_s23  ;;  %v2444_v54 = vpop.eup %2443 }
 0x382   : > { %v1854_v56 = vmul.f32 %v2444_v54, %v3625_v20 }
 0x383   : > { %1887 = vrot.lane.b32.xlu0 %v1840_v8, %s2491_s23  ;;  %v2446_v15 = vpop.eup %2445 }
 0x384   : > { %v1856_v47 = vmul.f32 %v2446_v15, %v3627_v31  ;;  %v1965_v15 = vld [vmem:[%s3719_s27 + $0x20] sm:$0xff] }
 0x385   : > { %1889 = vrot.lane.b32.xlu1 %v1842_v33, %s2491_s23 }
 0x387   : > { %1891 = vrot.lane.b32.xlu0 %v1844_v6, %s2491_s23 }
 0x389   : > { %1893 = vrot.lane.b32.xlu1 %v1846_v36, %s2491_s23 }
 0x38b   : > { %1895 = vrot.lane.b32.xlu0 %v1848_v29, %s2491_s23 }
 0x38d   : > { %1897 = vrot.lane.b32.xlu1 %v1850_v41, %s2491_s23 }
 0x38f   : > { %1899 = vrot.lane.b32.xlu0 %v1852_v18, %s2491_s23 }
 0x391   : > { %1901 = vrot.lane.b32.xlu1 %v1854_v56, %s2491_s23 }
 0x393   : > { %1903 = vrot.lane.b32.xlu0 %v1856_v47, %s2491_s23 }
 0x3b8   : > { %v1121_v17 = vpop.permute.xlu1 %1120 }
 0x3b9   : > { %2447 = vrcp.f32 %v1121_v17 }
 0x3ba   : > { %v1126_v46 = vpop.permute.xlu0 %1125 }
 0x3bb   : > { %2449 = vrcp.f32 %v1126_v46 }
 0x3c0   : > { %v1131_v21 = vpop.permute.xlu1 %1130 }
 0x3c1   : > { %2451 = vrcp.f32 %v1131_v21 }
 0x3c2   : > { %v1136_v49 = vpop.permute.xlu0 %1135 }
 0x3c3   : > { %2453 = vrcp.f32 %v1136_v49  ;;  %v2448_v34 = vpop.eup %2447  ;;  %v1966_v49 = vld [vmem:[%s3719_s27 + $0x28] sm:$0xff] }
 0x3c4   : > { %v1199_v43 = vmul.f32 %v2448_v34, %v3631_v40  ;;  %v1962_v40 = vld [vmem:[%s3719_s27 + $0x8] sm:$0xff] }
 0x3c5   : > { %v2450_v16 = vpop.eup %2449 }
 0x3c6   : > { %v1201_v63 = vmul.f32 %v2450_v16, %v3633_v61  ;;  %v1968_v16 = vld [vmem:[%s3719_s27 + $0x38] sm:$0xff] }
 0x3c8   : > { %v1141_v19 = vpop.permute.xlu1 %1140 }
 0x3c9   : > { %2455 = vrcp.f32 %v1141_v19 }
 0x3ca   : > { %v1146_v42 = vpop.permute.xlu0 %1145 }
 0x3cb   : > { %2457 = vrcp.f32 %v1146_v42  ;;  %v2452_v13 = vpop.eup %2451 }
 0x3cc   : > { %v1203_v27 = vmul.f32 %v2452_v13, %v3637_v1 }
 0x3cd   : > { %v2454_v58 = vpop.eup %2453 }
 0x3ce   : > { %v1205_v2 = vmul.f32 %v2454_v58, %v3639_v48 }
 0x3d0   : > { %v1151_v14 = vpop.permute.xlu1 %1150 }
 0x3d1   : > { %2459 = vrcp.f32 %v1151_v14 }
 0x3d2   : > { %v1156_v53 = vpop.permute.xlu0 %1155 }
 0x3d3   : > { %2461 = vrcp.f32 %v1156_v53  ;;  %v2456_v38 = vpop.eup %2455 }
 0x3d4   : > { %v1207_v37 = vmul.f32 %v2456_v38, %v3643_v7 }
 0x3d5   : > { %v2458_v6 = vpop.eup %2457 }
 0x3d6   : > { %v1209_v47 = vmul.f32 %v2458_v6, %v3645_v62 }
 0x3d8   : > { %v1161_v4 = vpop.permute.xlu1 %1160 }
 0x3d9   : > { %2463 = vrcp.f32 %v1161_v4 }
 0x3da   : > { %v1166_v59 = vpop.permute.xlu0 %1165 }
 0x3db   : > { %2465 = vrcp.f32 %v1166_v59  ;;  %v2460_v41 = vpop.eup %2459  ;;  %v1967_v59 = vld [vmem:[%s3719_s27 + $0x30] sm:$0xff] }
 0x3dc   : > { %v1211_v42 = vmul.f32 %v2460_v41, %v3649_v25 }
 0x3dd   : > { %v2462_v17 = vpop.eup %2461 }
 0x3e0   : > { %v1171_v20 = vpop.permute.xlu1 %1170 }
 0x3e1   : > { %2467 = vrcp.f32 %v1171_v20 }
 0x3e2   : > { %v1176_v9 = vpop.permute.xlu0 %1175 }
 0x3e3   : > { %2469 = vrcp.f32 %v1176_v9  ;;  %v2464_v14 = vpop.eup %2463  ;;  %v1213_v9 = vmul.f32 %v2462_v17, %v3651_v3  ;;  %v1974_v17 = vld [vmem:[%s3719_s27 + $0x68] sm:$0xff] }
 0x3e4   : > { %v1215_v13 = vmul.f32 %v2464_v14, %v3655_v52 }
 0x3e8   : > { %v1181_v31 = vpop.permute.xlu1 %1180 }
 0x3e9   : > { %2471 = vrcp.f32 %v1181_v31  ;;  %v2466_v31 = vpop.eup %2465 }
 0x3ea   : > { %v1186_v45 = vpop.permute.xlu0 %1185  ;;  %v1217_v58 = vmul.f32 %v2466_v31, %v3657_v12 }
 0x3eb   : > { %2473 = vrcp.f32 %v1186_v45 }
 0x3f0   : > { %v3711_v32 = vpop.permute.xlu1 %1190 }
 0x3f1   : > { %2475 = vrcp.f32 %v3711_v32 }
 0x3f2   : > { %v3713_v51 = vpop.permute.xlu0 %1195 }
 0x3f3   : > { %2477 = vrcp.f32 %v3713_v51 }
 0x3f4   : > { %v1874_v35 = vpop.permute.xlu1 %1873 }
 0x3f5   : > { %v1922_v0 = vsel %vm1921_vm12, %v1199_v43, %v1874_v35  ;;  %v2468_v35 = vpop.eup %2467 }
 0x3f6   : > { %v1945_v39 = vadd.f32 %v3725_v55, %v1922_v0  ;;  %v1876_v44 = vpop.permute.xlu0 %1875  ;;  %v1969_v0 = vld [vmem:[%s3719_s27 + $0x40] sm:$0xff] }
 0x3f7   : > { %v1923_v5 = vsel %vm1921_vm12, %v1201_v63, %v1876_v44 }
 0x3f8   : > { %v1977_v61 = vadd.f32 %v1961_v24, %v1945_v39  ;;  %v1946_v28 = vadd.f32 %v3725_v55, %v1923_v5  ;;  %v1878_v8 = vpop.permute.xlu1 %1877  ;;  %v2470_v39 = vpop.eup %2469 }
 0x3f9   : > { %v1924_v33 = vsel %vm1921_vm12, %v1203_v27, %v1878_v8  ;;  %v1219_v27 = vmul.f32 %v2468_v35, %v3661_v50  ;;  %v2472_v38 = vpop.eup %2471  ;;  %v1971_v8 = vld [vmem:[%s3719_s27 + $0x50] sm:$0xff] }
 0x3fa   : > { %1994 = vst.msk [vmem:[%s3735_s8] sm:$0xff] %vm1993_vm13, %v1977_v61  ;;  %v1978_v60 = vadd.f32 %v1962_v40, %v1946_v28  ;;  %v1947_v1 = vadd.f32 %v3725_v55, %v1924_v33  ;;  %v1880_v36 = vpop.permute.xlu0 %1879  ;;  %v1970_v40 = vld [vmem:[%s3719_s27 + $0x48] sm:$0xff]  ;;  %v1221_v33 = vmul.f32 %v2470_v39, %v3663_v10 }
 0x3fb   : > { %v1925_v29 = vsel %vm1921_vm12, %v1205_v2, %v1880_v36  ;;  %v2474_v2 = vpop.eup %2473 }
 0x3fc   : > { %1995 = vst.msk [vmem:[%s3735_s8 + $0x8] sm:$0xff] %vm1993_vm13, %v1978_v60  ;;  %v1979_v48 = vadd.f32 %v1963_v57, %v1947_v1  ;;  %v1948_v54 = vadd.f32 %v3725_v55, %v1925_v29  ;;  %v1882_v18 = vpop.permute.xlu1 %1881  ;;  %v1972_v1 = vld [vmem:[%s3719_s27 + $0x58] sm:$0xff]  ;;  %v2476_v29 = vpop.eup %2475 }
 0x3fd   : > { %v1926_v56 = vsel %vm1921_vm12, %v1207_v37, %v1882_v18  ;;  %v1225_v18 = vmul.f32 %v2474_v2, %v3669_v23 }
 0x3fe   : > { %1996 = vst.msk [vmem:[%s3735_s8 + $0x10] sm:$0xff] %vm1993_vm13, %v1979_v48  ;;  %v1980_v7 = vadd.f32 %v1964_v22, %v1948_v54  ;;  %v1949_v46 = vadd.f32 %v3725_v55, %v1926_v56  ;;  %v1884_v21 = vpop.permute.xlu0 %1883  ;;  %v1223_v22 = vmul.f32 %v2472_v38, %v3667_v11  ;;  %v1973_v48 = vld [vmem:[%s3719_s27 + $0x60] sm:$0xff] }
 0x3ff   : > { %v1927_v19 = vsel %vm1921_vm12, %v1209_v47, %v1884_v21 }
 0x400   : > { %1997 = vst.msk [vmem:[%s3735_s8 + $0x18] sm:$0xff] %vm1993_vm13, %v1980_v7  ;;  %v1981_v62 = vadd.f32 %v1965_v15, %v1949_v46  ;;  %v1950_v53 = vadd.f32 %v3725_v55, %v1927_v19  ;;  %v1886_v4 = vpop.permute.xlu1 %1885  ;;  %v2478_v15 = vpop.eup %2477  ;;  %v1227_v46 = vmul.f32 %v2476_v29, %v3673_v30  ;;  %v1975_v19 = vld [vmem:[%s3719_s27 + $0x70] sm:$0xff]  ;;  %v1976_v30 = vld [vmem:[%s3719_s27 + $0x78] sm:$0xff] }
 0x401   : > { %v1928_v20 = vsel %vm1921_vm12, %v1211_v42, %v1886_v4  ;;  %v1229_v14 = vmul.f32 %v2478_v15, %v3675_v26 }
 0x402   : > { %1998 = vst.msk [vmem:[%s3735_s8 + $0x20] sm:$0xff] %vm1993_vm13, %v1981_v62  ;;  %v1982_v25 = vadd.f32 %v1966_v49, %v1950_v53  ;;  %v1951_v45 = vadd.f32 %v3725_v55, %v1928_v20  ;;  %v1888_v34 = vpop.permute.xlu0 %1887 }
 0x403   : > { %v1929_v43 = vsel %vm1921_vm12, %v1213_v9, %v1888_v34 }
 0x404   : > { %1999 = vst.msk [vmem:[%s3735_s8 + $0x28] sm:$0xff] %vm1993_vm13, %v1982_v25  ;;  %v1983_v3 = vadd.f32 %v1967_v59, %v1951_v45  ;;  %v1952_v32 = vadd.f32 %v3725_v55, %v1929_v43  ;;  %v1890_v24 = vpop.permute.xlu1 %1889 }
 0x405   : > { %v1930_v63 = vsel %vm1921_vm12, %v1215_v13, %v1890_v24 }
 0x406   : > { %2000 = vst.msk [vmem:[%s3735_s8 + $0x30] sm:$0xff] %vm1993_vm13, %v1983_v3  ;;  %v1984_v52 = vadd.f32 %v1968_v16, %v1952_v32  ;;  %v1953_v51 = vadd.f32 %v3725_v55, %v1930_v63  ;;  %v1892_v44 = vpop.permute.xlu0 %1891 }
 0x407   : > { %v1931_v5 = vsel %vm1921_vm12, %v1217_v58, %v1892_v44 }
 0x408   : > { %2001 = vst.msk [vmem:[%s3735_s8 + $0x38] sm:$0xff] %vm1993_vm13, %v1984_v52  ;;  %v1985_v61 = vadd.f32 %v1969_v0, %v1953_v51  ;;  %v1954_v12 = vadd.f32 %v3725_v55, %v1931_v5  ;;  %v1894_v28 = vpop.permute.xlu1 %1893 }
 0x409   : > { %v1932_v57 = vsel %vm1921_vm12, %v1219_v27, %v1894_v28 }
 0x40a   : > { %2002 = vst.msk [vmem:[%s3735_s8 + $0x40] sm:$0xff] %vm1993_vm13, %v1985_v61  ;;  %v1986_v6 = vadd.f32 %v1970_v40, %v1954_v12  ;;  %v1955_v50 = vadd.f32 %v3725_v55, %v1932_v57  ;;  %v1896_v60 = vpop.permute.xlu0 %1895 }
 0x40b   : > { %v1933_v36 = vsel %vm1921_vm12, %v1221_v33, %v1896_v60 }
 0x40c   : > { %2003 = vst.msk [vmem:[%s3735_s8 + $0x48] sm:$0xff] %vm1993_vm13, %v1986_v6  ;;  %v1987_v37 = vadd.f32 %v1971_v8, %v1955_v50  ;;  %v1956_v10 = vadd.f32 %v3725_v55, %v1933_v36  ;;  %v1898_v41 = vpop.permute.xlu1 %1897 }
 0x40d   : > { %v1934_v54 = vsel %vm1921_vm12, %v1223_v22, %v1898_v41 }
 0x40e   : > { %2004 = vst.msk [vmem:[%s3735_s8 + $0x50] sm:$0xff] %vm1993_vm13, %v1987_v37  ;;  %v1988_v56 = vadd.f32 %v1972_v1, %v1956_v10  ;;  %v1957_v11 = vadd.f32 %v3725_v55, %v1934_v54  ;;  %v1900_v47 = vpop.permute.xlu0 %1899 }
 0x40f   : > { %v1935_v7 = vsel %vm1921_vm12, %v1225_v18, %v1900_v47 }
 0x410   : > { %2005 = vst.msk [vmem:[%s3735_s8 + $0x58] sm:$0xff] %vm1993_vm13, %v1988_v56  ;;  %v1989_v21 = vadd.f32 %v1973_v48, %v1957_v11  ;;  %v1958_v23 = vadd.f32 %v3725_v55, %v1935_v7  ;;  %v1902_v49 = vpop.permute.xlu1 %1901 }
 0x411   : > { %v1936_v42 = vsel %vm1921_vm12, %v1227_v46, %v1902_v49 }
 0x412   : > { %2006 = vst.msk [vmem:[%s3735_s8 + $0x60] sm:$0xff] %vm1993_vm13, %v1989_v21  ;;  %v1990_v62 = vadd.f32 %v1974_v17, %v1958_v23  ;;  %v1959_v53 = vadd.f32 %v3725_v55, %v1936_v42  ;;  %v1904_v4 = vpop.permute.xlu0 %1903 }
 0x413   : > { %v1937_v59 = vsel %vm1921_vm12, %v1229_v14, %v1904_v4 }
 0x414   : > { %2007 = vst.msk [vmem:[%s3735_s8 + $0x68] sm:$0xff] %vm1993_vm13, %v1990_v62  ;;  %v1991_v20 = vadd.f32 %v1975_v19, %v1959_v53  ;;  %v1960_v9 = vadd.f32 %v3725_v55, %v1937_v59 }
 0x416   : > { %2008 = vst.msk [vmem:[%s3735_s8 + $0x70] sm:$0xff] %vm1993_vm13, %v1991_v20  ;;  %v1992_v31 = vadd.f32 %v1976_v30, %v1960_v9 }
 0x418   : > { %2009 = vst.msk [vmem:[%s3735_s8 + $0x78] sm:$0xff] %vm1993_vm13, %v1992_v31 }
 0x419 PF: > { %s16_s21 = sadd.s32 1, %s2485_s21  }
 0x41a   : > { %p13_p5 = scmp.ge.s32.totalorder %s16_s21, 4  }
 0x41c   :  { %15 = sbr.rel (!%p13_p5) target bundleno = 1 (0x1), region = 80 }

</bundles_post_ra>
